<compile_context>
chip_gen: v7x
topology: tpu7x:2x2x1
jax: 0.10.0
libtpu: 0.0.40
codegen_flags: <defaults>
</compile_context>

<pallas_src>
import jax
import jax.numpy as jnp
from jax import lax
from jax.experimental import pallas as pl
from jax.experimental.pallas import tpu as pltpu

SOS_token = 1

HIDDEN = 32       # hidden size == embedding size (as in the tutorial)
VOCAB = 64        # output vocabulary size
SEQ_LEN = 8       # encoder input length
MAX_LENGTH = 6    # greedy decode steps
LANES = 128       # slab lane width

# ---- static row offsets inside the packed (SLAB_ROWS, 128) weight slab -----
_R_EMB = 0                        # (V, H)   embedding table
_R_EF_WI = _R_EMB + VOCAB         # (H, 3H)  encoder fwd input weights
_R_EF_WH = _R_EF_WI + HIDDEN      # (H, 3H)  encoder fwd hidden weights
_R_EB_WI = _R_EF_WH + HIDDEN      # (H, 3H)  encoder bwd input weights
_R_EB_WH = _R_EB_WI + HIDDEN      # (H, 3H)  encoder bwd hidden weights
_R_D_WI = _R_EB_WH + HIDDEN       # (H, 3H)  decoder input weights
_R_D_WH = _R_D_WI + HIDDEN        # (H, 3H)  decoder hidden weights
_R_WC1 = _R_D_WH + HIDDEN         # (H, H)   concat Linear, rnn-output half
_R_WC2 = _R_WC1 + HIDDEN          # (H, H)   concat Linear, context half
_R_WO = _R_WC2 + HIDDEN           # (H, V)   out Linear
_R_BIAS = _R_WO + HIDDEN          # 8 bias rows:
#   +0 ef_bi  +1 ef_bh  +2 eb_bi  +3 eb_bh  +4 d_bi  +5 d_bh  +6 bc  +7 bo
SLAB_ROWS = _R_BIAS + 8           # = 360 (multiple of 8)

_vmem = pl.BlockSpec(memory_space=pltpu.MemorySpace.VMEM)


# ----------------------------------------------------------------------------
# GRU cell update given a PRE-COMPUTED input projection gi = x @ Wi + bi.
# PyTorch GRUCell semantics (gate order r, z, n):
#   r = sigmoid(gi_r + gh_r); z = sigmoid(gi_z + gh_z)
#   n = tanh(gi_n + r * gh_n); h' = (1 - z) * n + z * h
# r and z share one sigmoid over the first 2H lanes (one EUP push).
# ----------------------------------------------------------------------------
def _gru_from_gi(gi, h, wh, bh, hidden):
    H = hidden
    gh = jnp.dot(h, wh, preferred_element_type=jnp.float32) + bh      # (1, 3H)
    rz = jax.nn.sigmoid(gi[:, 0:2 * H] + gh[:, 0:2 * H])               # (1, 2H)
    r = rz[:, 0:H]
    z = rz[:, H:2 * H]
    n = jnp.tanh(gi[:, 2 * H:3 * H] + r * gh[:, 2 * H:3 * H])
    return (1.0 - z) * n + z * h


# ----------------------------------------------------------------------------
# One fused kernel: encoder (fwd + bwd GRU interleaved, outputs summed)
# followed by the full greedy decode feedback loop.  Both loops are statically
# unrolled (S = 8, MAX_LENGTH = 6) so the LLO scheduler sees everything.
# ----------------------------------------------------------------------------
def _make_fused_kernel(seq_len, max_length, hidden, vocab):
    def kernel(enc_emb_ref, slab_ref, tok_out_ref, score_out_ref):
        H, V, S, ML = hidden, vocab, seq_len, max_length
        H3 = 3 * H

        # --- static views into the single packed weight slab (1 DMA total) ---
        emb_tbl = slab_ref[_R_EMB:_R_EMB + V, 0:H]                    # (V, H)
        ef_wi = slab_ref[_R_EF_WI:_R_EF_WI + H, 0:H3]
        ef_wh = slab_ref[_R_EF_WH:_R_EF_WH + H, 0:H3]
        eb_wi = slab_ref[_R_EB_WI:_R_EB_WI + H, 0:H3]
        eb_wh = slab_ref[_R_EB_WH:_R_EB_WH + H, 0:H3]
        d_wi = slab_ref[_R_D_WI:_R_D_WI + H, 0:H3]
        d_wh = slab_ref[_R_D_WH:_R_D_WH + H, 0:H3]
        wc1 = slab_ref[_R_WC1:_R_WC1 + H, 0:H]
        wc2 = slab_ref[_R_WC2:_R_WC2 + H, 0:H]
        wo = slab_ref[_R_WO:_R_WO + H, 0:V]
        bias = slab_ref[_R_BIAS:_R_BIAS + 8, :]                       # (8, 128)
        ef_bi, ef_bh = bias[0:1, 0:H3], bias[1:2, 0:H3]
        eb_bi, eb_bh = bias[2:3, 0:H3], bias[3:4, 0:H3]
        d_bi, d_bh = bias[4:5, 0:H3], bias[5:6, 0:H3]
        bc, bo = bias[6:7, 0:H], bias[7:8, 0:V]

        enc_emb = enc_emb_ref[...]                                     # (S, H)

        # ---------------- Encoder: bidirectional 1-layer GRU -----------------
        # Hoisted input projections: two (S,H)@(H,3H) matmuls off the chain.
        gi_f = jnp.dot(enc_emb, ef_wi, preferred_element_type=jnp.float32) + ef_bi
        gi_b = jnp.dot(enc_emb, eb_wi, preferred_element_type=jnp.float32) + eb_bi

        h_f = jnp.zeros((1, H), jnp.float32)
        h_b = jnp.zeros((1, H), jnp.float32)
        fwd_states = [None] * S
        bwd_states = [None] * S
        # Interleave the two independent recurrences so their latencies overlap.
        for i in range(S):
            tf = i
            tb = S - 1 - i
            h_f = _gru_from_gi(gi_f[tf:tf + 1, :], h_f, ef_wh, ef_bh, H)
            h_b = _gru_from_gi(gi_b[tb:tb + 1, :], h_b, eb_wh, eb_bh, H)
            fwd_states[tf] = h_f
            bwd_states[tb] = h_b

        # outputs[:, :, :H] + outputs[:, :, H:]  (sum of the two directions)
        enc_out = jnp.concatenate(
            [fwd_states[t] + bwd_states[t] for t in range(S)], axis=0)  # (S, H)
        enc_out_t = jnp.transpose(enc_out, (1, 0))   # (H, S), transposed ONCE

        # encoder_hidden[:decoder.n_layers] with n_layers=1, bidirectional=True
        # -> forward-direction final hidden state.
        dec_hidden = h_f                                               # (1, H)

        # ---------------- Greedy decode: on-chip feedback loop ---------------
        # Fold the embedding lookup into the decoder input projection:
        # gi = onehot @ (emb_tbl @ d_wi) + d_bi  -> one matmul on the chain.
        emb_dwi = jnp.dot(emb_tbl, d_wi, preferred_element_type=jnp.float32)  # (V, 3H)

        vocab_iota = lax.broadcasted_iota(jnp.int32, (1, V), 1)
        step_iota = lax.broadcasted_iota(jnp.int32, (1, ML), 1)
        tok2d = jnp.full((1, 1), SOS_token, dtype=jnp.int32)          # decoder_input
        tokens = jnp.zeros((1, ML), jnp.int32)
        scores = jnp.zeros((1, ML), jnp.float32)

        for step in range(ML):
            onehot = (vocab_iota == tok2d).astype(jnp.float32)        # (1, V)
            gi = jnp.dot(onehot, emb_dwi,
                         preferred_element_type=jnp.float32) + d_bi   # (1, 3H)
            dec_hidden = _gru_from_gi(gi, dec_hidden, d_wh, d_bh, H)

            # Luong "dot" attention over encoder positions (no per-step relayout)
            energies = jnp.dot(dec_hidden, enc_out_t,
                               preferred_element_type=jnp.float32)    # (1, S)
            energies = energies - jnp.max(energies, axis=1, keepdims=True)
            e = jnp.exp(energies)
            attn = e * pl.reciprocal(jnp.sum(e, axis=1, keepdims=True),
                                     approx=False)                    # softmax(dim=1)
            context = jnp.dot(attn, enc_out,
                              preferred_element_type=jnp.float32)     # (1, H)

            # tanh(cat([rnn_output, context]) @ Wc + bc)  (Wc split -> no concat)
            concat_out = jnp.tanh(
                jnp.dot(dec_hidden, wc1, preferred_element_type=jnp.float32)
                + jnp.dot(context, wc2, preferred_element_type=jnp.float32)
                + bc)                                                  # (1, H)
            logits = jnp.dot(concat_out, wo,
                             preferred_element_type=jnp.float32) + bo  # (1, V)

            # torch.max(softmax(logits), dim=1):
            #   argmax first (the only thing on the token-feedback path),
            #   score = max prob = 1 / sum(exp(x - max)) computed off the path.
            max_l = jnp.max(logits, axis=1, keepdims=True)             # (1, 1)
            tok2d = jnp.min(jnp.where(logits >= max_l, vocab_iota, V),
                            axis=1, keepdims=True).astype(jnp.int32)   # (1, 1)
            denom = jnp.sum(jnp.exp(logits - max_l), axis=1, keepdims=True)
            score2d = pl.reciprocal(denom, approx=False)               # (1, 1)

            mask = step_iota == step
            tokens = jnp.where(mask, tok2d, tokens)
            scores = jnp.where(mask, score2d, scores)

        # Single write of all tokens / scores at the end.
        tok_out_ref[...] = tokens
        score_out_ref[...] = scores

    return kernel


# ----------------------------------------------------------------------------
# GreedySearchDecoder.forward — one pallas_call for the whole thing.
# Takes the pre-packed weight slab (see pack_params).
# ----------------------------------------------------------------------------
def greedy_search_decoder(input_seq, input_length, max_length, slab):
    # TODO(synk): pack_padded_sequence / input_length masking is a no-op here
    # (batch=1, full-length input); input_length is ignored.
    del input_length
    tokens = input_seq[:, 0]                                   # (S,)
    emb_tbl = slab[_R_EMB:_R_EMB + VOCAB, 0:HIDDEN]            # (V, H)
    enc_emb = jnp.take(emb_tbl, tokens, axis=0)                # (S, H) encoder embedding
    seq_len = enc_emb.shape[0]

    kernel = _make_fused_kernel(seq_len, max_length, HIDDEN, VOCAB)
    out_tokens, out_scores = pl.pallas_call(
        kernel,
        out_shape=(jax.ShapeDtypeStruct((1, max_length), jnp.int32),
                   jax.ShapeDtypeStruct((1, max_length), jnp.float32)),
        in_specs=[_vmem, _vmem],
        out_specs=(_vmem, _vmem),
    )(enc_emb, slab)

    return out_tokens[0], out_scores[0]                         # (ML,), (ML,)


# ----------------------------------------------------------------------------
# Deterministic synthetic parameters (shapes implied by the module).
# GRU gate matrices are pre-stacked along the output axis: (H, 3H), (1, 3H).
# ----------------------------------------------------------------------------
def init_params(key):
    keys = jax.random.split(key, 18)

    def w(k, shape, scale=0.1):
        return jax.random.normal(k, shape, dtype=jnp.float32) * scale

    H, V = HIDDEN, VOCAB
    return {
        'embedding': w(keys[0], (V, H)),
        # encoder GRU, forward direction (gates r,z,n stacked on output axis)
        'enc_f_wi': w(keys[1], (H, 3 * H)), 'enc_f_wh': w(keys[2], (H, 3 * H)),
        'enc_f_bi': w(keys[3], (1, 3 * H)), 'enc_f_bh': w(keys[4], (1, 3 * H)),
        # encoder GRU, backward direction
        'enc_b_wi': w(keys[5], (H, 3 * H)), 'enc_b_wh': w(keys[6], (H, 3 * H)),
        'enc_b_bi': w(keys[7], (1, 3 * H)), 'enc_b_bh': w(keys[8], (1, 3 * H)),
        # decoder GRU
        'dec_wi': w(keys[9], (H, 3 * H)), 'dec_wh': w(keys[10], (H, 3 * H)),
        'dec_bi': w(keys[11], (1, 3 * H)), 'dec_bh': w(keys[12], (1, 3 * H)),
        # concat Linear(2H -> H) split into the rnn-output half and context half
        'wc1': w(keys[13], (H, H)), 'wc2': w(keys[14], (H, H)), 'bc': w(keys[15], (1, H)),
        # out Linear(H -> V)
        'wo': w(keys[16], (H, V)), 'bo': w(keys[17], (1, V)),
    }


def pack_params(p):
    """Pack all parameters into one (SLAB_ROWS, 128) f32 slab (single DMA)."""
    def pad_lanes(a):
        return jnp.pad(a, ((0, 0), (0, LANES - a.shape[1])))

    weight_order = ['embedding',
                    'enc_f_wi', 'enc_f_wh', 'enc_b_wi', 'enc_b_wh',
                    'dec_wi', 'dec_wh', 'wc1', 'wc2', 'wo']
    bias_order = ['enc_f_bi', 'enc_f_bh', 'enc_b_bi', 'enc_b_bh',
                  'dec_bi', 'dec_bh', 'bc', 'bo']
    rows = [pad_lanes(p[k]) for k in weight_order] + \
           [pad_lanes(p[k]) for k in bias_order]
    slab = jnp.concatenate(rows, axis=0)
    assert slab.shape == (SLAB_ROWS, LANES), slab.shape
    return slab


if __name__ == "__main__":
    key = jax.random.PRNGKey(0)
    pkey, dkey = jax.random.split(key)
    params = init_params(pkey)
    slab = pack_params(params)

    input_seq = jax.random.randint(dkey, (SEQ_LEN, 1), 0, VOCAB, dtype=jnp.int32)
    input_length = jnp.array([SEQ_LEN], dtype=jnp.int32)

    run = jax.jit(greedy_search_decoder, static_argnums=(2,))
    all_tokens, all_scores = run(input_seq, input_length, MAX_LENGTH, slab)
    jax.block_until_ready((all_tokens, all_scores))

    assert all_tokens.shape == (MAX_LENGTH,) and all_tokens.dtype == jnp.int32
    assert all_scores.shape == (MAX_LENGTH,) and all_scores.dtype == jnp.float32
    print("KERNEL_OK")
</pallas_src>

<mosaic_0001>
module attributes {stable_mosaic.version = 11 : i64} {
  func.func @kernel(%arg0: memref<8x32xf32, #tpu.memory_space<vmem>>, %arg1: memref<360x128xf32, #tpu.memory_space<vmem>>, %arg2: memref<1x6xi32, #tpu.memory_space<vmem>>, %arg3: memref<1x6xf32, #tpu.memory_space<vmem>>) attributes {dimension_semantics = [], scalar_prefetch = 0 : i64, scratch_operands = 0 : i64, tpu.core_type = #tpu.core_type<tc>} {
    %c0 = arith.constant 0 : index
    %c0_0 = arith.constant 0 : index
    %0 = vector.load %arg1[%c0, %c0_0] : memref<360x128xf32, #tpu.memory_space<vmem>>, vector<64x32xf32>
    %c64 = arith.constant 64 : index
    %c0_1 = arith.constant 0 : index
    %1 = vector.load %arg1[%c64, %c0_1] : memref<360x128xf32, #tpu.memory_space<vmem>>, vector<32x96xf32>
    %c96 = arith.constant 96 : index
    %c0_2 = arith.constant 0 : index
    %2 = vector.load %arg1[%c96, %c0_2] : memref<360x128xf32, #tpu.memory_space<vmem>>, vector<32x96xf32>
    %c128 = arith.constant 128 : index
    %c0_3 = arith.constant 0 : index
    %3 = vector.load %arg1[%c128, %c0_3] : memref<360x128xf32, #tpu.memory_space<vmem>>, vector<32x96xf32>
    %c160 = arith.constant 160 : index
    %c0_4 = arith.constant 0 : index
    %4 = vector.load %arg1[%c160, %c0_4] : memref<360x128xf32, #tpu.memory_space<vmem>>, vector<32x96xf32>
    %c192 = arith.constant 192 : index
    %c0_5 = arith.constant 0 : index
    %5 = vector.load %arg1[%c192, %c0_5] : memref<360x128xf32, #tpu.memory_space<vmem>>, vector<32x96xf32>
    %c224 = arith.constant 224 : index
    %c0_6 = arith.constant 0 : index
    %6 = vector.load %arg1[%c224, %c0_6] : memref<360x128xf32, #tpu.memory_space<vmem>>, vector<32x96xf32>
    %c256 = arith.constant 256 : index
    %c0_7 = arith.constant 0 : index
    %7 = vector.load %arg1[%c256, %c0_7] : memref<360x128xf32, #tpu.memory_space<vmem>>, vector<32x32xf32>
    %c288 = arith.constant 288 : index
    %c0_8 = arith.constant 0 : index
    %8 = vector.load %arg1[%c288, %c0_8] : memref<360x128xf32, #tpu.memory_space<vmem>>, vector<32x32xf32>
    %c320 = arith.constant 320 : index
    %c0_9 = arith.constant 0 : index
    %9 = vector.load %arg1[%c320, %c0_9] : memref<360x128xf32, #tpu.memory_space<vmem>>, vector<32x64xf32>
    %c352 = arith.constant 352 : index
    %c0_10 = arith.constant 0 : index
    %10 = vector.load %arg1[%c352, %c0_10] : memref<360x128xf32, #tpu.memory_space<vmem>>, vector<8x128xf32>
    %11 = vector.extract_strided_slice %10 {offsets = [0, 0], sizes = [1, 96], strides = [1, 1]} : vector<8x128xf32> to vector<1x96xf32>
    %12 = vector.extract_strided_slice %10 {offsets = [1, 0], sizes = [1, 96], strides = [1, 1]} : vector<8x128xf32> to vector<1x96xf32>
    %13 = vector.extract_strided_slice %10 {offsets = [2, 0], sizes = [1, 96], strides = [1, 1]} : vector<8x128xf32> to vector<1x96xf32>
    %14 = vector.extract_strided_slice %10 {offsets = [3, 0], sizes = [1, 96], strides = [1, 1]} : vector<8x128xf32> to vector<1x96xf32>
    %15 = vector.extract_strided_slice %10 {offsets = [4, 0], sizes = [1, 96], strides = [1, 1]} : vector<8x128xf32> to vector<1x96xf32>
    %16 = vector.extract_strided_slice %10 {offsets = [5, 0], sizes = [1, 96], strides = [1, 1]} : vector<8x128xf32> to vector<1x96xf32>
    %17 = vector.extract_strided_slice %10 {offsets = [6, 0], sizes = [1, 32], strides = [1, 1]} : vector<8x128xf32> to vector<1x32xf32>
    %18 = vector.extract_strided_slice %10 {offsets = [7, 0], sizes = [1, 64], strides = [1, 1]} : vector<8x128xf32> to vector<1x64xf32>
    %c0_11 = arith.constant 0 : index
    %c0_12 = arith.constant 0 : index
    %19 = vector.load %arg0[%c0_11, %c0_12] : memref<8x32xf32, #tpu.memory_space<vmem>>, vector<8x32xf32>
    %cst = arith.constant dense<0.000000e+00> : vector<8x96xf32>
    %20 = tpu.matmul %19, %1, %cst {dimension_numbers = #tpu.dot_dimension_numbers<[1], [0], [0], [1], [0, 0, 1, 1], [], []>} : vector<8x32xf32>, vector<32x96xf32>, vector<8x96xf32> -> vector<8x96xf32>
    %21 = vector.broadcast %11 : vector<1x96xf32> to vector<8x96xf32>
    %22 = arith.addf %20, %21 : vector<8x96xf32>
    %cst_13 = arith.constant dense<0.000000e+00> : vector<8x96xf32>
    %23 = tpu.matmul %19, %3, %cst_13 {dimension_numbers = #tpu.dot_dimension_numbers<[1], [0], [0], [1], [0, 0, 1, 1], [], []>} : vector<8x32xf32>, vector<32x96xf32>, vector<8x96xf32> -> vector<8x96xf32>
    %24 = vector.broadcast %13 : vector<1x96xf32> to vector<8x96xf32>
    %25 = arith.addf %23, %24 : vector<8x96xf32>
    %cst_14 = arith.constant 0.000000e+00 : f32
    %26 = vector.broadcast %cst_14 : f32 to vector<1x32xf32>
    %cst_15 = arith.constant 0.000000e+00 : f32
    %27 = vector.broadcast %cst_15 : f32 to vector<1x32xf32>
    %28 = vector.extract_strided_slice %22 {offsets = [0, 0], sizes = [1, 96], strides = [1, 1]} : vector<8x96xf32> to vector<1x96xf32>
    %cst_16 = arith.constant dense<0.000000e+00> : vector<1x96xf32>
    %29 = tpu.matmul %26, %2, %cst_16 {dimension_numbers = #tpu.dot_dimension_numbers<[1], [0], [0], [1], [0, 0, 1, 1], [], []>} : vector<1x32xf32>, vector<32x96xf32>, vector<1x96xf32> -> vector<1x96xf32>
    %30 = arith.addf %29, %12 : vector<1x96xf32>
    %31 = vector.extract_strided_slice %28 {offsets = [0, 0], sizes = [1, 64], strides = [1, 1]} : vector<1x96xf32> to vector<1x64xf32>
    %32 = vector.extract_strided_slice %30 {offsets = [0, 0], sizes = [1, 64], strides = [1, 1]} : vector<1x96xf32> to vector<1x64xf32>
    %33 = arith.addf %31, %32 : vector<1x64xf32>
    %34 = arith.negf %33 : vector<1x64xf32>
    %35 = math.exp %34 : vector<1x64xf32>
    %cst_17 = arith.constant 1.000000e+00 : f32
    %36 = vector.broadcast %cst_17 : f32 to vector<1x64xf32>
    %37 = arith.addf %36, %35 : vector<1x64xf32>
    %38 = arith.divf %36, %37 : vector<1x64xf32>
    %39 = vector.extract_strided_slice %38 {offsets = [0, 0], sizes = [1, 32], strides = [1, 1]} : vector<1x64xf32> to vector<1x32xf32>
    %40 = vector.extract_strided_slice %38 {offsets = [0, 32], sizes = [1, 32], strides = [1, 1]} : vector<1x64xf32> to vector<1x32xf32>
    %41 = vector.extract_strided_slice %28 {offsets = [0, 64], sizes = [1, 32], strides = [1, 1]} : vector<1x96xf32> to vector<1x32xf32>
    %42 = vector.extract_strided_slice %30 {offsets = [0, 64], sizes = [1, 32], strides = [1, 1]} : vector<1x96xf32> to vector<1x32xf32>
    %43 = arith.mulf %39, %42 : vector<1x32xf32>
    %44 = arith.addf %41, %43 : vector<1x32xf32>
    %45 = math.tanh %44 : vector<1x32xf32>
    %cst_18 = arith.constant 1.000000e+00 : f32
    %46 = vector.broadcast %cst_18 : f32 to vector<1x32xf32>
    %47 = arith.subf %46, %40 : vector<1x32xf32>
    %48 = arith.mulf %47, %45 : vector<1x32xf32>
    %49 = arith.mulf %40, %26 : vector<1x32xf32>
    %50 = arith.addf %48, %49 : vector<1x32xf32>
    %51 = vector.extract_strided_slice %25 {offsets = [7, 0], sizes = [1, 96], strides = [1, 1]} : vector<8x96xf32> to vector<1x96xf32>
    %cst_19 = arith.constant dense<0.000000e+00> : vector<1x96xf32>
    %52 = tpu.matmul %27, %4, %cst_19 {dimension_numbers = #tpu.dot_dimension_numbers<[1], [0], [0], [1], [0, 0, 1, 1], [], []>} : vector<1x32xf32>, vector<32x96xf32>, vector<1x96xf32> -> vector<1x96xf32>
    %53 = arith.addf %52, %14 : vector<1x96xf32>
    %54 = vector.extract_strided_slice %51 {offsets = [0, 0], sizes = [1, 64], strides = [1, 1]} : vector<1x96xf32> to vector<1x64xf32>
    %55 = vector.extract_strided_slice %53 {offsets = [0, 0], sizes = [1, 64], strides = [1, 1]} : vector<1x96xf32> to vector<1x64xf32>
    %56 = arith.addf %54, %55 : vector<1x64xf32>
    %57 = arith.negf %56 : vector<1x64xf32>
    %58 = math.exp %57 : vector<1x64xf32>
    %cst_20 = arith.constant 1.000000e+00 : f32
    %59 = vector.broadcast %cst_20 : f32 to vector<1x64xf32>
    %60 = arith.addf %59, %58 : vector<1x64xf32>
    %61 = arith.divf %59, %60 : vector<1x64xf32>
    %62 = vector.extract_strided_slice %61 {offsets = [0, 0], sizes = [1, 32], strides = [1, 1]} : vector<1x64xf32> to vector<1x32xf32>
    %63 = vector.extract_strided_slice %61 {offsets = [0, 32], sizes = [1, 32], strides = [1, 1]} : vector<1x64xf32> to vector<1x32xf32>
    %64 = vector.extract_strided_slice %51 {offsets = [0, 64], sizes = [1, 32], strides = [1, 1]} : vector<1x96xf32> to vector<1x32xf32>
    %65 = vector.extract_strided_slice %53 {offsets = [0, 64], sizes = [1, 32], strides = [1, 1]} : vector<1x96xf32> to vector<1x32xf32>
    %66 = arith.mulf %62, %65 : vector<1x32xf32>
    %67 = arith.addf %64, %66 : vector<1x32xf32>
    %68 = math.tanh %67 : vector<1x32xf32>
    %cst_21 = arith.constant 1.000000e+00 : f32
    %69 = vector.broadcast %cst_21 : f32 to vector<1x32xf32>
    %70 = arith.subf %69, %63 : vector<1x32xf32>
    %71 = arith.mulf %70, %68 : vector<1x32xf32>
    %72 = arith.mulf %63, %27 : vector<1x32xf32>
    %73 = arith.addf %71, %72 : vector<1x32xf32>
    %74 = vector.extract_strided_slice %22 {offsets = [1, 0], sizes = [1, 96], strides = [1, 1]} : vector<8x96xf32> to vector<1x96xf32>
    %cst_22 = arith.constant dense<0.000000e+00> : vector<1x96xf32>
    %75 = tpu.matmul %50, %2, %cst_22 {dimension_numbers = #tpu.dot_dimension_numbers<[1], [0], [0], [1], [0, 0, 1, 1], [], []>} : vector<1x32xf32>, vector<32x96xf32>, vector<1x96xf32> -> vector<1x96xf32>
    %76 = arith.addf %75, %12 : vector<1x96xf32>
    %77 = vector.extract_strided_slice %74 {offsets = [0, 0], sizes = [1, 64], strides = [1, 1]} : vector<1x96xf32> to vector<1x64xf32>
    %78 = vector.extract_strided_slice %76 {offsets = [0, 0], sizes = [1, 64], strides = [1, 1]} : vector<1x96xf32> to vector<1x64xf32>
    %79 = arith.addf %77, %78 : vector<1x64xf32>
    %80 = arith.negf %79 : vector<1x64xf32>
    %81 = math.exp %80 : vector<1x64xf32>
    %cst_23 = arith.constant 1.000000e+00 : f32
    %82 = vector.broadcast %cst_23 : f32 to vector<1x64xf32>
    %83 = arith.addf %82, %81 : vector<1x64xf32>
    %84 = arith.divf %82, %83 : vector<1x64xf32>
    %85 = vector.extract_strided_slice %84 {offsets = [0, 0], sizes = [1, 32], strides = [1, 1]} : vector<1x64xf32> to vector<1x32xf32>
    %86 = vector.extract_strided_slice %84 {offsets = [0, 32], sizes = [1, 32], strides = [1, 1]} : vector<1x64xf32> to vector<1x32xf32>
    %87 = vector.extract_strided_slice %74 {offsets = [0, 64], sizes = [1, 32], strides = [1, 1]} : vector<1x96xf32> to vector<1x32xf32>
    %88 = vector.extract_strided_slice %76 {offsets = [0, 64], sizes = [1, 32], strides = [1, 1]} : vector<1x96xf32> to vector<1x32xf32>
    %89 = arith.mulf %85, %88 : vector<1x32xf32>
    %90 = arith.addf %87, %89 : vector<1x32xf32>
    %91 = math.tanh %90 : vector<1x32xf32>
    %cst_24 = arith.constant 1.000000e+00 : f32
    %92 = vector.broadcast %cst_24 : f32 to vector<1x32xf32>
    %93 = arith.subf %92, %86 : vector<1x32xf32>
    %94 = arith.mulf %93, %91 : vector<1x32xf32>
    %95 = arith.mulf %86, %50 : vector<1x32xf32>
    %96 = arith.addf %94, %95 : vector<1x32xf32>
    %97 = vector.extract_strided_slice %25 {offsets = [6, 0], sizes = [1, 96], strides = [1, 1]} : vector<8x96xf32> to vector<1x96xf32>
    %cst_25 = arith.constant dense<0.000000e+00> : vector<1x96xf32>
    %98 = tpu.matmul %73, %4, %cst_25 {dimension_numbers = #tpu.dot_dimension_numbers<[1], [0], [0], [1], [0, 0, 1, 1], [], []>} : vector<1x32xf32>, vector<32x96xf32>, vector<1x96xf32> -> vector<1x96xf32>
    %99 = arith.addf %98, %14 : vector<1x96xf32>
    %100 = vector.extract_strided_slice %97 {offsets = [0, 0], sizes = [1, 64], strides = [1, 1]} : vector<1x96xf32> to vector<1x64xf32>
    %101 = vector.extract_strided_slice %99 {offsets = [0, 0], sizes = [1, 64], strides = [1, 1]} : vector<1x96xf32> to vector<1x64xf32>
    %102 = arith.addf %100, %101 : vector<1x64xf32>
    %103 = arith.negf %102 : vector<1x64xf32>
    %104 = math.exp %103 : vector<1x64xf32>
    %cst_26 = arith.constant 1.000000e+00 : f32
    %105 = vector.broadcast %cst_26 : f32 to vector<1x64xf32>
    %106 = arith.addf %105, %104 : vector<1x64xf32>
    %107 = arith.divf %105, %106 : vector<1x64xf32>
    %108 = vector.extract_strided_slice %107 {offsets = [0, 0], sizes = [1, 32], strides = [1, 1]} : vector<1x64xf32> to vector<1x32xf32>
    %109 = vector.extract_strided_slice %107 {offsets = [0, 32], sizes = [1, 32], strides = [1, 1]} : vector<1x64xf32> to vector<1x32xf32>
    %110 = vector.extract_strided_slice %97 {offsets = [0, 64], sizes = [1, 32], strides = [1, 1]} : vector<1x96xf32> to vector<1x32xf32>
    %111 = vector.extract_strided_slice %99 {offsets = [0, 64], sizes = [1, 32], strides = [1, 1]} : vector<1x96xf32> to vector<1x32xf32>
    %112 = arith.mulf %108, %111 : vector<1x32xf32>
    %113 = arith.addf %110, %112 : vector<1x32xf32>
    %114 = math.tanh %113 : vector<1x32xf32>
    %cst_27 = arith.constant 1.000000e+00 : f32
    %115 = vector.broadcast %cst_27 : f32 to vector<1x32xf32>
    %116 = arith.subf %115, %109 : vector<1x32xf32>
    %117 = arith.mulf %116, %114 : vector<1x32xf32>
    %118 = arith.mulf %109, %73 : vector<1x32xf32>
    %119 = arith.addf %117, %118 : vector<1x32xf32>
    %120 = vector.extract_strided_slice %22 {offsets = [2, 0], sizes = [1, 96], strides = [1, 1]} : vector<8x96xf32> to vector<1x96xf32>
    %cst_28 = arith.constant dense<0.000000e+00> : vector<1x96xf32>
    %121 = tpu.matmul %96, %2, %cst_28 {dimension_numbers = #tpu.dot_dimension_numbers<[1], [0], [0], [1], [0, 0, 1, 1], [], []>} : vector<1x32xf32>, vector<32x96xf32>, vector<1x96xf32> -> vector<1x96xf32>
    %122 = arith.addf %121, %12 : vector<1x96xf32>
    %123 = vector.extract_strided_slice %120 {offsets = [0, 0], sizes = [1, 64], strides = [1, 1]} : vector<1x96xf32> to vector<1x64xf32>
    %124 = vector.extract_strided_slice %122 {offsets = [0, 0], sizes = [1, 64], strides = [1, 1]} : vector<1x96xf32> to vector<1x64xf32>
    %125 = arith.addf %123, %124 : vector<1x64xf32>
    %126 = arith.negf %125 : vector<1x64xf32>
    %127 = math.exp %126 : vector<1x64xf32>
    %cst_29 = arith.constant 1.000000e+00 : f32
    %128 = vector.broadcast %cst_29 : f32 to vector<1x64xf32>
    %129 = arith.addf %128, %127 : vector<1x64xf32>
    %130 = arith.divf %128, %129 : vector<1x64xf32>
    %131 = vector.extract_strided_slice %130 {offsets = [0, 0], sizes = [1, 32], strides = [1, 1]} : vector<1x64xf32> to vector<1x32xf32>
    %132 = vector.extract_strided_slice %130 {offsets = [0, 32], sizes = [1, 32], strides = [1, 1]} : vector<1x64xf32> to vector<1x32xf32>
    %133 = vector.extract_strided_slice %120 {offsets = [0, 64], sizes = [1, 32], strides = [1, 1]} : vector<1x96xf32> to vector<1x32xf32>
    %134 = vector.extract_strided_slice %122 {offsets = [0, 64], sizes = [1, 32], strides = [1, 1]} : vector<1x96xf32> to vector<1x32xf32>
    %135 = arith.mulf %131, %134 : vector<1x32xf32>
    %136 = arith.addf %133, %135 : vector<1x32xf32>
    %137 = math.tanh %136 : vector<1x32xf32>
    %cst_30 = arith.constant 1.000000e+00 : f32
    %138 = vector.broadcast %cst_30 : f32 to vector<1x32xf32>
    %139 = arith.subf %138, %132 : vector<1x32xf32>
    %140 = arith.mulf %139, %137 : vector<1x32xf32>
    %141 = arith.mulf %132, %96 : vector<1x32xf32>
    %142 = arith.addf %140, %141 : vector<1x32xf32>
    %143 = vector.extract_strided_slice %25 {offsets = [5, 0], sizes = [1, 96], strides = [1, 1]} : vector<8x96xf32> to vector<1x96xf32>
    %cst_31 = arith.constant dense<0.000000e+00> : vector<1x96xf32>
    %144 = tpu.matmul %119, %4, %cst_31 {dimension_numbers = #tpu.dot_dimension_numbers<[1], [0], [0], [1], [0, 0, 1, 1], [], []>} : vector<1x32xf32>, vector<32x96xf32>, vector<1x96xf32> -> vector<1x96xf32>
    %145 = arith.addf %144, %14 : vector<1x96xf32>
    %146 = vector.extract_strided_slice %143 {offsets = [0, 0], sizes = [1, 64], strides = [1, 1]} : vector<1x96xf32> to vector<1x64xf32>
    %147 = vector.extract_strided_slice %145 {offsets = [0, 0], sizes = [1, 64], strides = [1, 1]} : vector<1x96xf32> to vector<1x64xf32>
    %148 = arith.addf %146, %147 : vector<1x64xf32>
    %149 = arith.negf %148 : vector<1x64xf32>
    %150 = math.exp %149 : vector<1x64xf32>
    %cst_32 = arith.constant 1.000000e+00 : f32
    %151 = vector.broadcast %cst_32 : f32 to vector<1x64xf32>
    %152 = arith.addf %151, %150 : vector<1x64xf32>
    %153 = arith.divf %151, %152 : vector<1x64xf32>
    %154 = vector.extract_strided_slice %153 {offsets = [0, 0], sizes = [1, 32], strides = [1, 1]} : vector<1x64xf32> to vector<1x32xf32>
    %155 = vector.extract_strided_slice %153 {offsets = [0, 32], sizes = [1, 32], strides = [1, 1]} : vector<1x64xf32> to vector<1x32xf32>
    %156 = vector.extract_strided_slice %143 {offsets = [0, 64], sizes = [1, 32], strides = [1, 1]} : vector<1x96xf32> to vector<1x32xf32>
    %157 = vector.extract_strided_slice %145 {offsets = [0, 64], sizes = [1, 32], strides = [1, 1]} : vector<1x96xf32> to vector<1x32xf32>
    %158 = arith.mulf %154, %157 : vector<1x32xf32>
    %159 = arith.addf %156, %158 : vector<1x32xf32>
    %160 = math.tanh %159 : vector<1x32xf32>
    %cst_33 = arith.constant 1.000000e+00 : f32
    %161 = vector.broadcast %cst_33 : f32 to vector<1x32xf32>
    %162 = arith.subf %161, %155 : vector<1x32xf32>
    %163 = arith.mulf %162, %160 : vector<1x32xf32>
    %164 = arith.mulf %155, %119 : vector<1x32xf32>
    %165 = arith.addf %163, %164 : vector<1x32xf32>
    %166 = vector.extract_strided_slice %22 {offsets = [3, 0], sizes = [1, 96], strides = [1, 1]} : vector<8x96xf32> to vector<1x96xf32>
    %cst_34 = arith.constant dense<0.000000e+00> : vector<1x96xf32>
    %167 = tpu.matmul %142, %2, %cst_34 {dimension_numbers = #tpu.dot_dimension_numbers<[1], [0], [0], [1], [0, 0, 1, 1], [], []>} : vector<1x32xf32>, vector<32x96xf32>, vector<1x96xf32> -> vector<1x96xf32>
    %168 = arith.addf %167, %12 : vector<1x96xf32>
    %169 = vector.extract_strided_slice %166 {offsets = [0, 0], sizes = [1, 64], strides = [1, 1]} : vector<1x96xf32> to vector<1x64xf32>
    %170 = vector.extract_strided_slice %168 {offsets = [0, 0], sizes = [1, 64], strides = [1, 1]} : vector<1x96xf32> to vector<1x64xf32>
    %171 = arith.addf %169, %170 : vector<1x64xf32>
    %172 = arith.negf %171 : vector<1x64xf32>
    %173 = math.exp %172 : vector<1x64xf32>
    %cst_35 = arith.constant 1.000000e+00 : f32
    %174 = vector.broadcast %cst_35 : f32 to vector<1x64xf32>
    %175 = arith.addf %174, %173 : vector<1x64xf32>
    %176 = arith.divf %174, %175 : vector<1x64xf32>
    %177 = vector.extract_strided_slice %176 {offsets = [0, 0], sizes = [1, 32], strides = [1, 1]} : vector<1x64xf32> to vector<1x32xf32>
    %178 = vector.extract_strided_slice %176 {offsets = [0, 32], sizes = [1, 32], strides = [1, 1]} : vector<1x64xf32> to vector<1x32xf32>
    %179 = vector.extract_strided_slice %166 {offsets = [0, 64], sizes = [1, 32], strides = [1, 1]} : vector<1x96xf32> to vector<1x32xf32>
    %180 = vector.extract_strided_slice %168 {offsets = [0, 64], sizes = [1, 32], strides = [1, 1]} : vector<1x96xf32> to vector<1x32xf32>
    %181 = arith.mulf %177, %180 : vector<1x32xf32>
    %182 = arith.addf %179, %181 : vector<1x32xf32>
    %183 = math.tanh %182 : vector<1x32xf32>
    %cst_36 = arith.constant 1.000000e+00 : f32
    %184 = vector.broadcast %cst_36 : f32 to vector<1x32xf32>
    %185 = arith.subf %184, %178 : vector<1x32xf32>
    %186 = arith.mulf %185, %183 : vector<1x32xf32>
    %187 = arith.mulf %178, %142 : vector<1x32xf32>
    %188 = arith.addf %186, %187 : vector<1x32xf32>
    %189 = vector.extract_strided_slice %25 {offsets = [4, 0], sizes = [1, 96], strides = [1, 1]} : vector<8x96xf32> to vector<1x96xf32>
    %cst_37 = arith.constant dense<0.000000e+00> : vector<1x96xf32>
    %190 = tpu.matmul %165, %4, %cst_37 {dimension_numbers = #tpu.dot_dimension_numbers<[1], [0], [0], [1], [0, 0, 1, 1], [], []>} : vector<1x32xf32>, vector<32x96xf32>, vector<1x96xf32> -> vector<1x96xf32>
    %191 = arith.addf %190, %14 : vector<1x96xf32>
    %192 = vector.extract_strided_slice %189 {offsets = [0, 0], sizes = [1, 64], strides = [1, 1]} : vector<1x96xf32> to vector<1x64xf32>
    %193 = vector.extract_strided_slice %191 {offsets = [0, 0], sizes = [1, 64], strides = [1, 1]} : vector<1x96xf32> to vector<1x64xf32>
    %194 = arith.addf %192, %193 : vector<1x64xf32>
    %195 = arith.negf %194 : vector<1x64xf32>
    %196 = math.exp %195 : vector<1x64xf32>
    %cst_38 = arith.constant 1.000000e+00 : f32
    %197 = vector.broadcast %cst_38 : f32 to vector<1x64xf32>
    %198 = arith.addf %197, %196 : vector<1x64xf32>
    %199 = arith.divf %197, %198 : vector<1x64xf32>
    %200 = vector.extract_strided_slice %199 {offsets = [0, 0], sizes = [1, 32], strides = [1, 1]} : vector<1x64xf32> to vector<1x32xf32>
    %201 = vector.extract_strided_slice %199 {offsets = [0, 32], sizes = [1, 32], strides = [1, 1]} : vector<1x64xf32> to vector<1x32xf32>
    %202 = vector.extract_strided_slice %189 {offsets = [0, 64], sizes = [1, 32], strides = [1, 1]} : vector<1x96xf32> to vector<1x32xf32>
    %203 = vector.extract_strided_slice %191 {offsets = [0, 64], sizes = [1, 32], strides = [1, 1]} : vector<1x96xf32> to vector<1x32xf32>
    %204 = arith.mulf %200, %203 : vector<1x32xf32>
    %205 = arith.addf %202, %204 : vector<1x32xf32>
    %206 = math.tanh %205 : vector<1x32xf32>
    %cst_39 = arith.constant 1.000000e+00 : f32
    %207 = vector.broadcast %cst_39 : f32 to vector<1x32xf32>
    %208 = arith.subf %207, %201 : vector<1x32xf32>
    %209 = arith.mulf %208, %206 : vector<1x32xf32>
    %210 = arith.mulf %201, %165 : vector<1x32xf32>
    %211 = arith.addf %209, %210 : vector<1x32xf32>
    %212 = vector.extract_strided_slice %22 {offsets = [4, 0], sizes = [1, 96], strides = [1, 1]} : vector<8x96xf32> to vector<1x96xf32>
    %cst_40 = arith.constant dense<0.000000e+00> : vector<1x96xf32>
    %213 = tpu.matmul %188, %2, %cst_40 {dimension_numbers = #tpu.dot_dimension_numbers<[1], [0], [0], [1], [0, 0, 1, 1], [], []>} : vector<1x32xf32>, vector<32x96xf32>, vector<1x96xf32> -> vector<1x96xf32>
    %214 = arith.addf %213, %12 : vector<1x96xf32>
    %215 = vector.extract_strided_slice %212 {offsets = [0, 0], sizes = [1, 64], strides = [1, 1]} : vector<1x96xf32> to vector<1x64xf32>
    %216 = vector.extract_strided_slice %214 {offsets = [0, 0], sizes = [1, 64], strides = [1, 1]} : vector<1x96xf32> to vector<1x64xf32>
    %217 = arith.addf %215, %216 : vector<1x64xf32>
    %218 = arith.negf %217 : vector<1x64xf32>
    %219 = math.exp %218 : vector<1x64xf32>
    %cst_41 = arith.constant 1.000000e+00 : f32
    %220 = vector.broadcast %cst_41 : f32 to vector<1x64xf32>
    %221 = arith.addf %220, %219 : vector<1x64xf32>
    %222 = arith.divf %220, %221 : vector<1x64xf32>
    %223 = vector.extract_strided_slice %222 {offsets = [0, 0], sizes = [1, 32], strides = [1, 1]} : vector<1x64xf32> to vector<1x32xf32>
    %224 = vector.extract_strided_slice %222 {offsets = [0, 32], sizes = [1, 32], strides = [1, 1]} : vector<1x64xf32> to vector<1x32xf32>
    %225 = vector.extract_strided_slice %212 {offsets = [0, 64], sizes = [1, 32], strides = [1, 1]} : vector<1x96xf32> to vector<1x32xf32>
    %226 = vector.extract_strided_slice %214 {offsets = [0, 64], sizes = [1, 32], strides = [1, 1]} : vector<1x96xf32> to vector<1x32xf32>
    %227 = arith.mulf %223, %226 : vector<1x32xf32>
    %228 = arith.addf %225, %227 : vector<1x32xf32>
    %229 = math.tanh %228 : vector<1x32xf32>
    %cst_42 = arith.constant 1.000000e+00 : f32
    %230 = vector.broadcast %cst_42 : f32 to vector<1x32xf32>
    %231 = arith.subf %230, %224 : vector<1x32xf32>
    %232 = arith.mulf %231, %229 : vector<1x32xf32>
    %233 = arith.mulf %224, %188 : vector<1x32xf32>
    %234 = arith.addf %232, %233 : vector<1x32xf32>
    %235 = vector.extract_strided_slice %25 {offsets = [3, 0], sizes = [1, 96], strides = [1, 1]} : vector<8x96xf32> to vector<1x96xf32>
    %cst_43 = arith.constant dense<0.000000e+00> : vector<1x96xf32>
    %236 = tpu.matmul %211, %4, %cst_43 {dimension_numbers = #tpu.dot_dimension_numbers<[1], [0], [0], [1], [0, 0, 1, 1], [], []>} : vector<1x32xf32>, vector<32x96xf32>, vector<1x96xf32> -> vector<1x96xf32>
    %237 = arith.addf %236, %14 : vector<1x96xf32>
    %238 = vector.extract_strided_slice %235 {offsets = [0, 0], sizes = [1, 64], strides = [1, 1]} : vector<1x96xf32> to vector<1x64xf32>
    %239 = vector.extract_strided_slice %237 {offsets = [0, 0], sizes = [1, 64], strides = [1, 1]} : vector<1x96xf32> to vector<1x64xf32>
    %240 = arith.addf %238, %239 : vector<1x64xf32>
    %241 = arith.negf %240 : vector<1x64xf32>
    %242 = math.exp %241 : vector<1x64xf32>
    %cst_44 = arith.constant 1.000000e+00 : f32
    %243 = vector.broadcast %cst_44 : f32 to vector<1x64xf32>
    %244 = arith.addf %243, %242 : vector<1x64xf32>
    %245 = arith.divf %243, %244 : vector<1x64xf32>
    %246 = vector.extract_strided_slice %245 {offsets = [0, 0], sizes = [1, 32], strides = [1, 1]} : vector<1x64xf32> to vector<1x32xf32>
    %247 = vector.extract_strided_slice %245 {offsets = [0, 32], sizes = [1, 32], strides = [1, 1]} : vector<1x64xf32> to vector<1x32xf32>
    %248 = vector.extract_strided_slice %235 {offsets = [0, 64], sizes = [1, 32], strides = [1, 1]} : vector<1x96xf32> to vector<1x32xf32>
    %249 = vector.extract_strided_slice %237 {offsets = [0, 64], sizes = [1, 32], strides = [1, 1]} : vector<1x96xf32> to vector<1x32xf32>
    %250 = arith.mulf %246, %249 : vector<1x32xf32>
    %251 = arith.addf %248, %250 : vector<1x32xf32>
    %252 = math.tanh %251 : vector<1x32xf32>
    %cst_45 = arith.constant 1.000000e+00 : f32
    %253 = vector.broadcast %cst_45 : f32 to vector<1x32xf32>
    %254 = arith.subf %253, %247 : vector<1x32xf32>
    %255 = arith.mulf %254, %252 : vector<1x32xf32>
    %256 = arith.mulf %247, %211 : vector<1x32xf32>
    %257 = arith.addf %255, %256 : vector<1x32xf32>
    %258 = vector.extract_strided_slice %22 {offsets = [5, 0], sizes = [1, 96], strides = [1, 1]} : vector<8x96xf32> to vector<1x96xf32>
    %cst_46 = arith.constant dense<0.000000e+00> : vector<1x96xf32>
    %259 = tpu.matmul %234, %2, %cst_46 {dimension_numbers = #tpu.dot_dimension_numbers<[1], [0], [0], [1], [0, 0, 1, 1], [], []>} : vector<1x32xf32>, vector<32x96xf32>, vector<1x96xf32> -> vector<1x96xf32>
    %260 = arith.addf %259, %12 : vector<1x96xf32>
    %261 = vector.extract_strided_slice %258 {offsets = [0, 0], sizes = [1, 64], strides = [1, 1]} : vector<1x96xf32> to vector<1x64xf32>
    %262 = vector.extract_strided_slice %260 {offsets = [0, 0], sizes = [1, 64], strides = [1, 1]} : vector<1x96xf32> to vector<1x64xf32>
    %263 = arith.addf %261, %262 : vector<1x64xf32>
    %264 = arith.negf %263 : vector<1x64xf32>
    %265 = math.exp %264 : vector<1x64xf32>
    %cst_47 = arith.constant 1.000000e+00 : f32
    %266 = vector.broadcast %cst_47 : f32 to vector<1x64xf32>
    %267 = arith.addf %266, %265 : vector<1x64xf32>
    %268 = arith.divf %266, %267 : vector<1x64xf32>
    %269 = vector.extract_strided_slice %268 {offsets = [0, 0], sizes = [1, 32], strides = [1, 1]} : vector<1x64xf32> to vector<1x32xf32>
    %270 = vector.extract_strided_slice %268 {offsets = [0, 32], sizes = [1, 32], strides = [1, 1]} : vector<1x64xf32> to vector<1x32xf32>
    %271 = vector.extract_strided_slice %258 {offsets = [0, 64], sizes = [1, 32], strides = [1, 1]} : vector<1x96xf32> to vector<1x32xf32>
    %272 = vector.extract_strided_slice %260 {offsets = [0, 64], sizes = [1, 32], strides = [1, 1]} : vector<1x96xf32> to vector<1x32xf32>
    %273 = arith.mulf %269, %272 : vector<1x32xf32>
    %274 = arith.addf %271, %273 : vector<1x32xf32>
    %275 = math.tanh %274 : vector<1x32xf32>
    %cst_48 = arith.constant 1.000000e+00 : f32
    %276 = vector.broadcast %cst_48 : f32 to vector<1x32xf32>
    %277 = arith.subf %276, %270 : vector<1x32xf32>
    %278 = arith.mulf %277, %275 : vector<1x32xf32>
    %279 = arith.mulf %270, %234 : vector<1x32xf32>
    %280 = arith.addf %278, %279 : vector<1x32xf32>
    %281 = vector.extract_strided_slice %25 {offsets = [2, 0], sizes = [1, 96], strides = [1, 1]} : vector<8x96xf32> to vector<1x96xf32>
    %cst_49 = arith.constant dense<0.000000e+00> : vector<1x96xf32>
    %282 = tpu.matmul %257, %4, %cst_49 {dimension_numbers = #tpu.dot_dimension_numbers<[1], [0], [0], [1], [0, 0, 1, 1], [], []>} : vector<1x32xf32>, vector<32x96xf32>, vector<1x96xf32> -> vector<1x96xf32>
    %283 = arith.addf %282, %14 : vector<1x96xf32>
    %284 = vector.extract_strided_slice %281 {offsets = [0, 0], sizes = [1, 64], strides = [1, 1]} : vector<1x96xf32> to vector<1x64xf32>
    %285 = vector.extract_strided_slice %283 {offsets = [0, 0], sizes = [1, 64], strides = [1, 1]} : vector<1x96xf32> to vector<1x64xf32>
    %286 = arith.addf %284, %285 : vector<1x64xf32>
    %287 = arith.negf %286 : vector<1x64xf32>
    %288 = math.exp %287 : vector<1x64xf32>
    %cst_50 = arith.constant 1.000000e+00 : f32
    %289 = vector.broadcast %cst_50 : f32 to vector<1x64xf32>
    %290 = arith.addf %289, %288 : vector<1x64xf32>
    %291 = arith.divf %289, %290 : vector<1x64xf32>
    %292 = vector.extract_strided_slice %291 {offsets = [0, 0], sizes = [1, 32], strides = [1, 1]} : vector<1x64xf32> to vector<1x32xf32>
    %293 = vector.extract_strided_slice %291 {offsets = [0, 32], sizes = [1, 32], strides = [1, 1]} : vector<1x64xf32> to vector<1x32xf32>
    %294 = vector.extract_strided_slice %281 {offsets = [0, 64], sizes = [1, 32], strides = [1, 1]} : vector<1x96xf32> to vector<1x32xf32>
    %295 = vector.extract_strided_slice %283 {offsets = [0, 64], sizes = [1, 32], strides = [1, 1]} : vector<1x96xf32> to vector<1x32xf32>
    %296 = arith.mulf %292, %295 : vector<1x32xf32>
    %297 = arith.addf %294, %296 : vector<1x32xf32>
    %298 = math.tanh %297 : vector<1x32xf32>
    %cst_51 = arith.constant 1.000000e+00 : f32
    %299 = vector.broadcast %cst_51 : f32 to vector<1x32xf32>
    %300 = arith.subf %299, %293 : vector<1x32xf32>
    %301 = arith.mulf %300, %298 : vector<1x32xf32>
    %302 = arith.mulf %293, %257 : vector<1x32xf32>
    %303 = arith.addf %301, %302 : vector<1x32xf32>
    %304 = vector.extract_strided_slice %22 {offsets = [6, 0], sizes = [1, 96], strides = [1, 1]} : vector<8x96xf32> to vector<1x96xf32>
    %cst_52 = arith.constant dense<0.000000e+00> : vector<1x96xf32>
    %305 = tpu.matmul %280, %2, %cst_52 {dimension_numbers = #tpu.dot_dimension_numbers<[1], [0], [0], [1], [0, 0, 1, 1], [], []>} : vector<1x32xf32>, vector<32x96xf32>, vector<1x96xf32> -> vector<1x96xf32>
    %306 = arith.addf %305, %12 : vector<1x96xf32>
    %307 = vector.extract_strided_slice %304 {offsets = [0, 0], sizes = [1, 64], strides = [1, 1]} : vector<1x96xf32> to vector<1x64xf32>
    %308 = vector.extract_strided_slice %306 {offsets = [0, 0], sizes = [1, 64], strides = [1, 1]} : vector<1x96xf32> to vector<1x64xf32>
    %309 = arith.addf %307, %308 : vector<1x64xf32>
    %310 = arith.negf %309 : vector<1x64xf32>
    %311 = math.exp %310 : vector<1x64xf32>
    %cst_53 = arith.constant 1.000000e+00 : f32
    %312 = vector.broadcast %cst_53 : f32 to vector<1x64xf32>
    %313 = arith.addf %312, %311 : vector<1x64xf32>
    %314 = arith.divf %312, %313 : vector<1x64xf32>
    %315 = vector.extract_strided_slice %314 {offsets = [0, 0], sizes = [1, 32], strides = [1, 1]} : vector<1x64xf32> to vector<1x32xf32>
    %316 = vector.extract_strided_slice %314 {offsets = [0, 32], sizes = [1, 32], strides = [1, 1]} : vector<1x64xf32> to vector<1x32xf32>
    %317 = vector.extract_strided_slice %304 {offsets = [0, 64], sizes = [1, 32], strides = [1, 1]} : vector<1x96xf32> to vector<1x32xf32>
    %318 = vector.extract_strided_slice %306 {offsets = [0, 64], sizes = [1, 32], strides = [1, 1]} : vector<1x96xf32> to vector<1x32xf32>
    %319 = arith.mulf %315, %318 : vector<1x32xf32>
    %320 = arith.addf %317, %319 : vector<1x32xf32>
    %321 = math.tanh %320 : vector<1x32xf32>
    %cst_54 = arith.constant 1.000000e+00 : f32
    %322 = vector.broadcast %cst_54 : f32 to vector<1x32xf32>
    %323 = arith.subf %322, %316 : vector<1x32xf32>
    %324 = arith.mulf %323, %321 : vector<1x32xf32>
    %325 = arith.mulf %316, %280 : vector<1x32xf32>
    %326 = arith.addf %324, %325 : vector<1x32xf32>
    %327 = vector.extract_strided_slice %25 {offsets = [1, 0], sizes = [1, 96], strides = [1, 1]} : vector<8x96xf32> to vector<1x96xf32>
    %cst_55 = arith.constant dense<0.000000e+00> : vector<1x96xf32>
    %328 = tpu.matmul %303, %4, %cst_55 {dimension_numbers = #tpu.dot_dimension_numbers<[1], [0], [0], [1], [0, 0, 1, 1], [], []>} : vector<1x32xf32>, vector<32x96xf32>, vector<1x96xf32> -> vector<1x96xf32>
    %329 = arith.addf %328, %14 : vector<1x96xf32>
    %330 = vector.extract_strided_slice %327 {offsets = [0, 0], sizes = [1, 64], strides = [1, 1]} : vector<1x96xf32> to vector<1x64xf32>
    %331 = vector.extract_strided_slice %329 {offsets = [0, 0], sizes = [1, 64], strides = [1, 1]} : vector<1x96xf32> to vector<1x64xf32>
    %332 = arith.addf %330, %331 : vector<1x64xf32>
    %333 = arith.negf %332 : vector<1x64xf32>
    %334 = math.exp %333 : vector<1x64xf32>
    %cst_56 = arith.constant 1.000000e+00 : f32
    %335 = vector.broadcast %cst_56 : f32 to vector<1x64xf32>
    %336 = arith.addf %335, %334 : vector<1x64xf32>
    %337 = arith.divf %335, %336 : vector<1x64xf32>
    %338 = vector.extract_strided_slice %337 {offsets = [0, 0], sizes = [1, 32], strides = [1, 1]} : vector<1x64xf32> to vector<1x32xf32>
    %339 = vector.extract_strided_slice %337 {offsets = [0, 32], sizes = [1, 32], strides = [1, 1]} : vector<1x64xf32> to vector<1x32xf32>
    %340 = vector.extract_strided_slice %327 {offsets = [0, 64], sizes = [1, 32], strides = [1, 1]} : vector<1x96xf32> to vector<1x32xf32>
    %341 = vector.extract_strided_slice %329 {offsets = [0, 64], sizes = [1, 32], strides = [1, 1]} : vector<1x96xf32> to vector<1x32xf32>
    %342 = arith.mulf %338, %341 : vector<1x32xf32>
    %343 = arith.addf %340, %342 : vector<1x32xf32>
    %344 = math.tanh %343 : vector<1x32xf32>
    %cst_57 = arith.constant 1.000000e+00 : f32
    %345 = vector.broadcast %cst_57 : f32 to vector<1x32xf32>
    %346 = arith.subf %345, %339 : vector<1x32xf32>
    %347 = arith.mulf %346, %344 : vector<1x32xf32>
    %348 = arith.mulf %339, %303 : vector<1x32xf32>
    %349 = arith.addf %347, %348 : vector<1x32xf32>
    %350 = vector.extract_strided_slice %22 {offsets = [7, 0], sizes = [1, 96], strides = [1, 1]} : vector<8x96xf32> to vector<1x96xf32>
    %cst_58 = arith.constant dense<0.000000e+00> : vector<1x96xf32>
    %351 = tpu.matmul %326, %2, %cst_58 {dimension_numbers = #tpu.dot_dimension_numbers<[1], [0], [0], [1], [0, 0, 1, 1], [], []>} : vector<1x32xf32>, vector<32x96xf32>, vector<1x96xf32> -> vector<1x96xf32>
    %352 = arith.addf %351, %12 : vector<1x96xf32>
    %353 = vector.extract_strided_slice %350 {offsets = [0, 0], sizes = [1, 64], strides = [1, 1]} : vector<1x96xf32> to vector<1x64xf32>
    %354 = vector.extract_strided_slice %352 {offsets = [0, 0], sizes = [1, 64], strides = [1, 1]} : vector<1x96xf32> to vector<1x64xf32>
    %355 = arith.addf %353, %354 : vector<1x64xf32>
    %356 = arith.negf %355 : vector<1x64xf32>
    %357 = math.exp %356 : vector<1x64xf32>
    %cst_59 = arith.constant 1.000000e+00 : f32
    %358 = vector.broadcast %cst_59 : f32 to vector<1x64xf32>
    %359 = arith.addf %358, %357 : vector<1x64xf32>
    %360 = arith.divf %358, %359 : vector<1x64xf32>
    %361 = vector.extract_strided_slice %360 {offsets = [0, 0], sizes = [1, 32], strides = [1, 1]} : vector<1x64xf32> to vector<1x32xf32>
    %362 = vector.extract_strided_slice %360 {offsets = [0, 32], sizes = [1, 32], strides = [1, 1]} : vector<1x64xf32> to vector<1x32xf32>
    %363 = vector.extract_strided_slice %350 {offsets = [0, 64], sizes = [1, 32], strides = [1, 1]} : vector<1x96xf32> to vector<1x32xf32>
    %364 = vector.extract_strided_slice %352 {offsets = [0, 64], sizes = [1, 32], strides = [1, 1]} : vector<1x96xf32> to vector<1x32xf32>
    %365 = arith.mulf %361, %364 : vector<1x32xf32>
    %366 = arith.addf %363, %365 : vector<1x32xf32>
    %367 = math.tanh %366 : vector<1x32xf32>
    %cst_60 = arith.constant 1.000000e+00 : f32
    %368 = vector.broadcast %cst_60 : f32 to vector<1x32xf32>
    %369 = arith.subf %368, %362 : vector<1x32xf32>
    %370 = arith.mulf %369, %367 : vector<1x32xf32>
    %371 = arith.mulf %362, %326 : vector<1x32xf32>
    %372 = arith.addf %370, %371 : vector<1x32xf32>
    %373 = vector.extract_strided_slice %25 {offsets = [0, 0], sizes = [1, 96], strides = [1, 1]} : vector<8x96xf32> to vector<1x96xf32>
    %cst_61 = arith.constant dense<0.000000e+00> : vector<1x96xf32>
    %374 = tpu.matmul %349, %4, %cst_61 {dimension_numbers = #tpu.dot_dimension_numbers<[1], [0], [0], [1], [0, 0, 1, 1], [], []>} : vector<1x32xf32>, vector<32x96xf32>, vector<1x96xf32> -> vector<1x96xf32>
    %375 = arith.addf %374, %14 : vector<1x96xf32>
    %376 = vector.extract_strided_slice %373 {offsets = [0, 0], sizes = [1, 64], strides = [1, 1]} : vector<1x96xf32> to vector<1x64xf32>
    %377 = vector.extract_strided_slice %375 {offsets = [0, 0], sizes = [1, 64], strides = [1, 1]} : vector<1x96xf32> to vector<1x64xf32>
    %378 = arith.addf %376, %377 : vector<1x64xf32>
    %379 = arith.negf %378 : vector<1x64xf32>
    %380 = math.exp %379 : vector<1x64xf32>
    %cst_62 = arith.constant 1.000000e+00 : f32
    %381 = vector.broadcast %cst_62 : f32 to vector<1x64xf32>
    %382 = arith.addf %381, %380 : vector<1x64xf32>
    %383 = arith.divf %381, %382 : vector<1x64xf32>
    %384 = vector.extract_strided_slice %383 {offsets = [0, 0], sizes = [1, 32], strides = [1, 1]} : vector<1x64xf32> to vector<1x32xf32>
    %385 = vector.extract_strided_slice %383 {offsets = [0, 32], sizes = [1, 32], strides = [1, 1]} : vector<1x64xf32> to vector<1x32xf32>
    %386 = vector.extract_strided_slice %373 {offsets = [0, 64], sizes = [1, 32], strides = [1, 1]} : vector<1x96xf32> to vector<1x32xf32>
    %387 = vector.extract_strided_slice %375 {offsets = [0, 64], sizes = [1, 32], strides = [1, 1]} : vector<1x96xf32> to vector<1x32xf32>
    %388 = arith.mulf %384, %387 : vector<1x32xf32>
    %389 = arith.addf %386, %388 : vector<1x32xf32>
    %390 = math.tanh %389 : vector<1x32xf32>
    %cst_63 = arith.constant 1.000000e+00 : f32
    %391 = vector.broadcast %cst_63 : f32 to vector<1x32xf32>
    %392 = arith.subf %391, %385 : vector<1x32xf32>
    %393 = arith.mulf %392, %390 : vector<1x32xf32>
    %394 = arith.mulf %385, %349 : vector<1x32xf32>
    %395 = arith.addf %393, %394 : vector<1x32xf32>
    %396 = arith.addf %50, %395 : vector<1x32xf32>
    %397 = arith.addf %96, %349 : vector<1x32xf32>
    %398 = arith.addf %142, %303 : vector<1x32xf32>
    %399 = arith.addf %188, %257 : vector<1x32xf32>
    %400 = arith.addf %234, %211 : vector<1x32xf32>
    %401 = arith.addf %280, %165 : vector<1x32xf32>
    %402 = arith.addf %326, %119 : vector<1x32xf32>
    %403 = arith.addf %372, %73 : vector<1x32xf32>
    %404 = tpu.concatenate %396, %397, %398, %399, %400, %401, %402, %403 in 0 : vector<1x32xf32>, vector<1x32xf32>, vector<1x32xf32>, vector<1x32xf32>, vector<1x32xf32>, vector<1x32xf32>, vector<1x32xf32>, vector<1x32xf32> -> vector<8x32xf32>
    %405 = tpu.transpose %404, [1, 0] : vector<8x32xf32> -> vector<32x8xf32>
    %cst_64 = arith.constant dense<0.000000e+00> : vector<64x96xf32>
    %406 = tpu.matmul %0, %5, %cst_64 {dimension_numbers = #tpu.dot_dimension_numbers<[1], [0], [0], [1], [0, 0, 1, 1], [], []>} : vector<64x32xf32>, vector<32x96xf32>, vector<64x96xf32> -> vector<64x96xf32>
    %407 = tpu.iota {dimensions = array<i32: 1>} : vector<1x64xi32>
    %408 = tpu.iota {dimensions = array<i32: 1>} : vector<1x6xi32>
    %c1_i32 = arith.constant 1 : i32
    %409 = vector.broadcast %c1_i32 : i32 to vector<1x1xi32>
    %c0_i32 = arith.constant 0 : i32
    %410 = vector.broadcast %c0_i32 : i32 to vector<1x6xi32>
    %cst_65 = arith.constant 0.000000e+00 : f32
    %411 = vector.broadcast %cst_65 : f32 to vector<1x6xf32>
    %412 = vector.broadcast %409 : vector<1x1xi32> to vector<1x64xi32>
    %413 = arith.cmpi eq, %407, %412 : vector<1x64xi32>
    %414 = arith.extui %413 : vector<1x64xi1> to vector<1x64xi32>
    %415 = arith.sitofp %414 : vector<1x64xi32> to vector<1x64xf32>
    %cst_66 = arith.constant dense<0.000000e+00> : vector<1x96xf32>
    %416 = tpu.matmul %415, %406, %cst_66 {dimension_numbers = #tpu.dot_dimension_numbers<[1], [0], [0], [1], [0, 0, 1, 1], [], []>} : vector<1x64xf32>, vector<64x96xf32>, vector<1x96xf32> -> vector<1x96xf32>
    %417 = arith.addf %416, %15 : vector<1x96xf32>
    %cst_67 = arith.constant dense<0.000000e+00> : vector<1x96xf32>
    %418 = tpu.matmul %372, %6, %cst_67 {dimension_numbers = #tpu.dot_dimension_numbers<[1], [0], [0], [1], [0, 0, 1, 1], [], []>} : vector<1x32xf32>, vector<32x96xf32>, vector<1x96xf32> -> vector<1x96xf32>
    %419 = arith.addf %418, %16 : vector<1x96xf32>
    %420 = vector.extract_strided_slice %417 {offsets = [0, 0], sizes = [1, 64], strides = [1, 1]} : vector<1x96xf32> to vector<1x64xf32>
    %421 = vector.extract_strided_slice %419 {offsets = [0, 0], sizes = [1, 64], strides = [1, 1]} : vector<1x96xf32> to vector<1x64xf32>
    %422 = arith.addf %420, %421 : vector<1x64xf32>
    %423 = arith.negf %422 : vector<1x64xf32>
    %424 = math.exp %423 : vector<1x64xf32>
    %cst_68 = arith.constant 1.000000e+00 : f32
    %425 = vector.broadcast %cst_68 : f32 to vector<1x64xf32>
    %426 = arith.addf %425, %424 : vector<1x64xf32>
    %427 = arith.divf %425, %426 : vector<1x64xf32>
    %428 = vector.extract_strided_slice %427 {offsets = [0, 0], sizes = [1, 32], strides = [1, 1]} : vector<1x64xf32> to vector<1x32xf32>
    %429 = vector.extract_strided_slice %427 {offsets = [0, 32], sizes = [1, 32], strides = [1, 1]} : vector<1x64xf32> to vector<1x32xf32>
    %430 = vector.extract_strided_slice %417 {offsets = [0, 64], sizes = [1, 32], strides = [1, 1]} : vector<1x96xf32> to vector<1x32xf32>
    %431 = vector.extract_strided_slice %419 {offsets = [0, 64], sizes = [1, 32], strides = [1, 1]} : vector<1x96xf32> to vector<1x32xf32>
    %432 = arith.mulf %428, %431 : vector<1x32xf32>
    %433 = arith.addf %430, %432 : vector<1x32xf32>
    %434 = math.tanh %433 : vector<1x32xf32>
    %cst_69 = arith.constant 1.000000e+00 : f32
    %435 = vector.broadcast %cst_69 : f32 to vector<1x32xf32>
    %436 = arith.subf %435, %429 : vector<1x32xf32>
    %437 = arith.mulf %436, %434 : vector<1x32xf32>
    %438 = arith.mulf %429, %372 : vector<1x32xf32>
    %439 = arith.addf %437, %438 : vector<1x32xf32>
    %cst_70 = arith.constant dense<0.000000e+00> : vector<1x8xf32>
    %440 = tpu.matmul %439, %405, %cst_70 {dimension_numbers = #tpu.dot_dimension_numbers<[1], [0], [0], [1], [0, 0, 1, 1], [], []>} : vector<1x32xf32>, vector<32x8xf32>, vector<1x8xf32> -> vector<1x8xf32>
    %cst_71 = arith.constant dense<0xFF800000> : vector<1xf32>
    %441 = vector.multi_reduction <maximumf>, %440, %cst_71 [1] : vector<1x8xf32> to vector<1xf32>
    %442 = vector.shape_cast %441 : vector<1xf32> to vector<1x1xf32>
    %443 = vector.broadcast %442 : vector<1x1xf32> to vector<1x8xf32>
    %444 = arith.subf %440, %443 : vector<1x8xf32>
    %445 = math.exp %444 : vector<1x8xf32>
    %cst_72 = arith.constant dense<0.000000e+00> : vector<1xf32>
    %446 = vector.multi_reduction <add>, %445, %cst_72 [1] : vector<1x8xf32> to vector<1xf32>
    %447 = vector.shape_cast %446 : vector<1xf32> to vector<1x1xf32>
    %448 = tpu.reciprocal %447 : vector<1x1xf32> -> vector<1x1xf32>
    %449 = vector.broadcast %448 : vector<1x1xf32> to vector<1x8xf32>
    %450 = arith.mulf %445, %449 : vector<1x8xf32>
    %cst_73 = arith.constant dense<0.000000e+00> : vector<1x32xf32>
    %451 = tpu.matmul %450, %404, %cst_73 {dimension_numbers = #tpu.dot_dimension_numbers<[1], [0], [0], [1], [0, 0, 1, 1], [], []>} : vector<1x8xf32>, vector<8x32xf32>, vector<1x32xf32> -> vector<1x32xf32>
    %cst_74 = arith.constant dense<0.000000e+00> : vector<1x32xf32>
    %452 = tpu.matmul %439, %7, %cst_74 {dimension_numbers = #tpu.dot_dimension_numbers<[1], [0], [0], [1], [0, 0, 1, 1], [], []>} : vector<1x32xf32>, vector<32x32xf32>, vector<1x32xf32> -> vector<1x32xf32>
    %cst_75 = arith.constant dense<0.000000e+00> : vector<1x32xf32>
    %453 = tpu.matmul %451, %8, %cst_75 {dimension_numbers = #tpu.dot_dimension_numbers<[1], [0], [0], [1], [0, 0, 1, 1], [], []>} : vector<1x32xf32>, vector<32x32xf32>, vector<1x32xf32> -> vector<1x32xf32>
    %454 = arith.addf %452, %453 : vector<1x32xf32>
    %455 = arith.addf %454, %17 : vector<1x32xf32>
    %456 = math.tanh %455 : vector<1x32xf32>
    %cst_76 = arith.constant dense<0.000000e+00> : vector<1x64xf32>
    %457 = tpu.matmul %456, %9, %cst_76 {dimension_numbers = #tpu.dot_dimension_numbers<[1], [0], [0], [1], [0, 0, 1, 1], [], []>} : vector<1x32xf32>, vector<32x64xf32>, vector<1x64xf32> -> vector<1x64xf32>
    %458 = arith.addf %457, %18 : vector<1x64xf32>
    %cst_77 = arith.constant dense<0xFF800000> : vector<1xf32>
    %459 = vector.multi_reduction <maximumf>, %458, %cst_77 [1] : vector<1x64xf32> to vector<1xf32>
    %460 = vector.shape_cast %459 : vector<1xf32> to vector<1x1xf32>
    %461 = vector.broadcast %460 : vector<1x1xf32> to vector<1x64xf32>
    %462 = arith.cmpf oge, %458, %461 : vector<1x64xf32>
    %c64_i32 = arith.constant 64 : i32
    %463 = vector.broadcast %c64_i32 : i32 to vector<1x64xi32>
    %464 = arith.select %462, %407, %463 : vector<1x64xi1>, vector<1x64xi32>
    %cst_78 = arith.constant dense<2147483647> : vector<1xi32>
    %465 = vector.multi_reduction <minsi>, %464, %cst_78 [1] : vector<1x64xi32> to vector<1xi32>
    %466 = vector.shape_cast %465 : vector<1xi32> to vector<1x1xi32>
    %467 = vector.broadcast %460 : vector<1x1xf32> to vector<1x64xf32>
    %468 = arith.subf %458, %467 : vector<1x64xf32>
    %469 = math.exp %468 : vector<1x64xf32>
    %cst_79 = arith.constant dense<0.000000e+00> : vector<1xf32>
    %470 = vector.multi_reduction <add>, %469, %cst_79 [1] : vector<1x64xf32> to vector<1xf32>
    %471 = vector.shape_cast %470 : vector<1xf32> to vector<1x1xf32>
    %472 = tpu.reciprocal %471 : vector<1x1xf32> -> vector<1x1xf32>
    %c0_i32_80 = arith.constant 0 : i32
    %473 = vector.broadcast %c0_i32_80 : i32 to vector<1x6xi32>
    %474 = arith.cmpi eq, %408, %473 : vector<1x6xi32>
    %475 = vector.shape_cast %466 : vector<1x1xi32> to vector<1x1xi32>
    %476 = vector.broadcast %475 : vector<1x1xi32> to vector<1x6xi32>
    %477 = arith.select %474, %476, %410 : vector<1x6xi1>, vector<1x6xi32>
    %478 = vector.shape_cast %472 : vector<1x1xf32> to vector<1x1xf32>
    %479 = vector.broadcast %478 : vector<1x1xf32> to vector<1x6xf32>
    %480 = arith.select %474, %479, %411 : vector<1x6xi1>, vector<1x6xf32>
    %481 = vector.broadcast %466 : vector<1x1xi32> to vector<1x64xi32>
    %482 = arith.cmpi eq, %407, %481 : vector<1x64xi32>
    %483 = arith.extui %482 : vector<1x64xi1> to vector<1x64xi32>
    %484 = arith.sitofp %483 : vector<1x64xi32> to vector<1x64xf32>
    %cst_81 = arith.constant dense<0.000000e+00> : vector<1x96xf32>
    %485 = tpu.matmul %484, %406, %cst_81 {dimension_numbers = #tpu.dot_dimension_numbers<[1], [0], [0], [1], [0, 0, 1, 1], [], []>} : vector<1x64xf32>, vector<64x96xf32>, vector<1x96xf32> -> vector<1x96xf32>
    %486 = arith.addf %485, %15 : vector<1x96xf32>
    %cst_82 = arith.constant dense<0.000000e+00> : vector<1x96xf32>
    %487 = tpu.matmul %439, %6, %cst_82 {dimension_numbers = #tpu.dot_dimension_numbers<[1], [0], [0], [1], [0, 0, 1, 1], [], []>} : vector<1x32xf32>, vector<32x96xf32>, vector<1x96xf32> -> vector<1x96xf32>
    %488 = arith.addf %487, %16 : vector<1x96xf32>
    %489 = vector.extract_strided_slice %486 {offsets = [0, 0], sizes = [1, 64], strides = [1, 1]} : vector<1x96xf32> to vector<1x64xf32>
    %490 = vector.extract_strided_slice %488 {offsets = [0, 0], sizes = [1, 64], strides = [1, 1]} : vector<1x96xf32> to vector<1x64xf32>
    %491 = arith.addf %489, %490 : vector<1x64xf32>
    %492 = arith.negf %491 : vector<1x64xf32>
    %493 = math.exp %492 : vector<1x64xf32>
    %cst_83 = arith.constant 1.000000e+00 : f32
    %494 = vector.broadcast %cst_83 : f32 to vector<1x64xf32>
    %495 = arith.addf %494, %493 : vector<1x64xf32>
    %496 = arith.divf %494, %495 : vector<1x64xf32>
    %497 = vector.extract_strided_slice %496 {offsets = [0, 0], sizes = [1, 32], strides = [1, 1]} : vector<1x64xf32> to vector<1x32xf32>
    %498 = vector.extract_strided_slice %496 {offsets = [0, 32], sizes = [1, 32], strides = [1, 1]} : vector<1x64xf32> to vector<1x32xf32>
    %499 = vector.extract_strided_slice %486 {offsets = [0, 64], sizes = [1, 32], strides = [1, 1]} : vector<1x96xf32> to vector<1x32xf32>
    %500 = vector.extract_strided_slice %488 {offsets = [0, 64], sizes = [1, 32], strides = [1, 1]} : vector<1x96xf32> to vector<1x32xf32>
    %501 = arith.mulf %497, %500 : vector<1x32xf32>
    %502 = arith.addf %499, %501 : vector<1x32xf32>
    %503 = math.tanh %502 : vector<1x32xf32>
    %cst_84 = arith.constant 1.000000e+00 : f32
    %504 = vector.broadcast %cst_84 : f32 to vector<1x32xf32>
    %505 = arith.subf %504, %498 : vector<1x32xf32>
    %506 = arith.mulf %505, %503 : vector<1x32xf32>
    %507 = arith.mulf %498, %439 : vector<1x32xf32>
    %508 = arith.addf %506, %507 : vector<1x32xf32>
    %cst_85 = arith.constant dense<0.000000e+00> : vector<1x8xf32>
    %509 = tpu.matmul %508, %405, %cst_85 {dimension_numbers = #tpu.dot_dimension_numbers<[1], [0], [0], [1], [0, 0, 1, 1], [], []>} : vector<1x32xf32>, vector<32x8xf32>, vector<1x8xf32> -> vector<1x8xf32>
    %cst_86 = arith.constant dense<0xFF800000> : vector<1xf32>
    %510 = vector.multi_reduction <maximumf>, %509, %cst_86 [1] : vector<1x8xf32> to vector<1xf32>
    %511 = vector.shape_cast %510 : vector<1xf32> to vector<1x1xf32>
    %512 = vector.broadcast %511 : vector<1x1xf32> to vector<1x8xf32>
    %513 = arith.subf %509, %512 : vector<1x8xf32>
    %514 = math.exp %513 : vector<1x8xf32>
    %cst_87 = arith.constant dense<0.000000e+00> : vector<1xf32>
    %515 = vector.multi_reduction <add>, %514, %cst_87 [1] : vector<1x8xf32> to vector<1xf32>
    %516 = vector.shape_cast %515 : vector<1xf32> to vector<1x1xf32>
    %517 = tpu.reciprocal %516 : vector<1x1xf32> -> vector<1x1xf32>
    %518 = vector.broadcast %517 : vector<1x1xf32> to vector<1x8xf32>
    %519 = arith.mulf %514, %518 : vector<1x8xf32>
    %cst_88 = arith.constant dense<0.000000e+00> : vector<1x32xf32>
    %520 = tpu.matmul %519, %404, %cst_88 {dimension_numbers = #tpu.dot_dimension_numbers<[1], [0], [0], [1], [0, 0, 1, 1], [], []>} : vector<1x8xf32>, vector<8x32xf32>, vector<1x32xf32> -> vector<1x32xf32>
    %cst_89 = arith.constant dense<0.000000e+00> : vector<1x32xf32>
    %521 = tpu.matmul %508, %7, %cst_89 {dimension_numbers = #tpu.dot_dimension_numbers<[1], [0], [0], [1], [0, 0, 1, 1], [], []>} : vector<1x32xf32>, vector<32x32xf32>, vector<1x32xf32> -> vector<1x32xf32>
    %cst_90 = arith.constant dense<0.000000e+00> : vector<1x32xf32>
    %522 = tpu.matmul %520, %8, %cst_90 {dimension_numbers = #tpu.dot_dimension_numbers<[1], [0], [0], [1], [0, 0, 1, 1], [], []>} : vector<1x32xf32>, vector<32x32xf32>, vector<1x32xf32> -> vector<1x32xf32>
    %523 = arith.addf %521, %522 : vector<1x32xf32>
    %524 = arith.addf %523, %17 : vector<1x32xf32>
    %525 = math.tanh %524 : vector<1x32xf32>
    %cst_91 = arith.constant dense<0.000000e+00> : vector<1x64xf32>
    %526 = tpu.matmul %525, %9, %cst_91 {dimension_numbers = #tpu.dot_dimension_numbers<[1], [0], [0], [1], [0, 0, 1, 1], [], []>} : vector<1x32xf32>, vector<32x64xf32>, vector<1x64xf32> -> vector<1x64xf32>
    %527 = arith.addf %526, %18 : vector<1x64xf32>
    %cst_92 = arith.constant dense<0xFF800000> : vector<1xf32>
    %528 = vector.multi_reduction <maximumf>, %527, %cst_92 [1] : vector<1x64xf32> to vector<1xf32>
    %529 = vector.shape_cast %528 : vector<1xf32> to vector<1x1xf32>
    %530 = vector.broadcast %529 : vector<1x1xf32> to vector<1x64xf32>
    %531 = arith.cmpf oge, %527, %530 : vector<1x64xf32>
    %c64_i32_93 = arith.constant 64 : i32
    %532 = vector.broadcast %c64_i32_93 : i32 to vector<1x64xi32>
    %533 = arith.select %531, %407, %532 : vector<1x64xi1>, vector<1x64xi32>
    %cst_94 = arith.constant dense<2147483647> : vector<1xi32>
    %534 = vector.multi_reduction <minsi>, %533, %cst_94 [1] : vector<1x64xi32> to vector<1xi32>
    %535 = vector.shape_cast %534 : vector<1xi32> to vector<1x1xi32>
    %536 = vector.broadcast %529 : vector<1x1xf32> to vector<1x64xf32>
    %537 = arith.subf %527, %536 : vector<1x64xf32>
    %538 = math.exp %537 : vector<1x64xf32>
    %cst_95 = arith.constant dense<0.000000e+00> : vector<1xf32>
    %539 = vector.multi_reduction <add>, %538, %cst_95 [1] : vector<1x64xf32> to vector<1xf32>
    %540 = vector.shape_cast %539 : vector<1xf32> to vector<1x1xf32>
    %541 = tpu.reciprocal %540 : vector<1x1xf32> -> vector<1x1xf32>
    %c1_i32_96 = arith.constant 1 : i32
    %542 = vector.broadcast %c1_i32_96 : i32 to vector<1x6xi32>
    %543 = arith.cmpi eq, %408, %542 : vector<1x6xi32>
    %544 = vector.shape_cast %535 : vector<1x1xi32> to vector<1x1xi32>
    %545 = vector.broadcast %544 : vector<1x1xi32> to vector<1x6xi32>
    %546 = arith.select %543, %545, %477 : vector<1x6xi1>, vector<1x6xi32>
    %547 = vector.shape_cast %541 : vector<1x1xf32> to vector<1x1xf32>
    %548 = vector.broadcast %547 : vector<1x1xf32> to vector<1x6xf32>
    %549 = arith.select %543, %548, %480 : vector<1x6xi1>, vector<1x6xf32>
    %550 = vector.broadcast %535 : vector<1x1xi32> to vector<1x64xi32>
    %551 = arith.cmpi eq, %407, %550 : vector<1x64xi32>
    %552 = arith.extui %551 : vector<1x64xi1> to vector<1x64xi32>
    %553 = arith.sitofp %552 : vector<1x64xi32> to vector<1x64xf32>
    %cst_97 = arith.constant dense<0.000000e+00> : vector<1x96xf32>
    %554 = tpu.matmul %553, %406, %cst_97 {dimension_numbers = #tpu.dot_dimension_numbers<[1], [0], [0], [1], [0, 0, 1, 1], [], []>} : vector<1x64xf32>, vector<64x96xf32>, vector<1x96xf32> -> vector<1x96xf32>
    %555 = arith.addf %554, %15 : vector<1x96xf32>
    %cst_98 = arith.constant dense<0.000000e+00> : vector<1x96xf32>
    %556 = tpu.matmul %508, %6, %cst_98 {dimension_numbers = #tpu.dot_dimension_numbers<[1], [0], [0], [1], [0, 0, 1, 1], [], []>} : vector<1x32xf32>, vector<32x96xf32>, vector<1x96xf32> -> vector<1x96xf32>
    %557 = arith.addf %556, %16 : vector<1x96xf32>
    %558 = vector.extract_strided_slice %555 {offsets = [0, 0], sizes = [1, 64], strides = [1, 1]} : vector<1x96xf32> to vector<1x64xf32>
    %559 = vector.extract_strided_slice %557 {offsets = [0, 0], sizes = [1, 64], strides = [1, 1]} : vector<1x96xf32> to vector<1x64xf32>
    %560 = arith.addf %558, %559 : vector<1x64xf32>
    %561 = arith.negf %560 : vector<1x64xf32>
    %562 = math.exp %561 : vector<1x64xf32>
    %cst_99 = arith.constant 1.000000e+00 : f32
    %563 = vector.broadcast %cst_99 : f32 to vector<1x64xf32>
    %564 = arith.addf %563, %562 : vector<1x64xf32>
    %565 = arith.divf %563, %564 : vector<1x64xf32>
    %566 = vector.extract_strided_slice %565 {offsets = [0, 0], sizes = [1, 32], strides = [1, 1]} : vector<1x64xf32> to vector<1x32xf32>
    %567 = vector.extract_strided_slice %565 {offsets = [0, 32], sizes = [1, 32], strides = [1, 1]} : vector<1x64xf32> to vector<1x32xf32>
    %568 = vector.extract_strided_slice %555 {offsets = [0, 64], sizes = [1, 32], strides = [1, 1]} : vector<1x96xf32> to vector<1x32xf32>
    %569 = vector.extract_strided_slice %557 {offsets = [0, 64], sizes = [1, 32], strides = [1, 1]} : vector<1x96xf32> to vector<1x32xf32>
    %570 = arith.mulf %566, %569 : vector<1x32xf32>
    %571 = arith.addf %568, %570 : vector<1x32xf32>
    %572 = math.tanh %571 : vector<1x32xf32>
    %cst_100 = arith.constant 1.000000e+00 : f32
    %573 = vector.broadcast %cst_100 : f32 to vector<1x32xf32>
    %574 = arith.subf %573, %567 : vector<1x32xf32>
    %575 = arith.mulf %574, %572 : vector<1x32xf32>
    %576 = arith.mulf %567, %508 : vector<1x32xf32>
    %577 = arith.addf %575, %576 : vector<1x32xf32>
    %cst_101 = arith.constant dense<0.000000e+00> : vector<1x8xf32>
    %578 = tpu.matmul %577, %405, %cst_101 {dimension_numbers = #tpu.dot_dimension_numbers<[1], [0], [0], [1], [0, 0, 1, 1], [], []>} : vector<1x32xf32>, vector<32x8xf32>, vector<1x8xf32> -> vector<1x8xf32>
    %cst_102 = arith.constant dense<0xFF800000> : vector<1xf32>
    %579 = vector.multi_reduction <maximumf>, %578, %cst_102 [1] : vector<1x8xf32> to vector<1xf32>
    %580 = vector.shape_cast %579 : vector<1xf32> to vector<1x1xf32>
    %581 = vector.broadcast %580 : vector<1x1xf32> to vector<1x8xf32>
    %582 = arith.subf %578, %581 : vector<1x8xf32>
    %583 = math.exp %582 : vector<1x8xf32>
    %cst_103 = arith.constant dense<0.000000e+00> : vector<1xf32>
    %584 = vector.multi_reduction <add>, %583, %cst_103 [1] : vector<1x8xf32> to vector<1xf32>
    %585 = vector.shape_cast %584 : vector<1xf32> to vector<1x1xf32>
    %586 = tpu.reciprocal %585 : vector<1x1xf32> -> vector<1x1xf32>
    %587 = vector.broadcast %586 : vector<1x1xf32> to vector<1x8xf32>
    %588 = arith.mulf %583, %587 : vector<1x8xf32>
    %cst_104 = arith.constant dense<0.000000e+00> : vector<1x32xf32>
    %589 = tpu.matmul %588, %404, %cst_104 {dimension_numbers = #tpu.dot_dimension_numbers<[1], [0], [0], [1], [0, 0, 1, 1], [], []>} : vector<1x8xf32>, vector<8x32xf32>, vector<1x32xf32> -> vector<1x32xf32>
    %cst_105 = arith.constant dense<0.000000e+00> : vector<1x32xf32>
    %590 = tpu.matmul %577, %7, %cst_105 {dimension_numbers = #tpu.dot_dimension_numbers<[1], [0], [0], [1], [0, 0, 1, 1], [], []>} : vector<1x32xf32>, vector<32x32xf32>, vector<1x32xf32> -> vector<1x32xf32>
    %cst_106 = arith.constant dense<0.000000e+00> : vector<1x32xf32>
    %591 = tpu.matmul %589, %8, %cst_106 {dimension_numbers = #tpu.dot_dimension_numbers<[1], [0], [0], [1], [0, 0, 1, 1], [], []>} : vector<1x32xf32>, vector<32x32xf32>, vector<1x32xf32> -> vector<1x32xf32>
    %592 = arith.addf %590, %591 : vector<1x32xf32>
    %593 = arith.addf %592, %17 : vector<1x32xf32>
    %594 = math.tanh %593 : vector<1x32xf32>
    %cst_107 = arith.constant dense<0.000000e+00> : vector<1x64xf32>
    %595 = tpu.matmul %594, %9, %cst_107 {dimension_numbers = #tpu.dot_dimension_numbers<[1], [0], [0], [1], [0, 0, 1, 1], [], []>} : vector<1x32xf32>, vector<32x64xf32>, vector<1x64xf32> -> vector<1x64xf32>
    %596 = arith.addf %595, %18 : vector<1x64xf32>
    %cst_108 = arith.constant dense<0xFF800000> : vector<1xf32>
    %597 = vector.multi_reduction <maximumf>, %596, %cst_108 [1] : vector<1x64xf32> to vector<1xf32>
    %598 = vector.shape_cast %597 : vector<1xf32> to vector<1x1xf32>
    %599 = vector.broadcast %598 : vector<1x1xf32> to vector<1x64xf32>
    %600 = arith.cmpf oge, %596, %599 : vector<1x64xf32>
    %c64_i32_109 = arith.constant 64 : i32
    %601 = vector.broadcast %c64_i32_109 : i32 to vector<1x64xi32>
    %602 = arith.select %600, %407, %601 : vector<1x64xi1>, vector<1x64xi32>
    %cst_110 = arith.constant dense<2147483647> : vector<1xi32>
    %603 = vector.multi_reduction <minsi>, %602, %cst_110 [1] : vector<1x64xi32> to vector<1xi32>
    %604 = vector.shape_cast %603 : vector<1xi32> to vector<1x1xi32>
    %605 = vector.broadcast %598 : vector<1x1xf32> to vector<1x64xf32>
    %606 = arith.subf %596, %605 : vector<1x64xf32>
    %607 = math.exp %606 : vector<1x64xf32>
    %cst_111 = arith.constant dense<0.000000e+00> : vector<1xf32>
    %608 = vector.multi_reduction <add>, %607, %cst_111 [1] : vector<1x64xf32> to vector<1xf32>
    %609 = vector.shape_cast %608 : vector<1xf32> to vector<1x1xf32>
    %610 = tpu.reciprocal %609 : vector<1x1xf32> -> vector<1x1xf32>
    %c2_i32 = arith.constant 2 : i32
    %611 = vector.broadcast %c2_i32 : i32 to vector<1x6xi32>
    %612 = arith.cmpi eq, %408, %611 : vector<1x6xi32>
    %613 = vector.shape_cast %604 : vector<1x1xi32> to vector<1x1xi32>
    %614 = vector.broadcast %613 : vector<1x1xi32> to vector<1x6xi32>
    %615 = arith.select %612, %614, %546 : vector<1x6xi1>, vector<1x6xi32>
    %616 = vector.shape_cast %610 : vector<1x1xf32> to vector<1x1xf32>
    %617 = vector.broadcast %616 : vector<1x1xf32> to vector<1x6xf32>
    %618 = arith.select %612, %617, %549 : vector<1x6xi1>, vector<1x6xf32>
    %619 = vector.broadcast %604 : vector<1x1xi32> to vector<1x64xi32>
    %620 = arith.cmpi eq, %407, %619 : vector<1x64xi32>
    %621 = arith.extui %620 : vector<1x64xi1> to vector<1x64xi32>
    %622 = arith.sitofp %621 : vector<1x64xi32> to vector<1x64xf32>
    %cst_112 = arith.constant dense<0.000000e+00> : vector<1x96xf32>
    %623 = tpu.matmul %622, %406, %cst_112 {dimension_numbers = #tpu.dot_dimension_numbers<[1], [0], [0], [1], [0, 0, 1, 1], [], []>} : vector<1x64xf32>, vector<64x96xf32>, vector<1x96xf32> -> vector<1x96xf32>
    %624 = arith.addf %623, %15 : vector<1x96xf32>
    %cst_113 = arith.constant dense<0.000000e+00> : vector<1x96xf32>
    %625 = tpu.matmul %577, %6, %cst_113 {dimension_numbers = #tpu.dot_dimension_numbers<[1], [0], [0], [1], [0, 0, 1, 1], [], []>} : vector<1x32xf32>, vector<32x96xf32>, vector<1x96xf32> -> vector<1x96xf32>
    %626 = arith.addf %625, %16 : vector<1x96xf32>
    %627 = vector.extract_strided_slice %624 {offsets = [0, 0], sizes = [1, 64], strides = [1, 1]} : vector<1x96xf32> to vector<1x64xf32>
    %628 = vector.extract_strided_slice %626 {offsets = [0, 0], sizes = [1, 64], strides = [1, 1]} : vector<1x96xf32> to vector<1x64xf32>
    %629 = arith.addf %627, %628 : vector<1x64xf32>
    %630 = arith.negf %629 : vector<1x64xf32>
    %631 = math.exp %630 : vector<1x64xf32>
    %cst_114 = arith.constant 1.000000e+00 : f32
    %632 = vector.broadcast %cst_114 : f32 to vector<1x64xf32>
    %633 = arith.addf %632, %631 : vector<1x64xf32>
    %634 = arith.divf %632, %633 : vector<1x64xf32>
    %635 = vector.extract_strided_slice %634 {offsets = [0, 0], sizes = [1, 32], strides = [1, 1]} : vector<1x64xf32> to vector<1x32xf32>
    %636 = vector.extract_strided_slice %634 {offsets = [0, 32], sizes = [1, 32], strides = [1, 1]} : vector<1x64xf32> to vector<1x32xf32>
    %637 = vector.extract_strided_slice %624 {offsets = [0, 64], sizes = [1, 32], strides = [1, 1]} : vector<1x96xf32> to vector<1x32xf32>
    %638 = vector.extract_strided_slice %626 {offsets = [0, 64], sizes = [1, 32], strides = [1, 1]} : vector<1x96xf32> to vector<1x32xf32>
    %639 = arith.mulf %635, %638 : vector<1x32xf32>
    %640 = arith.addf %637, %639 : vector<1x32xf32>
    %641 = math.tanh %640 : vector<1x32xf32>
    %cst_115 = arith.constant 1.000000e+00 : f32
    %642 = vector.broadcast %cst_115 : f32 to vector<1x32xf32>
    %643 = arith.subf %642, %636 : vector<1x32xf32>
    %644 = arith.mulf %643, %641 : vector<1x32xf32>
    %645 = arith.mulf %636, %577 : vector<1x32xf32>
    %646 = arith.addf %644, %645 : vector<1x32xf32>
    %cst_116 = arith.constant dense<0.000000e+00> : vector<1x8xf32>
    %647 = tpu.matmul %646, %405, %cst_116 {dimension_numbers = #tpu.dot_dimension_numbers<[1], [0], [0], [1], [0, 0, 1, 1], [], []>} : vector<1x32xf32>, vector<32x8xf32>, vector<1x8xf32> -> vector<1x8xf32>
    %cst_117 = arith.constant dense<0xFF800000> : vector<1xf32>
    %648 = vector.multi_reduction <maximumf>, %647, %cst_117 [1] : vector<1x8xf32> to vector<1xf32>
    %649 = vector.shape_cast %648 : vector<1xf32> to vector<1x1xf32>
    %650 = vector.broadcast %649 : vector<1x1xf32> to vector<1x8xf32>
    %651 = arith.subf %647, %650 : vector<1x8xf32>
    %652 = math.exp %651 : vector<1x8xf32>
    %cst_118 = arith.constant dense<0.000000e+00> : vector<1xf32>
    %653 = vector.multi_reduction <add>, %652, %cst_118 [1] : vector<1x8xf32> to vector<1xf32>
    %654 = vector.shape_cast %653 : vector<1xf32> to vector<1x1xf32>
    %655 = tpu.reciprocal %654 : vector<1x1xf32> -> vector<1x1xf32>
    %656 = vector.broadcast %655 : vector<1x1xf32> to vector<1x8xf32>
    %657 = arith.mulf %652, %656 : vector<1x8xf32>
    %cst_119 = arith.constant dense<0.000000e+00> : vector<1x32xf32>
    %658 = tpu.matmul %657, %404, %cst_119 {dimension_numbers = #tpu.dot_dimension_numbers<[1], [0], [0], [1], [0, 0, 1, 1], [], []>} : vector<1x8xf32>, vector<8x32xf32>, vector<1x32xf32> -> vector<1x32xf32>
    %cst_120 = arith.constant dense<0.000000e+00> : vector<1x32xf32>
    %659 = tpu.matmul %646, %7, %cst_120 {dimension_numbers = #tpu.dot_dimension_numbers<[1], [0], [0], [1], [0, 0, 1, 1], [], []>} : vector<1x32xf32>, vector<32x32xf32>, vector<1x32xf32> -> vector<1x32xf32>
    %cst_121 = arith.constant dense<0.000000e+00> : vector<1x32xf32>
    %660 = tpu.matmul %658, %8, %cst_121 {dimension_numbers = #tpu.dot_dimension_numbers<[1], [0], [0], [1], [0, 0, 1, 1], [], []>} : vector<1x32xf32>, vector<32x32xf32>, vector<1x32xf32> -> vector<1x32xf32>
    %661 = arith.addf %659, %660 : vector<1x32xf32>
    %662 = arith.addf %661, %17 : vector<1x32xf32>
    %663 = math.tanh %662 : vector<1x32xf32>
    %cst_122 = arith.constant dense<0.000000e+00> : vector<1x64xf32>
    %664 = tpu.matmul %663, %9, %cst_122 {dimension_numbers = #tpu.dot_dimension_numbers<[1], [0], [0], [1], [0, 0, 1, 1], [], []>} : vector<1x32xf32>, vector<32x64xf32>, vector<1x64xf32> -> vector<1x64xf32>
    %665 = arith.addf %664, %18 : vector<1x64xf32>
    %cst_123 = arith.constant dense<0xFF800000> : vector<1xf32>
    %666 = vector.multi_reduction <maximumf>, %665, %cst_123 [1] : vector<1x64xf32> to vector<1xf32>
    %667 = vector.shape_cast %666 : vector<1xf32> to vector<1x1xf32>
    %668 = vector.broadcast %667 : vector<1x1xf32> to vector<1x64xf32>
    %669 = arith.cmpf oge, %665, %668 : vector<1x64xf32>
    %c64_i32_124 = arith.constant 64 : i32
    %670 = vector.broadcast %c64_i32_124 : i32 to vector<1x64xi32>
    %671 = arith.select %669, %407, %670 : vector<1x64xi1>, vector<1x64xi32>
    %cst_125 = arith.constant dense<2147483647> : vector<1xi32>
    %672 = vector.multi_reduction <minsi>, %671, %cst_125 [1] : vector<1x64xi32> to vector<1xi32>
    %673 = vector.shape_cast %672 : vector<1xi32> to vector<1x1xi32>
    %674 = vector.broadcast %667 : vector<1x1xf32> to vector<1x64xf32>
    %675 = arith.subf %665, %674 : vector<1x64xf32>
    %676 = math.exp %675 : vector<1x64xf32>
    %cst_126 = arith.constant dense<0.000000e+00> : vector<1xf32>
    %677 = vector.multi_reduction <add>, %676, %cst_126 [1] : vector<1x64xf32> to vector<1xf32>
    %678 = vector.shape_cast %677 : vector<1xf32> to vector<1x1xf32>
    %679 = tpu.reciprocal %678 : vector<1x1xf32> -> vector<1x1xf32>
    %c3_i32 = arith.constant 3 : i32
    %680 = vector.broadcast %c3_i32 : i32 to vector<1x6xi32>
    %681 = arith.cmpi eq, %408, %680 : vector<1x6xi32>
    %682 = vector.shape_cast %673 : vector<1x1xi32> to vector<1x1xi32>
    %683 = vector.broadcast %682 : vector<1x1xi32> to vector<1x6xi32>
    %684 = arith.select %681, %683, %615 : vector<1x6xi1>, vector<1x6xi32>
    %685 = vector.shape_cast %679 : vector<1x1xf32> to vector<1x1xf32>
    %686 = vector.broadcast %685 : vector<1x1xf32> to vector<1x6xf32>
    %687 = arith.select %681, %686, %618 : vector<1x6xi1>, vector<1x6xf32>
    %688 = vector.broadcast %673 : vector<1x1xi32> to vector<1x64xi32>
    %689 = arith.cmpi eq, %407, %688 : vector<1x64xi32>
    %690 = arith.extui %689 : vector<1x64xi1> to vector<1x64xi32>
    %691 = arith.sitofp %690 : vector<1x64xi32> to vector<1x64xf32>
    %cst_127 = arith.constant dense<0.000000e+00> : vector<1x96xf32>
    %692 = tpu.matmul %691, %406, %cst_127 {dimension_numbers = #tpu.dot_dimension_numbers<[1], [0], [0], [1], [0, 0, 1, 1], [], []>} : vector<1x64xf32>, vector<64x96xf32>, vector<1x96xf32> -> vector<1x96xf32>
    %693 = arith.addf %692, %15 : vector<1x96xf32>
    %cst_128 = arith.constant dense<0.000000e+00> : vector<1x96xf32>
    %694 = tpu.matmul %646, %6, %cst_128 {dimension_numbers = #tpu.dot_dimension_numbers<[1], [0], [0], [1], [0, 0, 1, 1], [], []>} : vector<1x32xf32>, vector<32x96xf32>, vector<1x96xf32> -> vector<1x96xf32>
    %695 = arith.addf %694, %16 : vector<1x96xf32>
    %696 = vector.extract_strided_slice %693 {offsets = [0, 0], sizes = [1, 64], strides = [1, 1]} : vector<1x96xf32> to vector<1x64xf32>
    %697 = vector.extract_strided_slice %695 {offsets = [0, 0], sizes = [1, 64], strides = [1, 1]} : vector<1x96xf32> to vector<1x64xf32>
    %698 = arith.addf %696, %697 : vector<1x64xf32>
    %699 = arith.negf %698 : vector<1x64xf32>
    %700 = math.exp %699 : vector<1x64xf32>
    %cst_129 = arith.constant 1.000000e+00 : f32
    %701 = vector.broadcast %cst_129 : f32 to vector<1x64xf32>
    %702 = arith.addf %701, %700 : vector<1x64xf32>
    %703 = arith.divf %701, %702 : vector<1x64xf32>
    %704 = vector.extract_strided_slice %703 {offsets = [0, 0], sizes = [1, 32], strides = [1, 1]} : vector<1x64xf32> to vector<1x32xf32>
    %705 = vector.extract_strided_slice %703 {offsets = [0, 32], sizes = [1, 32], strides = [1, 1]} : vector<1x64xf32> to vector<1x32xf32>
    %706 = vector.extract_strided_slice %693 {offsets = [0, 64], sizes = [1, 32], strides = [1, 1]} : vector<1x96xf32> to vector<1x32xf32>
    %707 = vector.extract_strided_slice %695 {offsets = [0, 64], sizes = [1, 32], strides = [1, 1]} : vector<1x96xf32> to vector<1x32xf32>
    %708 = arith.mulf %704, %707 : vector<1x32xf32>
    %709 = arith.addf %706, %708 : vector<1x32xf32>
    %710 = math.tanh %709 : vector<1x32xf32>
    %cst_130 = arith.constant 1.000000e+00 : f32
    %711 = vector.broadcast %cst_130 : f32 to vector<1x32xf32>
    %712 = arith.subf %711, %705 : vector<1x32xf32>
    %713 = arith.mulf %712, %710 : vector<1x32xf32>
    %714 = arith.mulf %705, %646 : vector<1x32xf32>
    %715 = arith.addf %713, %714 : vector<1x32xf32>
    %cst_131 = arith.constant dense<0.000000e+00> : vector<1x8xf32>
    %716 = tpu.matmul %715, %405, %cst_131 {dimension_numbers = #tpu.dot_dimension_numbers<[1], [0], [0], [1], [0, 0, 1, 1], [], []>} : vector<1x32xf32>, vector<32x8xf32>, vector<1x8xf32> -> vector<1x8xf32>
    %cst_132 = arith.constant dense<0xFF800000> : vector<1xf32>
    %717 = vector.multi_reduction <maximumf>, %716, %cst_132 [1] : vector<1x8xf32> to vector<1xf32>
    %718 = vector.shape_cast %717 : vector<1xf32> to vector<1x1xf32>
    %719 = vector.broadcast %718 : vector<1x1xf32> to vector<1x8xf32>
    %720 = arith.subf %716, %719 : vector<1x8xf32>
    %721 = math.exp %720 : vector<1x8xf32>
    %cst_133 = arith.constant dense<0.000000e+00> : vector<1xf32>
    %722 = vector.multi_reduction <add>, %721, %cst_133 [1] : vector<1x8xf32> to vector<1xf32>
    %723 = vector.shape_cast %722 : vector<1xf32> to vector<1x1xf32>
    %724 = tpu.reciprocal %723 : vector<1x1xf32> -> vector<1x1xf32>
    %725 = vector.broadcast %724 : vector<1x1xf32> to vector<1x8xf32>
    %726 = arith.mulf %721, %725 : vector<1x8xf32>
    %cst_134 = arith.constant dense<0.000000e+00> : vector<1x32xf32>
    %727 = tpu.matmul %726, %404, %cst_134 {dimension_numbers = #tpu.dot_dimension_numbers<[1], [0], [0], [1], [0, 0, 1, 1], [], []>} : vector<1x8xf32>, vector<8x32xf32>, vector<1x32xf32> -> vector<1x32xf32>
    %cst_135 = arith.constant dense<0.000000e+00> : vector<1x32xf32>
    %728 = tpu.matmul %715, %7, %cst_135 {dimension_numbers = #tpu.dot_dimension_numbers<[1], [0], [0], [1], [0, 0, 1, 1], [], []>} : vector<1x32xf32>, vector<32x32xf32>, vector<1x32xf32> -> vector<1x32xf32>
    %cst_136 = arith.constant dense<0.000000e+00> : vector<1x32xf32>
    %729 = tpu.matmul %727, %8, %cst_136 {dimension_numbers = #tpu.dot_dimension_numbers<[1], [0], [0], [1], [0, 0, 1, 1], [], []>} : vector<1x32xf32>, vector<32x32xf32>, vector<1x32xf32> -> vector<1x32xf32>
    %730 = arith.addf %728, %729 : vector<1x32xf32>
    %731 = arith.addf %730, %17 : vector<1x32xf32>
    %732 = math.tanh %731 : vector<1x32xf32>
    %cst_137 = arith.constant dense<0.000000e+00> : vector<1x64xf32>
    %733 = tpu.matmul %732, %9, %cst_137 {dimension_numbers = #tpu.dot_dimension_numbers<[1], [0], [0], [1], [0, 0, 1, 1], [], []>} : vector<1x32xf32>, vector<32x64xf32>, vector<1x64xf32> -> vector<1x64xf32>
    %734 = arith.addf %733, %18 : vector<1x64xf32>
    %cst_138 = arith.constant dense<0xFF800000> : vector<1xf32>
    %735 = vector.multi_reduction <maximumf>, %734, %cst_138 [1] : vector<1x64xf32> to vector<1xf32>
    %736 = vector.shape_cast %735 : vector<1xf32> to vector<1x1xf32>
    %737 = vector.broadcast %736 : vector<1x1xf32> to vector<1x64xf32>
    %738 = arith.cmpf oge, %734, %737 : vector<1x64xf32>
    %c64_i32_139 = arith.constant 64 : i32
    %739 = vector.broadcast %c64_i32_139 : i32 to vector<1x64xi32>
    %740 = arith.select %738, %407, %739 : vector<1x64xi1>, vector<1x64xi32>
    %cst_140 = arith.constant dense<2147483647> : vector<1xi32>
    %741 = vector.multi_reduction <minsi>, %740, %cst_140 [1] : vector<1x64xi32> to vector<1xi32>
    %742 = vector.shape_cast %741 : vector<1xi32> to vector<1x1xi32>
    %743 = vector.broadcast %736 : vector<1x1xf32> to vector<1x64xf32>
    %744 = arith.subf %734, %743 : vector<1x64xf32>
    %745 = math.exp %744 : vector<1x64xf32>
    %cst_141 = arith.constant dense<0.000000e+00> : vector<1xf32>
    %746 = vector.multi_reduction <add>, %745, %cst_141 [1] : vector<1x64xf32> to vector<1xf32>
    %747 = vector.shape_cast %746 : vector<1xf32> to vector<1x1xf32>
    %748 = tpu.reciprocal %747 : vector<1x1xf32> -> vector<1x1xf32>
    %c4_i32 = arith.constant 4 : i32
    %749 = vector.broadcast %c4_i32 : i32 to vector<1x6xi32>
    %750 = arith.cmpi eq, %408, %749 : vector<1x6xi32>
    %751 = vector.shape_cast %742 : vector<1x1xi32> to vector<1x1xi32>
    %752 = vector.broadcast %751 : vector<1x1xi32> to vector<1x6xi32>
    %753 = arith.select %750, %752, %684 : vector<1x6xi1>, vector<1x6xi32>
    %754 = vector.shape_cast %748 : vector<1x1xf32> to vector<1x1xf32>
    %755 = vector.broadcast %754 : vector<1x1xf32> to vector<1x6xf32>
    %756 = arith.select %750, %755, %687 : vector<1x6xi1>, vector<1x6xf32>
    %757 = vector.broadcast %742 : vector<1x1xi32> to vector<1x64xi32>
    %758 = arith.cmpi eq, %407, %757 : vector<1x64xi32>
    %759 = arith.extui %758 : vector<1x64xi1> to vector<1x64xi32>
    %760 = arith.sitofp %759 : vector<1x64xi32> to vector<1x64xf32>
    %cst_142 = arith.constant dense<0.000000e+00> : vector<1x96xf32>
    %761 = tpu.matmul %760, %406, %cst_142 {dimension_numbers = #tpu.dot_dimension_numbers<[1], [0], [0], [1], [0, 0, 1, 1], [], []>} : vector<1x64xf32>, vector<64x96xf32>, vector<1x96xf32> -> vector<1x96xf32>
    %762 = arith.addf %761, %15 : vector<1x96xf32>
    %cst_143 = arith.constant dense<0.000000e+00> : vector<1x96xf32>
    %763 = tpu.matmul %715, %6, %cst_143 {dimension_numbers = #tpu.dot_dimension_numbers<[1], [0], [0], [1], [0, 0, 1, 1], [], []>} : vector<1x32xf32>, vector<32x96xf32>, vector<1x96xf32> -> vector<1x96xf32>
    %764 = arith.addf %763, %16 : vector<1x96xf32>
    %765 = vector.extract_strided_slice %762 {offsets = [0, 0], sizes = [1, 64], strides = [1, 1]} : vector<1x96xf32> to vector<1x64xf32>
    %766 = vector.extract_strided_slice %764 {offsets = [0, 0], sizes = [1, 64], strides = [1, 1]} : vector<1x96xf32> to vector<1x64xf32>
    %767 = arith.addf %765, %766 : vector<1x64xf32>
    %768 = arith.negf %767 : vector<1x64xf32>
    %769 = math.exp %768 : vector<1x64xf32>
    %cst_144 = arith.constant 1.000000e+00 : f32
    %770 = vector.broadcast %cst_144 : f32 to vector<1x64xf32>
    %771 = arith.addf %770, %769 : vector<1x64xf32>
    %772 = arith.divf %770, %771 : vector<1x64xf32>
    %773 = vector.extract_strided_slice %772 {offsets = [0, 0], sizes = [1, 32], strides = [1, 1]} : vector<1x64xf32> to vector<1x32xf32>
    %774 = vector.extract_strided_slice %772 {offsets = [0, 32], sizes = [1, 32], strides = [1, 1]} : vector<1x64xf32> to vector<1x32xf32>
    %775 = vector.extract_strided_slice %762 {offsets = [0, 64], sizes = [1, 32], strides = [1, 1]} : vector<1x96xf32> to vector<1x32xf32>
    %776 = vector.extract_strided_slice %764 {offsets = [0, 64], sizes = [1, 32], strides = [1, 1]} : vector<1x96xf32> to vector<1x32xf32>
    %777 = arith.mulf %773, %776 : vector<1x32xf32>
    %778 = arith.addf %775, %777 : vector<1x32xf32>
    %779 = math.tanh %778 : vector<1x32xf32>
    %cst_145 = arith.constant 1.000000e+00 : f32
    %780 = vector.broadcast %cst_145 : f32 to vector<1x32xf32>
    %781 = arith.subf %780, %774 : vector<1x32xf32>
    %782 = arith.mulf %781, %779 : vector<1x32xf32>
    %783 = arith.mulf %774, %715 : vector<1x32xf32>
    %784 = arith.addf %782, %783 : vector<1x32xf32>
    %cst_146 = arith.constant dense<0.000000e+00> : vector<1x8xf32>
    %785 = tpu.matmul %784, %405, %cst_146 {dimension_numbers = #tpu.dot_dimension_numbers<[1], [0], [0], [1], [0, 0, 1, 1], [], []>} : vector<1x32xf32>, vector<32x8xf32>, vector<1x8xf32> -> vector<1x8xf32>
    %cst_147 = arith.constant dense<0xFF800000> : vector<1xf32>
    %786 = vector.multi_reduction <maximumf>, %785, %cst_147 [1] : vector<1x8xf32> to vector<1xf32>
    %787 = vector.shape_cast %786 : vector<1xf32> to vector<1x1xf32>
    %788 = vector.broadcast %787 : vector<1x1xf32> to vector<1x8xf32>
    %789 = arith.subf %785, %788 : vector<1x8xf32>
    %790 = math.exp %789 : vector<1x8xf32>
    %cst_148 = arith.constant dense<0.000000e+00> : vector<1xf32>
    %791 = vector.multi_reduction <add>, %790, %cst_148 [1] : vector<1x8xf32> to vector<1xf32>
    %792 = vector.shape_cast %791 : vector<1xf32> to vector<1x1xf32>
    %793 = tpu.reciprocal %792 : vector<1x1xf32> -> vector<1x1xf32>
    %794 = vector.broadcast %793 : vector<1x1xf32> to vector<1x8xf32>
    %795 = arith.mulf %790, %794 : vector<1x8xf32>
    %cst_149 = arith.constant dense<0.000000e+00> : vector<1x32xf32>
    %796 = tpu.matmul %795, %404, %cst_149 {dimension_numbers = #tpu.dot_dimension_numbers<[1], [0], [0], [1], [0, 0, 1, 1], [], []>} : vector<1x8xf32>, vector<8x32xf32>, vector<1x32xf32> -> vector<1x32xf32>
    %cst_150 = arith.constant dense<0.000000e+00> : vector<1x32xf32>
    %797 = tpu.matmul %784, %7, %cst_150 {dimension_numbers = #tpu.dot_dimension_numbers<[1], [0], [0], [1], [0, 0, 1, 1], [], []>} : vector<1x32xf32>, vector<32x32xf32>, vector<1x32xf32> -> vector<1x32xf32>
    %cst_151 = arith.constant dense<0.000000e+00> : vector<1x32xf32>
    %798 = tpu.matmul %796, %8, %cst_151 {dimension_numbers = #tpu.dot_dimension_numbers<[1], [0], [0], [1], [0, 0, 1, 1], [], []>} : vector<1x32xf32>, vector<32x32xf32>, vector<1x32xf32> -> vector<1x32xf32>
    %799 = arith.addf %797, %798 : vector<1x32xf32>
    %800 = arith.addf %799, %17 : vector<1x32xf32>
    %801 = math.tanh %800 : vector<1x32xf32>
    %cst_152 = arith.constant dense<0.000000e+00> : vector<1x64xf32>
    %802 = tpu.matmul %801, %9, %cst_152 {dimension_numbers = #tpu.dot_dimension_numbers<[1], [0], [0], [1], [0, 0, 1, 1], [], []>} : vector<1x32xf32>, vector<32x64xf32>, vector<1x64xf32> -> vector<1x64xf32>
    %803 = arith.addf %802, %18 : vector<1x64xf32>
    %cst_153 = arith.constant dense<0xFF800000> : vector<1xf32>
    %804 = vector.multi_reduction <maximumf>, %803, %cst_153 [1] : vector<1x64xf32> to vector<1xf32>
    %805 = vector.shape_cast %804 : vector<1xf32> to vector<1x1xf32>
    %806 = vector.broadcast %805 : vector<1x1xf32> to vector<1x64xf32>
    %807 = arith.cmpf oge, %803, %806 : vector<1x64xf32>
    %c64_i32_154 = arith.constant 64 : i32
    %808 = vector.broadcast %c64_i32_154 : i32 to vector<1x64xi32>
    %809 = arith.select %807, %407, %808 : vector<1x64xi1>, vector<1x64xi32>
    %cst_155 = arith.constant dense<2147483647> : vector<1xi32>
    %810 = vector.multi_reduction <minsi>, %809, %cst_155 [1] : vector<1x64xi32> to vector<1xi32>
    %811 = vector.shape_cast %810 : vector<1xi32> to vector<1x1xi32>
    %812 = vector.broadcast %805 : vector<1x1xf32> to vector<1x64xf32>
    %813 = arith.subf %803, %812 : vector<1x64xf32>
    %814 = math.exp %813 : vector<1x64xf32>
    %cst_156 = arith.constant dense<0.000000e+00> : vector<1xf32>
    %815 = vector.multi_reduction <add>, %814, %cst_156 [1] : vector<1x64xf32> to vector<1xf32>
    %816 = vector.shape_cast %815 : vector<1xf32> to vector<1x1xf32>
    %817 = tpu.reciprocal %816 : vector<1x1xf32> -> vector<1x1xf32>
    %c5_i32 = arith.constant 5 : i32
    %818 = vector.broadcast %c5_i32 : i32 to vector<1x6xi32>
    %819 = arith.cmpi eq, %408, %818 : vector<1x6xi32>
    %820 = vector.shape_cast %811 : vector<1x1xi32> to vector<1x1xi32>
    %821 = vector.broadcast %820 : vector<1x1xi32> to vector<1x6xi32>
    %822 = arith.select %819, %821, %753 : vector<1x6xi1>, vector<1x6xi32>
    %823 = vector.shape_cast %817 : vector<1x1xf32> to vector<1x1xf32>
    %824 = vector.broadcast %823 : vector<1x1xf32> to vector<1x6xf32>
    %825 = arith.select %819, %824, %756 : vector<1x6xi1>, vector<1x6xf32>
    %c0_157 = arith.constant 0 : index
    %c0_158 = arith.constant 0 : index
    %826 = vector.load %arg2[%c0_157, %c0_158] : memref<1x6xi32, #tpu.memory_space<vmem>>, vector<1x6xi32>
    tpu.vector_store %arg2[%c0_157, %c0_158], %822 {strides = array<i32>} : memref<1x6xi32, #tpu.memory_space<vmem>>, vector<1x6xi32>,
    %c0_159 = arith.constant 0 : index
    %c0_160 = arith.constant 0 : index
    %827 = vector.load %arg3[%c0_159, %c0_160] : memref<1x6xf32, #tpu.memory_space<vmem>>, vector<1x6xf32>
    tpu.vector_store %arg3[%c0_159, %c0_160], %825 {strides = array<i32>} : memref<1x6xf32, #tpu.memory_space<vmem>>, vector<1x6xf32>,
    return
  }
}

</mosaic_0001>

<bundles_post_ra>
// kernel: greedy_search_decoder.1
= control target key start
LH: loop header
LB: loop body
LE: loop exit
PB: predicated region body
PF: predicated region fallthrough
CT: control target
= control target key end

     0   :  { %9 = vsyncpa [#allocation3], 0  ;;  %s8227_s0 = inlined_call_operand.vmem [shape: f32[8,32], index: 0, kind: input, shape index: {}]   ;;  %s8228_s1 = inlined_call_operand.hbm [shape: f32[360,128], index: 1, kind: input, shape index: {}]   ;;  %s8229_s2 = inlined_call_operand.hbm [shape: s32[1,6], index: 2, kind: output, shape index: {0}]   ;;  %s8230_s3 = inlined_call_operand.hbm [shape: f32[1,6], index: 3, kind: output, shape index: {1}]  }
   0x1   :  { %10 = vsyncpa [#allocation4], 0 }
   0x2   :  { %11 = vsyncpa [#allocation7], 0  ;;  %s7255_s12 = smov [#allocation2]   ;;  %s7183_s16 = scalar_lea.hbm %s8228_s1, 5760 }
   0x3   :  { %s19_s13 = sshll.u32 %s7255_s12, 4  ;;  %p7184_p0 = scmp.ne.s32.totalorder %s8228_s1, %s7183_s16  ;;  %s20_s13 = int_to_ptr.vmem [resolvable:$true] %s19_s13 }
   0x4   :  { %p7187_p1 = scmp.lt.u32.totalorder %s7183_s16, %s8228_s1 }
   0x6   :  { %p7189_p2 = pnand %p7187_p1, %p7184_p0 }
   0x8   :  { %7192 = shalt.err (!%p7189_p2)
}
   0x9   :  { %s7193_s21 = scalar_lea.vmem %s20_s13, 5760  ;;  %p7198_p4 = scmp.lt.s32.totalorder %s20_s13, %s20_s13 }
   0xa   :  { %p7194_p3 = scmp.ne.s32.totalorder %s20_s13, %s7193_s21  ;;  %p7199_p5 = scmp.lt.s32.totalorder %s7193_s21, %s7193_s21 }
   0xc   :  { %p7200_p6 = por %p7199_p5, %p7198_p4 }
   0xe   :  { %p7201_p7 = pnand %p7200_p6, %p7194_p3 }
  0x10   :  { %7204 = shalt.err (!%p7201_p7)
}
  0x11   :  { %s7256_s22 = smov 128   ;;  %s7257_s23 = smov 8  }
  0x12   :  { %25 = dma.hbm_to_vmem [thread:$0]  %s8228_s1, 5760, %s20_s13, [#allocation3], %s7256_s22, %s7256_s22, %s7257_s23  }
  0x13   :  { %7249 = dma.done.wait [#allocation3], 5760  }
  0x14   :  { %7250 = vsyncadd [#allocation3], 4294961536  ;;  %v7258_v0 = vmov 0.0|0.0   ;;  %vm7259_vm0 = vmmov 0   ;;  %v7260_v1 = vmov 0.0   ;;  %v37_v2 = vld [vmem:[#allocation2 + $0x40] sm:$0xff]  ;;  %v75_v38 = vlaneseq }
  0x15   :  { %6648 = vmatprep.subr.bf16.mxu0 %v7258_v0  ;;  %6000 = vmatprep.mubr.msk.f32.mxu0 %vm7259_vm0, %v7260_v1  ;;  %v38_v3 = vld [vmem:[#allocation2 + $0x48] sm:$0xff]  ;;  %v39_v4 = vld [vmem:[#allocation2 + $0x50] sm:$0xff]  ;;  %v40_v6 = vld [vmem:[#allocation2 + $0x58] sm:$0xff]  ;;  %vm79_vm1 = vcmask 261120   ;;  %s7262_s27 = smov 96   ;;  %vm2067_vm3 = vcmask 523264  }
  0x16   :  { %6654 = vmatprep.subr.bf16.mxu1 %v7258_v0  ;;  %6011 = vmatprep.mubr.msk.f32.mxu1 %vm7259_vm0, %v7260_v1  ;;  %v6649_v5 = vpack.c.bf16 %v38_v3, %v37_v2  ;;  %v6652_v7 = vpack.c.bf16 %v40_v6, %v39_v4  ;;  %v45_v8 = vld [vmem:[#allocation2 + $0x80] sm:$0xff]  ;;  %v46_v9 = vld [vmem:[#allocation2 + $0x88] sm:$0xff]  ;;  %v47_v10 = vld [vmem:[#allocation2 + $0x90] sm:$0xff]  ;;  %v76_v39 = vshrl.u32 %v75_v38, 7  ;;  %vm1917_vm4 = vcmask 1040384   ;;  %s7263_s28 = smov [#allocation6]  }
  0x17   :  { %v41_v11 = vld [vmem:[#allocation2 + $0x60] sm:$0xff]  ;;  %v42_v12 = vld [vmem:[#allocation2 + $0x68] sm:$0xff]  ;;  %v6655_v13 = vpack.c.bf16 %v46_v9, %v45_v8  ;;  %v48_v14 = vld [vmem:[#allocation2 + $0x98] sm:$0xff]  ;;  %vm1919_vm5 = vcmask 1041408   ;;  %vm1921_vm6 = vcmask 1042432   ;;  %vm1923_vm7 = vcmask 1043456  }
  0x18   :  { %6650 = vmatpush3.bf16.msra.mxu0 %v6649_v5  ;;  %v6658_v15 = vpack.c.bf16 %v48_v14, %v47_v10  ;;  %v74_v16 = vld [vmem:[%s8227_s0] sm:$0xff]  ;;  %v7307_v17 = vpack.c.bf16 %v42_v12, %v41_v11  ;;  %v50_v19 = vld [vmem:[#allocation2 + $0xa8] sm:$0xff]  ;;  %v43_v20 = vld [vmem:[#allocation2 + $0x70] sm:$0xff]  ;;  %s7261_s0 = smov 64   ;;  %v77_v40 = vsub.s32 0, %v76_v39  ;;  %v155_v53 = vsub.s32 2, %v76_v39 }
  0x19   :  { %6651 = vmatprep.subr.bf16.mxu0 %v7258_v0  ;;  %6656 = vmatpush3.bf16.msra.mxu1 %v6655_v13  ;;  %v49_v18 = vld [vmem:[#allocation2 + $0xa0] sm:$0xff]  ;;  %v44_v21 = vld [vmem:[#allocation2 + $0x78] sm:$0xff]  ;;  %v51_v24 = vld [vmem:[#allocation2 + $0xb0] sm:$0xff]  ;;  %vm1925_vm8 = vcmask 1044480   ;;  %vm1927_vm9 = vcmask 1045504   ;;  %vm1929_vm10 = vcmask 1046528  }
  0x1a   :  { %6657 = vmatprep.subr.bf16.mxu1 %v7258_v0  ;;  %v7312_v22 = vpack.c.bf16 %v50_v19, %v49_v18  ;;  %v7315_v23 = vpack.c.bf16 %v44_v21, %v43_v20  ;;  %v52_v25 = vld [vmem:[#allocation2 + $0xb8] sm:$0xff]  ;;  %v73_v30 = vld [vmem:[#allocation2 + $0x160] sm:$0xff]  ;;  %vm2326_vm11 = vcmask 57344   ;;  %vm2339_vm12 = vcmask 64512   ;;  %s5579_s29 = sshll.u32 %s7263_s28, 4  ;;  %s5580_s29 = int_to_ptr.vmem [resolvable:$true] %s5579_s29 }
  0x1b   :  { %v7323_v26 = vpack.c.bf16 %v52_v25, %v51_v24  ;;  %v7346_v32 = vrot.slane %v73_v30, 1  ;;  %v78_v41 = vrot.slane %v73_v30, %v77_v40  ;;  %v7354_v47 = vrot.slane %v73_v30, 3  ;;  %s7205_s30 = scalar_lea.vmem %s5580_s29, 16  ;;  %s7209_s4 = scalar_lea.vmem %s5580_s29, 32 }
  0x1c   :  { %6653 = vmatpush3.bf16.msra.mxu0 %v6652_v7  ;;  %v156_v54 = vrot.slane %v73_v30, %v155_v53  ;;  %vm2635_vm13 = vcmask 516096   ;;  %p7206_p8 = scmp.ne.s32.totalorder %s5580_s29, %s7205_s30  ;;  %p7210_p9 = scmp.lt.s32.totalorder %s5580_s29, %s5580_s29 }
  0x1d   :  { %6660 = vmatprep.subr.bf16.mxu0 %v7258_v0  ;;  %6659 = vmatpush3.bf16.msra.mxu1 %v6658_v15  ;;  %p7211_p10 = scmp.lt.s32.totalorder %s7209_s4, %s7205_s30 }
  0x1e   :  { %6666 = vmatprep.subr.bf16.mxu1 %v7258_v0 }
  0x1f   :  { %6001 = vmatmul.mubr.msk.f32.vlgmr.msra.gmra.mrb[0].mxu0 %vm79_vm1, %v74_v16  ;;  %p7212_p11 = por %p7211_p10, %p7210_p9 }
  0x20   :  { %6662 = vmatpush3.bf16.msra.mxu0 %v7307_v17  ;;  %6022 = vmatprep.mubr.msk.f32.mxu0 %vm7259_vm0, %v7260_v1 }
  0x21   :  { %6663 = vmatprep.subr.bf16.mxu0 %v7258_v0  ;;  %6012 = vmatmul.mubr.msk.f32.vlgmr.msra.gmra.mrb[0].mxu1 %vm79_vm1, %v74_v16  ;;  %p7213_p12 = pnand %p7212_p11, %p7206_p8 }
  0x22   :  { %6668 = vmatpush3.bf16.msra.mxu1 %v7312_v22  ;;  %6033 = vmatprep.mubr.msk.f32.mxu1 %vm7259_vm0, %v7260_v1 }
  0x23   :  { %6669 = vmatprep.subr.bf16.mxu1 %v7258_v0 }
  0x24   :  { %6665 = vmatpush3.bf16.msra.mxu0 %v7315_v23 }
  0x25   :  { %6672 = vmatprep.subr.bf16.mxu0 %v7258_v0 }
  0x26   :  { %6671 = vmatpush3.bf16.msra.mxu1 %v7323_v26 }
  0x27   :  { %6023 = vmatmul.mubr.f32.vlgmr.msra.gmra.mrb[2].mxu0 %v7260_v1  ;;  %6678 = vmatprep.subr.bf16.mxu1 %v7258_v0 }
  0x28   :  { %6674 = vmatpush3.bf16.msra.mxu0 %v7307_v17  ;;  %6044 = vmatprep.mubr.msk.f32.mxu0 %vm7259_vm0, %v7260_v1 }
  0x29   :  { %6675 = vmatprep.subr.bf16.mxu0 %v7258_v0  ;;  %6034 = vmatmul.mubr.f32.vlgmr.msra.gmra.mrb[2].mxu1 %v7260_v1 }
  0x2a   :  { %6680 = vmatpush3.bf16.msra.mxu1 %v7312_v22  ;;  %6055 = vmatprep.mubr.msk.f32.mxu1 %vm7259_vm0, %v7260_v1 }
  0x2b   :  { %6681 = vmatprep.subr.bf16.mxu1 %v7258_v0 }
  0x2c   :  { %6677 = vmatpush3.bf16.msra.mxu0 %v7315_v23 }
  0x2d   :  { %6684 = vmatprep.subr.bf16.mxu0 %v7258_v0 }
  0x2e   :  { %6683 = vmatpush3.bf16.msra.mxu1 %v7323_v26 }
  0x2f   :  { %6690 = vmatprep.subr.bf16.mxu1 %v7258_v0 }
  0xf2   :  { %v149_v27 = vpop.f32.mrb[0].mxu0 }
  0xf3   :  { %v6002_v28 = vpop.f32.mrb[1].mxu0  ;;  %v7351_v42 = vadd.f32 %v149_v27, %v78_v41 }
  0xf4   :  { %v223_v29 = vpop.f32.mrb[0].mxu1 }
  0xf5   :  { %v6013_v31 = vpop.f32.mrb[1].mxu1  ;;  %v7359_v55 = vadd.f32 %v223_v29, %v156_v54 }
  0xfa   :  { %v299_v33 = vpop.f32.mrb[2].mxu0 }
  0xfb   :  { %v300_v34 = vadd.f32 %v299_v33, %v7346_v32  ;;  %v6024_v35 = vpop.f32.mrb[3].mxu0 }
  0xfc   :  { %v397_v36 = vpop.f32.mrb[2].mxu1 }
  0xfd   :  { %311 = vrot.lane.b32.xlu0 %v300_v34, %s7261_s0  ;;  %v6035_v37 = vpop.f32.mrb[3].mxu1  ;;  %v303_v43 = vadd.f32 %v300_v34, %v7351_v42  ;;  %v398_v48 = vadd.f32 %v397_v36, %v7354_v47 }
  0xff   :  { %v5594_v44 = vmul.f32 -1.442695, %v303_v43  ;;  %v402_v52 = vrot.slane %v398_v48, 1 }
 0x101   :  { %6990 = vpow2.f32 %v5594_v44  ;;  %v404_v56 = vadd.f32 %v402_v52, %v7359_v55 }
 0x103   :  { %v5595_v57 = vmul.f32 -1.442695, %v404_v56 }
 0x10b   :  { %v6991_v45 = vpop.eup %6990 }
 0x10c   :  { %v307_v46 = vadd.f32 1.0, %v6991_v45 }
 0x10e   :  { %6992 = vrcp.f32 %v307_v46 }
 0x10f   :  { %6994 = vpow2.f32 %v5595_v57 }
 0x118   :  { %v6993_v49 = vpop.eup %6992 }
 0x119   :  { %v6995_v58 = vpop.eup %6994  ;;  %v321_v6 = vsub.f32 1.0, %v6993_v49  ;;  %v327_v8 = vmul.f32 0.0, %v6993_v49 }
 0x11a   :  { %v408_v59 = vadd.f32 1.0, %v6995_v58 }
 0x11c   :  { %6996 = vrcp.f32 %v408_v59 }
 0x126   :  { %v6997_v62 = vpop.eup %6996 }
 0x127   :  { %v421_v12 = vsub.f32 1.0, %v6997_v62  ;;  %v427_v14 = vmul.f32 0.0, %v6997_v62 }
 0x16f   :  { %v312_v50 = vpop.permute.xlu0 %311 }
 0x170   :  { %v314_v51 = vmul.f32 %v6993_v49, %v312_v50 }
 0x172   :  { %316 = vrot.lane.b32.xlu0 %v314_v51, %s7261_s0 }
 0x176   :  { %411 = vrot.lane.b32.xlu0 %v402_v52, %s7261_s0 }
 0x1e4   :  { %v317_v60 = vpop.permute.xlu0 %316 }
 0x1e5   :  { %v319_v61 = vadd.f32 %v317_v60, %v7351_v42 }
 0x1e7   :  { %6998 = vtanh.f32 %v319_v61 }
 0x1e8   :  { %v412_v63 = vpop.permute.xlu0 %411 }
 0x1e9   :  { %v414_v2 = vmul.f32 %v6997_v62, %v412_v63 }
 0x1eb   :  { %416 = vrot.lane.b32.xlu0 %v414_v2, %s7261_s0 }
 0x1f1   :  { %v6999_v3 = vpop.eup %6998 }
 0x1f2   :  { %323 = vrot.lane.b32.xlu1 %v6999_v3, %s7262_s27 }
 0x25d   :  { %v417_v4 = vpop.permute.xlu0 %416 }
 0x25e   :  { %v419_v5 = vadd.f32 %v417_v4, %v7359_v55 }
 0x260   :  { %7000 = vtanh.f32 %v419_v5 }
 0x264   :  { %v324_v7 = vpop.permute.xlu1 %323 }
 0x265   :  { %v326_v9 = vmul.f32 %v324_v7, %v321_v6 }
 0x267   :  { %v7366_v10 = vadd.f32 %v327_v8, %v326_v9 }
 0x269   :  { %430 = vrot.lane.b32.xlu1 %v7366_v10, %s7262_s27  ;;  %v530_v57 = vrot.slane %v7366_v10, 7 }
 0x26a   :  { %v7001_v11 = vpop.eup %7000 }
 0x26b   :  { %423 = vrot.lane.b32.xlu0 %v7001_v11, %s7262_s27 }
 0x2db   :  { %v431_v13 = vpop.permute.xlu1 %430 }
 0x2dc   :  { %6045 = vmatmul.mubr.msk.f32.vlgmr.msra.gmra.mrb[4].mxu0 %vm79_vm1, %v431_v13 }
 0x2dd   :  { %v424_v15 = vpop.permute.xlu0 %423  ;;  %6686 = vmatpush3.bf16.msra.mxu0 %v7307_v17  ;;  %6066 = vmatprep.mubr.msk.f32.mxu0 %vm7259_vm0, %v7260_v1 }
 0x2de   :  { %v426_v16 = vmul.f32 %v424_v15, %v421_v12  ;;  %6687 = vmatprep.subr.bf16.mxu0 %v7258_v0 }
 0x2e0   :  { %v7376_v18 = vadd.f32 %v427_v14, %v426_v16 }
 0x2e1   :  { %6689 = vmatpush3.bf16.msra.mxu0 %v7315_v23 }
 0x2e2   :  { %v535_v19 = vrot.slane %v7376_v18, 7  ;;  %6696 = vmatprep.subr.bf16.mxu0 %v7258_v0  ;;  %v636_v4 = vrot.slane %v7376_v18, 1 }
 0x2e4   :  { %536 = vrot.lane.b32.xlu0 %v535_v19, %s7262_s27 }
 0x356   :  { %v537_v20 = vpop.permute.xlu0 %536 }
 0x357   :  { %6056 = vmatmul.mubr.msk.f32.vlgmr.msra.gmra.mrb[4].mxu1 %vm79_vm1, %v537_v20 }
 0x358   :  { %6692 = vmatpush3.bf16.msra.mxu1 %v7312_v22  ;;  %6077 = vmatprep.mubr.msk.f32.mxu1 %vm7259_vm0, %v7260_v1 }
 0x359   :  { %6693 = vmatprep.subr.bf16.mxu1 %v7258_v0 }
 0x35c   :  { %6695 = vmatpush3.bf16.msra.mxu1 %v7323_v26 }
 0x35d   :  { %6702 = vmatprep.subr.bf16.mxu1 %v7258_v0 }
 0x3af   :  { %v500_v21 = vpop.f32.mrb[4].mxu0 }
 0x3b0   :  { %v501_v24 = vadd.f32 %v500_v21, %v7346_v32  ;;  %v6046_v25 = vpop.f32.mrb[5].mxu0 }
 0x3b2   :  { %v505_v27 = vrot.slane %v501_v24, 7 }
 0x3b4   :  { %514 = vrot.lane.b32.xlu1 %v505_v27, %s7261_s0  ;;  %v507_v28 = vadd.f32 %v505_v27, %v7351_v42 }
 0x3b6   :  { %v5597_v29 = vmul.f32 -1.442695, %v507_v28 }
 0x3b8   :  { %7002 = vpow2.f32 %v5597_v29 }
 0x3c2   :  { %v7003_v30 = vpop.eup %7002 }
 0x3c3   :  { %v511_v31 = vadd.f32 1.0, %v7003_v30 }
 0x3c5   :  { %7004 = vrcp.f32 %v511_v31 }
 0x3cf   :  { %v7005_v33 = vpop.eup %7004 }
 0x3d0   :  { %v524_v56 = vsub.f32 1.0, %v7005_v33  ;;  %v532_v59 = vmul.f32 %v7005_v33, %v530_v57 }
 0x426   :  { %v515_v34 = vpop.permute.xlu1 %514 }
 0x427   :  { %v517_v35 = vmul.f32 %v7005_v33, %v515_v34 }
 0x429   :  { %519 = vrot.lane.b32.xlu1 %v517_v35, %s7261_s0 }
 0x42a   :  { %v606_v36 = vpop.f32.mrb[4].mxu1 }
 0x42b   :  { %v607_v37 = vadd.f32 %v606_v36, %v7354_v47  ;;  %v6057_v39 = vpop.f32.mrb[5].mxu1 }
 0x42d   :  { %v611_v40 = vrot.slane %v607_v37, 2 }
 0x42f   :  { %620 = vrot.lane.b32.xlu0 %v611_v40, %s7261_s0  ;;  %v613_v41 = vadd.f32 %v611_v40, %v7359_v55 }
 0x431   :  { %v5599_v43 = vmul.f32 -1.442695, %v613_v41 }
 0x433   :  { %7006 = vpow2.f32 %v5599_v43 }
 0x43d   :  { %v7007_v44 = vpop.eup %7006 }
 0x43e   :  { %v617_v45 = vadd.f32 1.0, %v7007_v44 }
 0x440   :  { %7008 = vrcp.f32 %v617_v45 }
 0x44a   :  { %v7009_v49 = vpop.eup %7008 }
 0x44b   :  { %v630_v3 = vsub.f32 1.0, %v7009_v49  ;;  %v638_v6 = vmul.f32 %v7009_v49, %v636_v4 }
 0x49b   :  { %v520_v46 = vpop.permute.xlu1 %519 }
 0x49c   :  { %v522_v48 = vadd.f32 %v520_v46, %v7351_v42 }
 0x49e   :  { %7010 = vtanh.f32 %v522_v48 }
 0x4a1   :  { %v621_v50 = vpop.permute.xlu0 %620 }
 0x4a2   :  { %v623_v51 = vmul.f32 %v7009_v49, %v621_v50 }
 0x4a4   :  { %625 = vrot.lane.b32.xlu0 %v623_v51, %s7261_s0 }
 0x4a8   :  { %v7011_v52 = vpop.eup %7010 }
 0x4a9   :  { %526 = vrot.lane.b32.xlu1 %v7011_v52, %s7262_s27 }
 0x516   :  { %v626_v53 = vpop.permute.xlu0 %625 }
 0x517   :  { %v628_v54 = vadd.f32 %v626_v53, %v7359_v55 }
 0x519   :  { %7012 = vtanh.f32 %v628_v54 }
 0x51b   :  { %v527_v58 = vpop.permute.xlu1 %526 }
 0x51c   :  { %v529_v60 = vmul.f32 %v527_v58, %v524_v56 }
 0x51e   :  { %v7401_v61 = vadd.f32 %v532_v59, %v529_v60 }
 0x520   :  { %v641_v62 = vrot.slane %v7401_v61, 1  ;;  %v742_v49 = vrot.slane %v7401_v61, 7 }
 0x522   :  { %642 = vrot.lane.b32.xlu1 %v641_v62, %s7262_s27 }
 0x523   :  { %v7013_v63 = vpop.eup %7012 }
 0x524   :  { %632 = vrot.lane.b32.xlu0 %v7013_v63, %s7262_s27 }
 0x594   :  { %v643_v2 = vpop.permute.xlu1 %642 }
 0x595   :  { %6067 = vmatmul.mubr.msk.f32.vlgmr.msra.gmra.mrb[6].mxu0 %vm79_vm1, %v643_v2 }
 0x596   :  { %v633_v5 = vpop.permute.xlu0 %632  ;;  %6698 = vmatpush3.bf16.msra.mxu0 %v7307_v17  ;;  %6088 = vmatprep.mubr.msk.f32.mxu0 %vm7259_vm0, %v7260_v1 }
 0x597   :  { %v635_v7 = vmul.f32 %v633_v5, %v630_v3  ;;  %6699 = vmatprep.subr.bf16.mxu0 %v7258_v0 }
 0x599   :  { %v7412_v8 = vadd.f32 %v638_v6, %v635_v7 }
 0x59a   :  { %6701 = vmatpush3.bf16.msra.mxu0 %v7315_v23 }
 0x59b   :  { %v747_v9 = vrot.slane %v7412_v8, 6  ;;  %6708 = vmatprep.subr.bf16.mxu0 %v7258_v0  ;;  %v848_v59 = vrot.slane %v7412_v8, 1 }
 0x59d   :  { %748 = vrot.lane.b32.xlu0 %v747_v9, %s7262_s27 }
 0x60f   :  { %v749_v11 = vpop.permute.xlu0 %748 }
 0x610   :  { %6078 = vmatmul.mubr.msk.f32.vlgmr.msra.gmra.mrb[6].mxu1 %vm79_vm1, %v749_v11 }
 0x611   :  { %6704 = vmatpush3.bf16.msra.mxu1 %v7312_v22  ;;  %6099 = vmatprep.mubr.msk.f32.mxu1 %vm7259_vm0, %v7260_v1 }
 0x612   :  { %6705 = vmatprep.subr.bf16.mxu1 %v7258_v0 }
 0x615   :  { %6707 = vmatpush3.bf16.msra.mxu1 %v7323_v26 }
 0x616   :  { %6714 = vmatprep.subr.bf16.mxu1 %v7258_v0 }
 0x668   :  { %v712_v12 = vpop.f32.mrb[6].mxu0 }
 0x669   :  { %v713_v13 = vadd.f32 %v712_v12, %v7346_v32  ;;  %v6068_v14 = vpop.f32.mrb[7].mxu0 }
 0x66b   :  { %v717_v15 = vrot.slane %v713_v13, 6 }
 0x66d   :  { %726 = vrot.lane.b32.xlu1 %v717_v15, %s7261_s0  ;;  %v719_v16 = vadd.f32 %v717_v15, %v7351_v42 }
 0x66f   :  { %v5601_v19 = vmul.f32 -1.442695, %v719_v16 }
 0x671   :  { %7014 = vpow2.f32 %v5601_v19 }
 0x67b   :  { %v7015_v20 = vpop.eup %7014 }
 0x67c   :  { %v723_v21 = vadd.f32 1.0, %v7015_v20 }
 0x67e   :  { %7016 = vrcp.f32 %v723_v21 }
 0x688   :  { %v7017_v24 = vpop.eup %7016 }
 0x689   :  { %v736_v48 = vsub.f32 1.0, %v7017_v24  ;;  %v744_v51 = vmul.f32 %v7017_v24, %v742_v49 }
 0x6df   :  { %v727_v25 = vpop.permute.xlu1 %726 }
 0x6e0   :  { %v729_v27 = vmul.f32 %v7017_v24, %v727_v25 }
 0x6e2   :  { %731 = vrot.lane.b32.xlu1 %v729_v27, %s7261_s0 }
 0x6e3   :  { %v818_v28 = vpop.f32.mrb[6].mxu1 }
 0x6e4   :  { %v819_v29 = vadd.f32 %v818_v28, %v7354_v47  ;;  %v6079_v30 = vpop.f32.mrb[7].mxu1 }
 0x6e6   :  { %v823_v31 = vrot.slane %v819_v29, 3 }
 0x6e8   :  { %832 = vrot.lane.b32.xlu0 %v823_v31, %s7261_s0  ;;  %v825_v33 = vadd.f32 %v823_v31, %v7359_v55 }
 0x6ea   :  { %v5603_v34 = vmul.f32 -1.442695, %v825_v33 }
 0x6ec   :  { %7018 = vpow2.f32 %v5603_v34 }
 0x6f6   :  { %v7019_v35 = vpop.eup %7018 }
 0x6f7   :  { %v829_v36 = vadd.f32 1.0, %v7019_v35 }
 0x6f9   :  { %7020 = vrcp.f32 %v829_v36 }
 0x703   :  { %v7021_v40 = vpop.eup %7020 }
 0x704   :  { %v842_v58 = vsub.f32 1.0, %v7021_v40  ;;  %v850_v62 = vmul.f32 %v7021_v40, %v848_v59 }
 0x754   :  { %v732_v37 = vpop.permute.xlu1 %731 }
 0x755   :  { %v734_v39 = vadd.f32 %v732_v37, %v7351_v42 }
 0x757   :  { %7022 = vtanh.f32 %v734_v39 }
 0x75a   :  { %v833_v41 = vpop.permute.xlu0 %832 }
 0x75b   :  { %v835_v43 = vmul.f32 %v7021_v40, %v833_v41 }
 0x75d   :  { %837 = vrot.lane.b32.xlu0 %v835_v43, %s7261_s0 }
 0x761   :  { %v7023_v44 = vpop.eup %7022 }
 0x762   :  { %738 = vrot.lane.b32.xlu1 %v7023_v44, %s7262_s27 }
 0x7cf   :  { %v838_v45 = vpop.permute.xlu0 %837 }
 0x7d0   :  { %v840_v46 = vadd.f32 %v838_v45, %v7359_v55 }
 0x7d2   :  { %7024 = vtanh.f32 %v840_v46 }
 0x7d4   :  { %v739_v50 = vpop.permute.xlu1 %738 }
 0x7d5   :  { %v741_v52 = vmul.f32 %v739_v50, %v736_v48 }
 0x7d7   :  { %v7437_v53 = vadd.f32 %v744_v51, %v741_v52 }
 0x7d9   :  { %v853_v54 = vrot.slane %v7437_v53, 2  ;;  %v954_v43 = vrot.slane %v7437_v53, 7 }
 0x7db   :  { %854 = vrot.lane.b32.xlu1 %v853_v54, %s7262_s27 }
 0x7dc   :  { %v7025_v56 = vpop.eup %7024 }
 0x7dd   :  { %844 = vrot.lane.b32.xlu0 %v7025_v56, %s7262_s27 }
 0x84d   :  { %v855_v57 = vpop.permute.xlu1 %854 }
 0x84e   :  { %6089 = vmatmul.mubr.msk.f32.vlgmr.msra.gmra.mrb[8].mxu0 %vm79_vm1, %v855_v57 }
 0x84f   :  { %v845_v60 = vpop.permute.xlu0 %844  ;;  %6710 = vmatpush3.bf16.msra.mxu0 %v7307_v17  ;;  %6110 = vmatprep.mubr.msk.f32.mxu0 %vm7259_vm0, %v7260_v1 }
 0x850   :  { %v847_v63 = vmul.f32 %v845_v60, %v842_v58  ;;  %6711 = vmatprep.subr.bf16.mxu0 %v7258_v0 }
 0x852   :  { %v7448_v2 = vadd.f32 %v850_v62, %v847_v63 }
 0x853   :  { %6713 = vmatpush3.bf16.msra.mxu0 %v7315_v23 }
 0x854   :  { %v959_v3 = vrot.slane %v7448_v2, 5  ;;  %6720 = vmatprep.subr.bf16.mxu0 %v7258_v0  ;;  %v1060_v54 = vrot.slane %v7448_v2, 1 }
 0x856   :  { %960 = vrot.lane.b32.xlu0 %v959_v3, %s7262_s27 }
 0x8c8   :  { %v961_v4 = vpop.permute.xlu0 %960 }
 0x8c9   :  { %6100 = vmatmul.mubr.msk.f32.vlgmr.msra.gmra.mrb[8].mxu1 %vm79_vm1, %v961_v4 }
 0x8ca   :  { %6716 = vmatpush3.bf16.msra.mxu1 %v7312_v22  ;;  %6121 = vmatprep.mubr.msk.f32.mxu1 %vm7259_vm0, %v7260_v1 }
 0x8cb   :  { %6717 = vmatprep.subr.bf16.mxu1 %v7258_v0 }
 0x8ce   :  { %6719 = vmatpush3.bf16.msra.mxu1 %v7323_v26 }
 0x8cf   :  { %6726 = vmatprep.subr.bf16.mxu1 %v7258_v0 }
 0x921   :  { %v924_v5 = vpop.f32.mrb[8].mxu0 }
 0x922   :  { %v925_v6 = vadd.f32 %v924_v5, %v7346_v32  ;;  %v6090_v7 = vpop.f32.mrb[9].mxu0 }
 0x924   :  { %v929_v9 = vrot.slane %v925_v6, 5 }
 0x926   :  { %938 = vrot.lane.b32.xlu1 %v929_v9, %s7261_s0  ;;  %v931_v11 = vadd.f32 %v929_v9, %v7351_v42 }
 0x928   :  { %v5605_v12 = vmul.f32 -1.442695, %v931_v11 }
 0x92a   :  { %7026 = vpow2.f32 %v5605_v12 }
 0x934   :  { %v7027_v13 = vpop.eup %7026 }
 0x935   :  { %v935_v14 = vadd.f32 1.0, %v7027_v13 }
 0x937   :  { %7028 = vrcp.f32 %v935_v14 }
 0x941   :  { %v7029_v15 = vpop.eup %7028 }
 0x942   :  { %v948_v41 = vsub.f32 1.0, %v7029_v15  ;;  %v956_v45 = vmul.f32 %v7029_v15, %v954_v43 }
 0x998   :  { %v939_v16 = vpop.permute.xlu1 %938 }
 0x999   :  { %v941_v19 = vmul.f32 %v7029_v15, %v939_v16 }
 0x99b   :  { %943 = vrot.lane.b32.xlu1 %v941_v19, %s7261_s0 }
 0x99c   :  { %v1030_v20 = vpop.f32.mrb[8].mxu1 }
 0x99d   :  { %v1031_v21 = vadd.f32 %v1030_v20, %v7354_v47  ;;  %v6101_v24 = vpop.f32.mrb[9].mxu1 }
 0x99f   :  { %v1035_v25 = vrot.slane %v1031_v21, 4 }
 0x9a1   :  { %1044 = vrot.lane.b32.xlu0 %v1035_v25, %s7261_s0  ;;  %v1037_v27 = vadd.f32 %v1035_v25, %v7359_v55 }
 0x9a3   :  { %v5607_v28 = vmul.f32 -1.442695, %v1037_v27 }
 0x9a5   :  { %7030 = vpow2.f32 %v5607_v28 }
 0x9af   :  { %v7031_v29 = vpop.eup %7030 }
 0x9b0   :  { %v1041_v30 = vadd.f32 1.0, %v7031_v29 }
 0x9b2   :  { %7032 = vrcp.f32 %v1041_v30 }
 0x9bc   :  { %v7033_v34 = vpop.eup %7032 }
 0x9bd   :  { %v1054_v52 = vsub.f32 1.0, %v7033_v34  ;;  %v1062_v57 = vmul.f32 %v7033_v34, %v1060_v54 }
 0xa0d   :  { %v944_v31 = vpop.permute.xlu1 %943 }
 0xa0e   :  { %v946_v33 = vadd.f32 %v944_v31, %v7351_v42 }
 0xa10   :  { %7034 = vtanh.f32 %v946_v33 }
 0xa13   :  { %v1045_v35 = vpop.permute.xlu0 %1044 }
 0xa14   :  { %v1047_v36 = vmul.f32 %v7033_v34, %v1045_v35 }
 0xa16   :  { %1049 = vrot.lane.b32.xlu0 %v1047_v36, %s7261_s0 }
 0xa1a   :  { %v7035_v37 = vpop.eup %7034 }
 0xa1b   :  { %950 = vrot.lane.b32.xlu1 %v7035_v37, %s7262_s27 }
 0xa88   :  { %v1050_v39 = vpop.permute.xlu0 %1049 }
 0xa89   :  { %v1052_v40 = vadd.f32 %v1050_v39, %v7359_v55 }
 0xa8b   :  { %7036 = vtanh.f32 %v1052_v40 }
 0xa8d   :  { %v951_v44 = vpop.permute.xlu1 %950 }
 0xa8e   :  { %v953_v46 = vmul.f32 %v951_v44, %v948_v41 }
 0xa90   :  { %v7473_v48 = vadd.f32 %v956_v45, %v953_v46 }
 0xa92   :  { %v1065_v49 = vrot.slane %v7473_v48, 3  ;;  %v1166_v39 = vrot.slane %v7473_v48, 7 }
 0xa94   :  { %1066 = vrot.lane.b32.xlu1 %v1065_v49, %s7262_s27 }
 0xa95   :  { %v7037_v50 = vpop.eup %7036 }
 0xa96   :  { %1056 = vrot.lane.b32.xlu0 %v7037_v50, %s7262_s27 }
 0xb06   :  { %v1067_v51 = vpop.permute.xlu1 %1066 }
 0xb07   :  { %6111 = vmatmul.mubr.msk.f32.vlgmr.msra.gmra.mrb[10].mxu0 %vm79_vm1, %v1067_v51 }
 0xb08   :  { %v1057_v56 = vpop.permute.xlu0 %1056  ;;  %6722 = vmatpush3.bf16.msra.mxu0 %v7307_v17  ;;  %6132 = vmatprep.mubr.msk.f32.mxu0 %vm7259_vm0, %v7260_v1 }
 0xb09   :  { %v1059_v58 = vmul.f32 %v1057_v56, %v1054_v52  ;;  %6723 = vmatprep.subr.bf16.mxu0 %v7258_v0 }
 0xb0b   :  { %v7484_v59 = vadd.f32 %v1062_v57, %v1059_v58 }
 0xb0c   :  { %6725 = vmatpush3.bf16.msra.mxu0 %v7315_v23 }
 0xb0d   :  { %v1171_v60 = vrot.slane %v7484_v59, 4  ;;  %6732 = vmatprep.subr.bf16.mxu0 %v7258_v0  ;;  %v1272_v51 = vrot.slane %v7484_v59, 1 }
 0xb0f   :  { %1172 = vrot.lane.b32.xlu0 %v1171_v60, %s7262_s27 }
 0xb81   :  { %v1173_v62 = vpop.permute.xlu0 %1172 }
 0xb82   :  { %6122 = vmatmul.mubr.msk.f32.vlgmr.msra.gmra.mrb[10].mxu1 %vm79_vm1, %v1173_v62 }
 0xb83   :  { %6728 = vmatpush3.bf16.msra.mxu1 %v7312_v22  ;;  %6143 = vmatprep.mubr.msk.f32.mxu1 %vm7259_vm0, %v7260_v1 }
 0xb84   :  { %6729 = vmatprep.subr.bf16.mxu1 %v7258_v0 }
 0xb87   :  { %6731 = vmatpush3.bf16.msra.mxu1 %v7323_v26 }
 0xb88   :  { %6738 = vmatprep.subr.bf16.mxu1 %v7258_v0 }
 0xbda   :  { %v1136_v63 = vpop.f32.mrb[10].mxu0 }
 0xbdb   :  { %v1137_v3 = vadd.f32 %v1136_v63, %v7346_v32  ;;  %v6112_v4 = vpop.f32.mrb[11].mxu0 }
 0xbdd   :  { %v1141_v5 = vrot.slane %v1137_v3, 4 }
 0xbdf   :  { %1150 = vrot.lane.b32.xlu1 %v1141_v5, %s7261_s0  ;;  %v1143_v6 = vadd.f32 %v1141_v5, %v7351_v42 }
 0xbe1   :  { %v5609_v7 = vmul.f32 -1.442695, %v1143_v6 }
 0xbe3   :  { %7038 = vpow2.f32 %v5609_v7 }
 0xbed   :  { %v7039_v9 = vpop.eup %7038 }
 0xbee   :  { %v1147_v11 = vadd.f32 1.0, %v7039_v9 }
 0xbf0   :  { %7040 = vrcp.f32 %v1147_v11 }
 0xbfa   :  { %v7041_v12 = vpop.eup %7040 }
 0xbfb   :  { %v1160_v37 = vsub.f32 1.0, %v7041_v12  ;;  %v1168_v41 = vmul.f32 %v7041_v12, %v1166_v39 }
 0xc51   :  { %v1151_v13 = vpop.permute.xlu1 %1150 }
 0xc52   :  { %v1153_v14 = vmul.f32 %v7041_v12, %v1151_v13 }
 0xc54   :  { %1155 = vrot.lane.b32.xlu1 %v1153_v14, %s7261_s0 }
 0xc55   :  { %v1242_v15 = vpop.f32.mrb[10].mxu1 }
 0xc56   :  { %v1243_v16 = vadd.f32 %v1242_v15, %v7354_v47  ;;  %v6123_v19 = vpop.f32.mrb[11].mxu1 }
 0xc58   :  { %v1247_v20 = vrot.slane %v1243_v16, 5 }
 0xc5a   :  { %1256 = vrot.lane.b32.xlu0 %v1247_v20, %s7261_s0  ;;  %v1249_v21 = vadd.f32 %v1247_v20, %v7359_v55 }
 0xc5c   :  { %v5611_v24 = vmul.f32 -1.442695, %v1249_v21 }
 0xc5e   :  { %7042 = vpow2.f32 %v5611_v24 }
 0xc68   :  { %v7043_v25 = vpop.eup %7042 }
 0xc69   :  { %v1253_v27 = vadd.f32 1.0, %v7043_v25 }
 0xc6b   :  { %7044 = vrcp.f32 %v1253_v27 }
 0xc75   :  { %v7045_v30 = vpop.eup %7044 }
 0xc76   :  { %v1266_v50 = vsub.f32 1.0, %v7045_v30  ;;  %v1274_v54 = vmul.f32 %v7045_v30, %v1272_v51 }
 0xcc6   :  { %v1156_v28 = vpop.permute.xlu1 %1155 }
 0xcc7   :  { %v1158_v29 = vadd.f32 %v1156_v28, %v7351_v42 }
 0xcc9   :  { %7046 = vtanh.f32 %v1158_v29 }
 0xccc   :  { %v1257_v31 = vpop.permute.xlu0 %1256 }
 0xccd   :  { %v1259_v33 = vmul.f32 %v7045_v30, %v1257_v31 }
 0xccf   :  { %1261 = vrot.lane.b32.xlu0 %v1259_v33, %s7261_s0 }
 0xcd3   :  { %v7047_v34 = vpop.eup %7046 }
 0xcd4   :  { %1162 = vrot.lane.b32.xlu1 %v7047_v34, %s7262_s27 }
 0xd41   :  { %v1262_v35 = vpop.permute.xlu0 %1261 }
 0xd42   :  { %v1264_v36 = vadd.f32 %v1262_v35, %v7359_v55 }
 0xd44   :  { %7048 = vtanh.f32 %v1264_v36 }
 0xd46   :  { %v1163_v40 = vpop.permute.xlu1 %1162 }
 0xd47   :  { %v1165_v43 = vmul.f32 %v1163_v40, %v1160_v37 }
 0xd49   :  { %v7509_v44 = vadd.f32 %v1168_v41, %v1165_v43 }
 0xd4b   :  { %v1277_v45 = vrot.slane %v7509_v44, 4  ;;  %v1378_v37 = vrot.slane %v7509_v44, 7 }
 0xd4d   :  { %1278 = vrot.lane.b32.xlu1 %v1277_v45, %s7262_s27 }
 0xd4e   :  { %v7049_v46 = vpop.eup %7048 }
 0xd4f   :  { %1268 = vrot.lane.b32.xlu0 %v7049_v46, %s7262_s27 }
 0xdbf   :  { %v1279_v49 = vpop.permute.xlu1 %1278 }
 0xdc0   :  { %6133 = vmatmul.mubr.msk.f32.vlgmr.msra.gmra.mrb[12].mxu0 %vm79_vm1, %v1279_v49 }
 0xdc1   :  { %v1269_v52 = vpop.permute.xlu0 %1268  ;;  %6734 = vmatpush3.bf16.msra.mxu0 %v7307_v17  ;;  %6154 = vmatprep.mubr.msk.f32.mxu0 %vm7259_vm0, %v7260_v1 }
 0xdc2   :  { %v1271_v56 = vmul.f32 %v1269_v52, %v1266_v50  ;;  %6735 = vmatprep.subr.bf16.mxu0 %v7258_v0 }
 0xdc4   :  { %v7520_v57 = vadd.f32 %v1274_v54, %v1271_v56 }
 0xdc5   :  { %6737 = vmatpush3.bf16.msra.mxu0 %v7315_v23 }
 0xdc6   :  { %v1383_v58 = vrot.slane %v7520_v57, 3  ;;  %6744 = vmatprep.subr.bf16.mxu0 %v7258_v0  ;;  %v1484_v51 = vrot.slane %v7520_v57, 1 }
 0xdc8   :  { %1384 = vrot.lane.b32.xlu0 %v1383_v58, %s7262_s27 }
 0xe3a   :  { %v1385_v60 = vpop.permute.xlu0 %1384 }
 0xe3b   :  { %6144 = vmatmul.mubr.msk.f32.vlgmr.msra.gmra.mrb[12].mxu1 %vm79_vm1, %v1385_v60 }
 0xe3c   :  { %6740 = vmatpush3.bf16.msra.mxu1 %v7312_v22  ;;  %6165 = vmatprep.mubr.msk.f32.mxu1 %vm7259_vm0, %v7260_v1 }
 0xe3d   :  { %6741 = vmatprep.subr.bf16.mxu1 %v7258_v0 }
 0xe40   :  { %6743 = vmatpush3.bf16.msra.mxu1 %v7323_v26 }
 0xe41   :  { %6750 = vmatprep.subr.bf16.mxu1 %v7258_v0 }
 0xe93   :  { %v1348_v62 = vpop.f32.mrb[12].mxu0 }
 0xe94   :  { %v1349_v63 = vadd.f32 %v1348_v62, %v7346_v32  ;;  %v6134_v3 = vpop.f32.mrb[13].mxu0 }
 0xe96   :  { %v1353_v4 = vrot.slane %v1349_v63, 3 }
 0xe98   :  { %1362 = vrot.lane.b32.xlu1 %v1353_v4, %s7261_s0  ;;  %v1355_v5 = vadd.f32 %v1353_v4, %v7351_v42 }
 0xe9a   :  { %v5613_v6 = vmul.f32 -1.442695, %v1355_v5 }
 0xe9c   :  { %7050 = vpow2.f32 %v5613_v6 }
 0xea6   :  { %v7051_v7 = vpop.eup %7050 }
 0xea7   :  { %v1359_v9 = vadd.f32 1.0, %v7051_v7 }
 0xea9   :  { %7052 = vrcp.f32 %v1359_v9 }
 0xeb3   :  { %v7053_v11 = vpop.eup %7052 }
 0xeb4   :  { %v1372_v36 = vsub.f32 1.0, %v7053_v11  ;;  %v1380_v40 = vmul.f32 %v7053_v11, %v1378_v37 }
 0xf0a   :  { %v1363_v12 = vpop.permute.xlu1 %1362 }
 0xf0b   :  { %v1365_v13 = vmul.f32 %v7053_v11, %v1363_v12 }
 0xf0d   :  { %1367 = vrot.lane.b32.xlu1 %v1365_v13, %s7261_s0 }
 0xf0e   :  { %v1454_v14 = vpop.f32.mrb[12].mxu1 }
 0xf0f   :  { %v1455_v15 = vadd.f32 %v1454_v14, %v7354_v47  ;;  %v6145_v16 = vpop.f32.mrb[13].mxu1 }
 0xf11   :  { %v1459_v19 = vrot.slane %v1455_v15, 6 }
 0xf13   :  { %1468 = vrot.lane.b32.xlu0 %v1459_v19, %s7261_s0  ;;  %v1461_v20 = vadd.f32 %v1459_v19, %v7359_v55 }
 0xf15   :  { %v5615_v21 = vmul.f32 -1.442695, %v1461_v20 }
 0xf17   :  { %7054 = vpow2.f32 %v5615_v21 }
 0xf21   :  { %v7055_v24 = vpop.eup %7054 }
 0xf22   :  { %v1465_v25 = vadd.f32 1.0, %v7055_v24 }
 0xf24   :  { %7056 = vrcp.f32 %v1465_v25 }
 0xf2e   :  { %v7057_v29 = vpop.eup %7056 }
 0xf2f   :  { %v1478_v50 = vsub.f32 1.0, %v7057_v29  ;;  %v1486_v54 = vmul.f32 %v7057_v29, %v1484_v51 }
 0xf7f   :  { %v1368_v27 = vpop.permute.xlu1 %1367 }
 0xf80   :  { %v1370_v28 = vadd.f32 %v1368_v27, %v7351_v42 }
 0xf82   :  { %7058 = vtanh.f32 %v1370_v28 }
 0xf85   :  { %v1469_v30 = vpop.permute.xlu0 %1468 }
 0xf86   :  { %v1471_v31 = vmul.f32 %v7057_v29, %v1469_v30 }
 0xf88   :  { %1473 = vrot.lane.b32.xlu0 %v1471_v31, %s7261_s0 }
 0xf8c   :  { %v7059_v33 = vpop.eup %7058 }
 0xf8d   :  { %1374 = vrot.lane.b32.xlu1 %v7059_v33, %s7262_s27 }
 0xffa   :  { %v1474_v34 = vpop.permute.xlu0 %1473 }
 0xffb   :  { %v1476_v35 = vadd.f32 %v1474_v34, %v7359_v55 }
 0xffd   :  { %7060 = vtanh.f32 %v1476_v35 }
 0xfff   :  { %v1375_v39 = vpop.permute.xlu1 %1374 }
0x1000   :  { %v1377_v41 = vmul.f32 %v1375_v39, %v1372_v36 }
0x1002   :  { %v7545_v43 = vadd.f32 %v1380_v40, %v1377_v41 }
0x1004   :  { %v1489_v45 = vrot.slane %v7545_v43, 5  ;;  %v1590_v34 = vrot.slane %v7545_v43, 7 }
0x1006   :  { %1490 = vrot.lane.b32.xlu1 %v1489_v45, %s7262_s27 }
0x1007   :  { %v7061_v46 = vpop.eup %7060 }
0x1008   :  { %1480 = vrot.lane.b32.xlu0 %v7061_v46, %s7262_s27 }
0x1078   :  { %v1491_v49 = vpop.permute.xlu1 %1490 }
0x1079   :  { %6155 = vmatmul.mubr.msk.f32.vlgmr.msra.gmra.mrb[14].mxu0 %vm79_vm1, %v1491_v49 }
0x107a   :  { %v1481_v52 = vpop.permute.xlu0 %1480  ;;  %6746 = vmatpush3.bf16.msra.mxu0 %v7307_v17  ;;  %6176 = vmatprep.mubr.msk.f32.mxu0 %vm7259_vm0, %v7260_v1 }
0x107b   :  { %v1483_v56 = vmul.f32 %v1481_v52, %v1478_v50  ;;  %6747 = vmatprep.subr.bf16.mxu0 %v7258_v0 }
0x107d   :  { %v7556_v58 = vadd.f32 %v1486_v54, %v1483_v56 }
0x107e   :  { %6749 = vmatpush3.bf16.msra.mxu0 %v7315_v23 }
0x107f   :  { %v1595_v60 = vrot.slane %v7556_v58, 2  ;;  %v1696_v49 = vrot.slane %v7556_v58, 1 }
0x1081   :  { %1596 = vrot.lane.b32.xlu0 %v1595_v60, %s7262_s27 }
0x10f3   :  { %v1597_v62 = vpop.permute.xlu0 %1596 }
0x10f4   :  { %6166 = vmatmul.mubr.msk.f32.vlgmr.msra.gmra.mrb[14].mxu1 %vm79_vm1, %v1597_v62 }
0x10f5   :  { %6752 = vmatpush3.bf16.msra.mxu1 %v7312_v22  ;;  %6187 = vmatprep.mubr.msk.f32.mxu1 %vm7259_vm0, %v7260_v1 }
0x10f6   :  { %6753 = vmatprep.subr.bf16.mxu1 %v7258_v0 }
0x10f9   :  { %6755 = vmatpush3.bf16.msra.mxu1 %v7323_v26 }
0x10fa   :  { %6764 = vmatprep.subr.bf16.mxu1 %v7258_v0 }
0x114c   :  { %v1560_v17 = vpop.f32.mrb[14].mxu0 }
0x114d   :  { %v1561_v23 = vadd.f32 %v1560_v17, %v7346_v32  ;;  %v6156_v63 = vpop.f32.mrb[15].mxu0 }
0x114f   :  { %v1565_v3 = vrot.slane %v1561_v23, 2 }
0x1151   :  { %1574 = vrot.lane.b32.xlu1 %v1565_v3, %s7261_s0  ;;  %v1567_v4 = vadd.f32 %v1565_v3, %v7351_v42 }
0x1153   :  { %v5617_v5 = vmul.f32 -1.442695, %v1567_v4 }
0x1155   :  { %7062 = vpow2.f32 %v5617_v5 }
0x115f   :  { %v7063_v22 = vpop.eup %7062 }
0x1160   :  { %v1571_v6 = vadd.f32 1.0, %v7063_v22 }
0x1162   :  { %7064 = vrcp.f32 %v1571_v6  ;;  %v53_v6 = vld [vmem:[#allocation2 + $0xc0] sm:$0xff] }
0x116c   :  { %v7065_v7 = vpop.eup %7064 }
0x116d   :  { %v1584_v33 = vsub.f32 1.0, %v7065_v7  ;;  %v1592_v36 = vmul.f32 %v7065_v7, %v1590_v34 }
0x11c3   :  { %v1575_v9 = vpop.permute.xlu1 %1574 }
0x11c4   :  { %v1577_v11 = vmul.f32 %v7065_v7, %v1575_v9  ;;  %v54_v7 = vld [vmem:[#allocation2 + $0xc8] sm:$0xff] }
0x11c5   :  { %v6756_v9 = vpack.c.bf16 %v54_v7, %v53_v6  ;;  %v7640_v7 = vand.u32 127, %v75_v38 }
0x11c6   :  { %1579 = vrot.lane.b32.xlu1 %v1577_v11, %s7261_s0 }
0x11c7   :  { %v1666_v26 = vpop.f32.mrb[14].mxu1  ;;  %6757 = vmatprep.subr.bf16.mxu0 %v6756_v9  ;;  %vm2062_vm2 = vcmp.eq.s32.totalorder %v7640_v7, 1 }
0x11c8   :  { %v1667_v12 = vadd.f32 %v1666_v26, %v7354_v47  ;;  %v6167_v13 = vpop.f32.mrb[15].mxu1 }
0x11c9   :  { %v56_v13 = vld [vmem:[#allocation2 + $0xd8] sm:$0xff] }
0x11ca   :  { %v1671_v14 = vrot.slane %v1667_v12, 7  ;;  %v55_v12 = vld [vmem:[#allocation2 + $0xd0] sm:$0xff] }
0x11cc   :  { %1680 = vrot.lane.b32.xlu0 %v1671_v14, %s7261_s0  ;;  %v1673_v15 = vadd.f32 %v1671_v14, %v7359_v55  ;;  %v6760_v14 = vpack.c.bf16 %v56_v13, %v55_v12  ;;  %v5632_v12 = vsel %vm2062_vm2, 1.0, %v7260_v1 }
0x11ce   :  { %v5619_v16 = vmul.f32 -1.442695, %v1673_v15  ;;  %v29_v15 = vld [vmem:[#allocation2] sm:$0xff] }
0x11d0   :  { %7066 = vpow2.f32 %v5619_v16 }
0x11da   :  { %v7067_v19 = vpop.eup %7066 }
0x11db   :  { %v1677_v20 = vadd.f32 1.0, %v7067_v19 }
0x11dd   :  { %7068 = vrcp.f32 %v1677_v20 }
0x11e7   :  { %v7069_v25 = vpop.eup %7068 }
0x11e8   :  { %v1690_v46 = vsub.f32 1.0, %v7069_v25  ;;  %v1698_v51 = vmul.f32 %v7069_v25, %v1696_v49  ;;  %v59_v49 = vld [vmem:[#allocation2 + $0xf0] sm:$0xff] }
0x1238   :  { %v1580_v21 = vpop.permute.xlu1 %1579 }
0x1239   :  { %v1582_v24 = vadd.f32 %v1580_v21, %v7351_v42  ;;  %v30_v21 = vld [vmem:[#allocation2 + $0x8] sm:$0xff] }
0x123b   :  { %7070 = vtanh.f32 %v1582_v24  ;;  %v31_v24 = vld [vmem:[#allocation2 + $0x10] sm:$0xff] }
0x123e   :  { %v1681_v27 = vpop.permute.xlu0 %1680 }
0x123f   :  { %v1683_v28 = vmul.f32 %v7069_v25, %v1681_v27  ;;  %v32_v25 = vld [vmem:[#allocation2 + $0x18] sm:$0xff]  ;;  %v33_v27 = vld [vmem:[#allocation2 + $0x20] sm:$0xff] }
0x1241   :  { %1685 = vrot.lane.b32.xlu0 %v1683_v28, %s7261_s0  ;;  %v35_v28 = vld [vmem:[#allocation2 + $0x30] sm:$0xff] }
0x1245   :  { %v7071_v29 = vpop.eup %7070 }
0x1246   :  { %1586 = vrot.lane.b32.xlu1 %v7071_v29, %s7262_s27  ;;  %v36_v29 = vld [vmem:[#allocation2 + $0x38] sm:$0xff] }
0x12b3   :  { %v1686_v30 = vpop.permute.xlu0 %1685 }
0x12b4   :  { %v1688_v31 = vadd.f32 %v1686_v30, %v7359_v55 }
0x12b6   :  { %7072 = vtanh.f32 %v1688_v31 }
0x12b8   :  { %v1587_v35 = vpop.permute.xlu1 %1586 }
0x12b9   :  { %v1589_v37 = vmul.f32 %v1587_v35, %v1584_v33 }
0x12bb   :  { %v7580_v39 = vadd.f32 %v1592_v36, %v1589_v37 }
0x12bd   :  { %v1701_v40 = vrot.slane %v7580_v39, 6 }
0x12bf   :  { %1702 = vrot.lane.b32.xlu1 %v1701_v40, %s7262_s27 }
0x12c0   :  { %v7073_v41 = vpop.eup %7072 }
0x12c1   :  { %1692 = vrot.lane.b32.xlu0 %v7073_v41, %s7262_s27 }
0x1331   :  { %v1703_v45 = vpop.permute.xlu1 %1702 }
0x1332   :  { %6177 = vmatmul.mubr.msk.f32.vlgmr.msra.gmra.mrb[16].mxu0 %vm79_vm1, %v1703_v45  ;;  %v57_v45 = vld [vmem:[#allocation2 + $0xe0] sm:$0xff] }
0x1333   :  { %v1693_v50 = vpop.permute.xlu0 %1692  ;;  %6759 = vmatpush3.bf16.msra.mxu0 %v6756_v9  ;;  %6198 = vmatprep.mubr.msk.f32.mxu0 %vm79_vm1, %v29_v15 }
0x1334   :  { %v1695_v52 = vmul.f32 %v1693_v50, %v1690_v46  ;;  %6761 = vmatprep.subr.bf16.mxu0 %v6760_v14  ;;  %v58_v46 = vld [vmem:[#allocation2 + $0xe8] sm:$0xff] }
0x1335   :  { %v7619_v50 = vpack.c.bf16 %v58_v46, %v57_v45 }
0x1336   :  { %v7587_v54 = vadd.f32 %v1698_v51, %v1695_v52  ;;  %v60_v51 = vld [vmem:[#allocation2 + $0xf8] sm:$0xff] }
0x1337   :  { %6763 = vmatpush3.bf16.msra.mxu0 %v6760_v14  ;;  %v7622_v52 = vpack.c.bf16 %v60_v51, %v59_v49  ;;  %v1802_v14 = vrot.slane %v7580_v39, 7 }
0x1338   :  { %v1807_v56 = vrot.slane %v7587_v54, 1  ;;  %6776 = vmatprep.subr.bf16.mxu0 %v7258_v0 }
0x133a   :  { %1808 = vrot.lane.b32.xlu0 %v1807_v56, %s7262_s27  ;;  %6199 = vmatmul.mubr.msk.f32.vlgmr.msra.gmra.mrb[18].mxu0 %vm79_vm1, %v30_v21 }
0x133b   :  { %6201 = vmatprep.mubr.msk.f32.mxu0 %vm79_vm1, %v31_v24  ;;  %6778 = vmatpush3.bf16.msra.mxu0 %v7619_v50 }
0x133c   :  { %6779 = vmatprep.subr.bf16.mxu0 %v7258_v0 }
0x133e   :  { %6202 = vmatmul.mubr.msk.f32.gmra.mrb[20].mxu0 %vm79_vm1, %v32_v25 }
0x133f   :  { %6204 = vmatprep.mubr.msk.f32.mxu0 %vm79_vm1, %v33_v27  ;;  %6781 = vmatpush3.bf16.msra.mxu0 %v7622_v52 }
0x1340   :  { %6782 = vmatprep.subr.bf16.mxu0 %v7258_v0 }
0x13ac   :  { %v1809_v60 = vpop.permute.xlu0 %1808 }
0x13ad   :  { %6188 = vmatmul.mubr.msk.f32.vlgmr.msra.gmra.mrb[16].mxu1 %vm79_vm1, %v1809_v60 }
0x13ae   :  { %6226 = vmatprep.mubr.msk.f32.mxu1 %vm7259_vm0, %v7260_v1 }
0x1405   :  { %v1772_v62 = vpop.f32.mrb[16].mxu0 }
0x1406   :  { %v1773_v17 = vadd.f32 %v1772_v62, %v7346_v32  ;;  %v6178_v23 = vpop.f32.mrb[17].mxu0 }
0x1408   :  { %v1777_v63 = vrot.slane %v1773_v17, 1 }
0x140a   :  { %1786 = vrot.lane.b32.xlu1 %v1777_v63, %s7261_s0  ;;  %v1779_v3 = vadd.f32 %v1777_v63, %v7351_v42 }
0x140c   :  { %v5621_v4 = vmul.f32 -1.442695, %v1779_v3 }
0x140e   :  { %7074 = vpow2.f32 %v5621_v4 }
0x1418   :  { %v7075_v5 = vpop.eup %7074 }
0x1419   :  { %v1783_v22 = vadd.f32 1.0, %v7075_v5 }
0x141b   :  { %7076 = vrcp.f32 %v1783_v22 }
0x1425   :  { %v7599_v11 = vpop.eup %7076 }
0x1426   :  { %v1796_v13 = vsub.f32 1.0, %v7599_v11 }
0x147c   :  { %v1787_v26 = vpop.permute.xlu1 %1786 }
0x147d   :  { %v1789_v32 = vmul.f32 %v7599_v11, %v1787_v26 }
0x147f   :  { %1791 = vrot.lane.b32.xlu1 %v1789_v32, %s7261_s0 }
0x1480   :  { %v1878_v16 = vpop.f32.mrb[16].mxu1 }
0x1481   :  { %v1879_v19 = vadd.f32 %v1878_v16, %v7354_v47  ;;  %v6189_v20 = vpop.f32.mrb[17].mxu1  ;;  %v34_v47 = vld [vmem:[#allocation2 + $0x28] sm:$0xff]  ;;  %v1804_v16 = vmul.f32 %v7599_v11, %v1802_v14 }
0x1482   :  { %6205 = vmatmul.mubr.msk.f32.gmra.mrb[22].mxu0 %vm79_vm1, %v34_v47 }
0x1483   :  { %1890 = vrot.lane.b32.xlu0 %v1879_v19, %s7261_s0  ;;  %6207 = vmatprep.mubr.msk.f32.mxu0 %vm79_vm1, %v35_v28  ;;  %v1882_v30 = vadd.f32 %v1879_v19, %v7359_v55 }
0x1485   :  { %v5623_v31 = vmul.f32 -1.442695, %v1882_v30 }
0x1486   :  { %6208 = vmatmul.mubr.msk.f32.gmra.mrb[24].mxu0 %vm79_vm1, %v36_v29  ;;  %v1910_v29 = vadd.f32 %v7587_v54, %v7401_v61  ;;  %v1914_v61 = vadd.f32 %v7545_v43, %v7448_v2 }
0x1487   :  { %6237 = vmatprep.mubr.msk.f32.mxu0 %vm7259_vm0, %v7260_v1  ;;  %7078 = vpow2.f32 %v5623_v31  ;;  %v1911_v31 = vadd.f32 %v7556_v58, %v7437_v53 }
0x1491   :  { %v7079_v33 = vpop.eup %7078 }
0x1492   :  { %v1886_v34 = vadd.f32 1.0, %v7079_v33 }
0x1494   :  { %7080 = vrcp.f32 %v1886_v34  ;;  %v1913_v34 = vadd.f32 %v7509_v44, %v7484_v59 }
0x149e   :  { %v7081_v37 = vpop.eup %7080 }
0x149f   :  { %v1907_v47 = vmul.f32 %v7081_v37, %v1807_v56  ;;  %v1912_v56 = vadd.f32 %v7520_v57, %v7473_v48 }
0x14f1   :  { %v1792_v35 = vpop.permute.xlu1 %1791 }
0x14f2   :  { %v1794_v36 = vadd.f32 %v1792_v35, %v7351_v42  ;;  %v6200_v42 = vpop.f32.mrb[18].mxu0 }
0x14f3   :  { %v2021_v62 = vpop.f32.mrb[19].mxu0 }
0x14f4   :  { %7082 = vtanh.f32 %v1794_v36  ;;  %v7628_v17 = vpack.c.bf16 %v6200_v42, %v2021_v62  ;;  %v6203_v23 = vpop.f32.mrb[20].mxu0 }
0x14f5   :  { %v1891_v40 = vpop.permute.xlu0 %1890  ;;  %v2031_v63 = vpop.f32.mrb[21].mxu0 }
0x14f6   :  { %v1893_v41 = vmul.f32 %v7081_v37, %v1891_v40  ;;  %6766 = vmatpush3.bf16.msra.mxu1 %v7628_v17  ;;  %v7632_v3 = vpack.c.bf16 %v6203_v23, %v2031_v63 }
0x14f7   :  { %6767 = vmatprep.subr.bf16.mxu1 %v7258_v0 }
0x14f8   :  { %1895 = vrot.lane.b32.xlu0 %v1893_v41, %s7261_s0 }
0x14fa   :  { %6769 = vmatpush3.bf16.msra.mxu1 %v7632_v3 }
0x14fb   :  { %6770 = vmatprep.subr.bf16.mxu1 %v7258_v0 }
0x14fe   :  { %v7083_v60 = vpop.eup %7082 }
0x14ff   :  { %1798 = vrot.lane.b32.xlu1 %v7083_v60, %s7262_s27 }
0x1555   :  { %v6206_v4 = vpop.f32.mrb[22].mxu0 }
0x1556   :  { %v2041_v5 = vpop.f32.mrb[23].mxu0 }
0x1557   :  { %v7636_v22 = vpack.c.bf16 %v6206_v4, %v2041_v5 }
0x1559   :  { %v6209_v6 = vpop.f32.mrb[24].mxu0  ;;  %6772 = vmatpush3.bf16.msra.mxu1 %v7636_v22 }
0x155a   :  { %v2051_v9 = vpop.f32.mrb[25].mxu0  ;;  %6773 = vmatprep.subr.bf16.mxu1 %v7258_v0 }
0x155b   :  { %v7643_v26 = vpack.c.bf16 %v6209_v6, %v2051_v9 }
0x155d   :  { %6775 = vmatpush3.bf16.msra.mxu1 %v7643_v26 }
0x155e   :  { %6240 = vmatprep.subr.mxu1 %v7260_v1 }
0x1560   :  { %6227 = vmatmul.mubr.msk.f32.vlgmr.msra.gmra.mrb[18].mxu1 %vm2067_vm3, %v5632_v12 }
0x1561   :  { %6242 = vmatprep.mubr.msk.f32.mxu1 %vm7259_vm0, %v7260_v1 }
0x156a   :  { %v1896_v32 = vpop.permute.xlu0 %1895 }
0x156b   :  { %v1898_v38 = vadd.f32 %v1896_v32, %v7359_v55  ;;  %v1900_v55 = vsub.f32 1.0, %v7081_v37 }
0x156d   :  { %7084 = vtanh.f32 %v1898_v38 }
0x1571   :  { %v1799_v15 = vpop.permute.xlu1 %1798 }
0x1572   :  { %v1801_v19 = vmul.f32 %v1799_v15, %v1796_v13 }
0x1574   :  { %v7658_v20 = vadd.f32 %v1804_v16, %v1801_v19 }
0x1576   :  { %v2142_v21 = vrot.slane %v7658_v20, 7  ;;  %v1916_v48 = vadd.f32 %v7658_v20, %v7376_v18 }
0x1577   :  { %v7085_v24 = vpop.eup %7084 }
0x1578   :  { %1902 = vrot.lane.b32.xlu0 %v7085_v24, %s7262_s27  ;;  %2143 = vrot.lane.b32.xlu1 %v2142_v21, %s7262_s27 }
0x15ea   :  { %v1903_v25 = vpop.permute.xlu0 %1902  ;;  %v2144_v27 = vpop.permute.xlu1 %2143 }
0x15eb   :  { %v1905_v28 = vmul.f32 %v1903_v25, %v1900_v55  ;;  %6238 = vmatmul.mubr.msk.f32.vlgmr.msra.gmra.mrb[26].mxu0 %vm79_vm1, %v2144_v27  ;;  %v65_v55 = vld [vmem:[#allocation2 + $0x120] sm:$0xff]  ;;  %v66_v25 = vld [vmem:[#allocation2 + $0x128] sm:$0xff]  ;;  %v67_v27 = vld [vmem:[#allocation2 + $0x130] sm:$0xff] }
0x15ec   :  { %6258 = vmatprep.mubr.msk.f32.mxu0 %vm7259_vm0, %v7260_v1 }
0x15ed   :  { %v1908_v11 = vadd.f32 %v1907_v47, %v1905_v28  ;;  %v7720_v47 = vpack.c.bf16 %v66_v25, %v65_v55  ;;  %v68_v28 = vld [vmem:[#allocation2 + $0x138] sm:$0xff] }
0x15ef   :  { %v1909_v30 = vadd.f32 %v1908_v11, %v7366_v10  ;;  %v1915_v10 = vadd.f32 %v7580_v39, %v7412_v8  ;;  %v7691_v8 = vld [vmem:[#allocation2 + $0x160] sm:$0xff]  ;;  %6784 = vmatpush3.bf16.msra.mxu0 %v7720_v47  ;;  %v7723_v11 = vpack.c.bf16 %v68_v28, %v67_v27 }
0x15f0   :  { %v7694_v2 = vrot.slane %v7691_v8, 5  ;;  %v7699_v40 = vrot.slane %v7691_v8, 4  ;;  %6785 = vmatprep.subr.bf16.mxu0 %v7258_v0 }
0x15f1   :  { %v1918_v33 = vsel %vm1917_vm4, %v1909_v30, %v1910_v29  ;;  %v61_v30 = vld [vmem:[#allocation2 + $0x100] sm:$0xff] }
0x15f2   :  { %v1920_v35 = vsel %vm1919_vm5, %v1918_v33, %v1911_v31  ;;  %v62_v31 = vld [vmem:[#allocation2 + $0x108] sm:$0xff] }
0x15f3   :  { %v1922_v54 = vsel %vm1921_vm6, %v1920_v35, %v1912_v56  ;;  %6787 = vmatpush3.bf16.msra.mxu0 %v7723_v11  ;;  %v7728_v33 = vpack.c.bf16 %v62_v31, %v61_v30  ;;  %v63_v35 = vld [vmem:[#allocation2 + $0x110] sm:$0xff] }
0x15f4   :  { %v1924_v53 = vsel %vm1923_vm7, %v1922_v54, %v1913_v34  ;;  %6794 = vmatprep.subr.bf16.mxu0 %v7258_v0  ;;  %vm2663_vm7 = vcmp.eq.s32.totalorder %v7640_v7, 0 }
0x15f5   :  { %v1926_v57 = vsel %vm1925_vm8, %v1924_v53, %v1914_v61  ;;  %v64_v61 = vld [vmem:[#allocation2 + $0x118] sm:$0xff] }
0x15f6   :  { %v1928_v58 = vsel %vm1927_vm9, %v1926_v57, %v1915_v10  ;;  %v7732_v54 = vpack.c.bf16 %v64_v61, %v63_v35 }
0x15f7   :  { %v1930_v36 = vsel %vm1929_vm10, %v1928_v58, %v1916_v48  ;;  %v69_v58 = vld [vmem:[#allocation2 + $0x140] sm:$0xff] }
0x15f8   :  { %2250 = vrot.lane.b32.xlu0 %v1930_v36, %s7262_s27  ;;  %v70_v36 = vld [vmem:[#allocation2 + $0x148] sm:$0xff] }
0x1633   :  { %v2137_v59 = vpop.f32.mrb[18].mxu1 }
0x1634   :  { %v6228_v44 = vpop.f32.mrb[19].mxu1  ;;  %v2138_v41 = vadd.f32 %v2137_v59, %v7699_v40  ;;  %v71_v59 = vld [vmem:[#allocation2 + $0x150] sm:$0xff] }
0x1635   :  { %v7754_v44 = vpack.c.bf16 %v70_v36, %v69_v58 }
0x166a   :  { %v7686_v37 = vpop.permute.xlu0 %2250 }
0x166b   :  { %6241 = vmatpush3.xpose.msk.msra.mxu1 %vm79_vm1, %v7686_v37 }
0x166c   :  { %6245 = vmatprep.subr.mxu1 %v7260_v1 }
0x16be   :  { %v2215_v18 = vpop.f32.mrb[26].mxu0 }
0x16bf   :  { %v2216_v43 = vadd.f32 %v2215_v18, %v7694_v2  ;;  %v6239_v39 = vpop.f32.mrb[27].mxu0  ;;  %v72_v18 = vld [vmem:[#allocation2 + $0x158] sm:$0xff] }
0x16c0   :  { %v7763_v39 = vrot.slane %v7691_v8, 6 }
0x16c1   :  { %2227 = vrot.lane.b32.xlu1 %v2216_v43, %s7261_s0  ;;  %v2219_v45 = vadd.f32 %v2216_v43, %v2138_v41  ;;  %v7757_v43 = vpack.c.bf16 %v72_v18, %v71_v59 }
0x16c3   :  { %v5635_v46 = vmul.f32 -1.442695, %v2219_v45 }
0x16c5   :  { %7086 = vpow2.f32 %v5635_v46 }
0x16cf   :  { %v7087_v49 = vpop.eup %7086 }
0x16d0   :  { %v2223_v51 = vadd.f32 1.0, %v7087_v49 }
0x16d2   :  { %7088 = vrcp.f32 %v2223_v51 }
0x16dc   :  { %v7089_v60 = vpop.eup %7088 }
0x16dd   :  { %v2237_v5 = vsub.f32 1.0, %v7089_v60  ;;  %v2244_v9 = vmul.f32 %v7089_v60, %v2142_v21 }
0x1733   :  { %v2228_v42 = vpop.permute.xlu1 %2227 }
0x1734   :  { %v2230_v62 = vmul.f32 %v7089_v60, %v2228_v42  ;;  %v7782_v60 = vrot.slane %v7691_v8, 7 }
0x1736   :  { %2232 = vrot.lane.b32.xlu1 %v2230_v62, %s7261_s0 }
0x17a8   :  { %v2233_v23 = vpop.permute.xlu1 %2232 }
0x17a9   :  { %v2235_v63 = vadd.f32 %v2233_v23, %v2138_v41 }
0x17ab   :  { %7090 = vtanh.f32 %v2235_v63 }
0x17b5   :  { %v7091_v4 = vpop.eup %7090 }
0x17b6   :  { %2239 = vrot.lane.b32.xlu1 %v7091_v4, %s7262_s27 }
0x1828   :  { %v2240_v6 = vpop.permute.xlu1 %2239 }
0x1829   :  { %v2242_v32 = vmul.f32 %v2240_v6, %v2237_v5 }
0x182b   :  { %v7706_v12 = vadd.f32 %v2244_v9, %v2242_v32 }
0x182d   :  { %2247 = vrot.lane.b32.xlu1 %v7706_v12, %s7262_s27 }
0x189f   :  { %v7710_v38 = vpop.permute.xlu1 %2247 }
0x18a0   :  { %6243 = vmatmul.mubr.msk.f32.vlgmr.msra.gmra.mrb[20].mxu1 %vm79_vm1, %v7710_v38 }
0x18a1   :  { %6246 = vmatpush3.msra.mxu1 %v7686_v37  ;;  %6247 = vmatprep.mubr.msk.f32.mxu1 %vm7259_vm0, %v7260_v1 }
0x18a2   :  { %6788 = vmatprep.subr.bf16.mxu1 %v7258_v0 }
0x1973   :  { %v2322_v13 = vpop.f32.mrb[20].mxu1 }
0x1974   :  { %v6244_v14 = vpop.f32.mrb[21].mxu1  ;;  %v2327_v15 = vsel %vm2326_vm11, %v2322_v13, -inf }
0x1975   :  { %2328 = vmax.xlane.f32.xlu0 %v2327_v15 }
0x1a02   :  { %v2329_v16 = vpop.xlane.xlu0 %2328 }
0x1a03   :  { %v2330_v19 = vsub.f32 %v2322_v13, %v2329_v16 }
0x1a05   :  { %v2331_v20 = vmul.f32 1.442695, %v2330_v19 }
0x1a07   :  { %7092 = vpow2.f32 %v2331_v20 }
0x1a11   :  { %v7093_v21 = vpop.eup %7092 }
0x1a12   :  { %v2333_v24 = vsel %vm2326_vm11, %v7093_v21, 0.0 }
0x1a13   :  { %2334 = vadd.xlane.f32.xlu1 %v2333_v24 }
0x1aa0   :  { %v2335_v29 = vpop.xlane.xlu1 %2334 }
0x1aa1   :  { %7094 = vrcp.f32 %v2335_v29 }
0x1aab   :  { %v7095_v56 = vpop.eup %7094 }
0x1aac   :  { %v2337_v34 = vmul.f32 %v7095_v56, %v7093_v21 }
0x1aae   :  { %6248 = vmatmul.mubr.msk.f32.vlgmr.msra.gmra.mrb[22].mxu1 %vm2339_vm12, %v2337_v34 }
0x1aaf   :  { %6790 = vmatpush3.bf16.msra.mxu1 %v7728_v33  ;;  %6269 = vmatprep.mubr.msk.f32.mxu1 %vm7259_vm0, %v7260_v1 }
0x1ab0   :  { %6791 = vmatprep.subr.bf16.mxu1 %v7258_v0 }
0x1ab3   :  { %6793 = vmatpush3.bf16.msra.mxu1 %v7732_v54 }
0x1ab4   :  { %6800 = vmatprep.subr.bf16.mxu1 %v7258_v0 }
0x1ab6   :  { %6270 = vmatmul.mubr.msk.f32.vlgmr.msra.gmra.mrb[24].mxu1 %vm79_vm1, %v7710_v38 }
0x1ab7   :  { %6802 = vmatpush3.bf16.msra.mxu1 %v7628_v17  ;;  %6299 = vmatprep.mubr.msk.f32.mxu1 %vm7259_vm0, %v7260_v1 }
0x1ab8   :  { %6803 = vmatprep.subr.bf16.mxu1 %v7258_v0 }
0x1abb   :  { %6805 = vmatpush3.bf16.msra.mxu1 %v7632_v3 }
0x1abc   :  { %6806 = vmatprep.subr.bf16.mxu1 %v7258_v0 }
0x1abf   :  { %6808 = vmatpush3.bf16.msra.mxu1 %v7636_v22 }
0x1ac0   :  { %6809 = vmatprep.subr.bf16.mxu1 %v7258_v0 }
0x1ac3   :  { %6811 = vmatpush3.bf16.msra.mxu1 %v7643_v26 }
0x1ac4   :  { %6313 = vmatprep.subr.mxu1 %v7260_v1 }
0x1b81   :  { %v2409_v10 = vpop.f32.mrb[22].mxu1 }
0x1b82   :  { %v6249_v53 = vpop.f32.mrb[23].mxu1  ;;  %6259 = vmatmul.mubr.msk.f32.vlgmr.msra.gmra.mrb[28].mxu0 %vm79_vm1, %v2409_v10 }
0x1b83   :  { %6280 = vmatprep.mubr.msk.f32.mxu0 %vm7259_vm0, %v7260_v1  ;;  %6796 = vmatpush3.bf16.msra.mxu0 %v7754_v44 }
0x1b84   :  { %6797 = vmatprep.subr.bf16.mxu0 %v7258_v0 }
0x1b87   :  { %6799 = vmatpush3.bf16.msra.mxu0 %v7757_v43 }
0x1b88   :  { %6812 = vmatprep.subr.bf16.mxu0 %v7258_v0 }
0x1b89   :  { %v2552_v48 = vpop.f32.mrb[24].mxu1 }
0x1b8a   :  { %v6271_v57 = vpop.f32.mrb[25].mxu1 }
0x1c55   :  { %v2482_v41 = vpop.f32.mrb[28].mxu0 }
0x1c56   :  { %v2553_v45 = vadd.f32 %v2552_v48, %v2482_v41  ;;  %v6260_v46 = vpop.f32.mrb[29].mxu0 }
0x1c58   :  { %v2558_v49 = vadd.f32 %v7763_v39, %v2553_v45 }
0x1c5a   :  { %7096 = vtanh.f32 %v2558_v49 }
0x1c64   :  { %v7097_v51 = vpop.eup %7096 }
0x1c65   :  { %6281 = vmatmul.mubr.msk.f32.vlgmr.msra.gmra.mrb[30].mxu0 %vm79_vm1, %v7097_v51 }
0x1c66   :  { %6814 = vmatpush3.bf16.msra.mxu0 %v7619_v50  ;;  %6310 = vmatprep.mubr.msk.f32.mxu0 %vm7259_vm0, %v7260_v1 }
0x1c67   :  { %6815 = vmatprep.subr.bf16.mxu0 %v7258_v0 }
0x1c6a   :  { %6817 = vmatpush3.bf16.msra.mxu0 %v7622_v52 }
0x1c6b   :  { %6818 = vmatprep.subr.bf16.mxu0 %v7258_v0 }
0x1c6d   :  { %6311 = vmatmul.mubr.msk.f32.vlgmr.msra.gmra.mrb[32].mxu0 %vm79_vm1, %v7710_v38 }
0x1c6e   :  { %6820 = vmatpush3.bf16.msra.mxu0 %v7720_v47  ;;  %6331 = vmatprep.mubr.msk.f32.mxu0 %vm7259_vm0, %v7260_v1 }
0x1c6f   :  { %6821 = vmatprep.subr.bf16.mxu0 %v7258_v0 }
0x1c72   :  { %6823 = vmatpush3.bf16.msra.mxu0 %v7723_v11 }
0x1c73   :  { %6830 = vmatprep.subr.bf16.mxu0 %v7258_v0 }
0x1d38   :  { %v2631_v42 = vpop.f32.mrb[30].mxu0 }
0x1d39   :  { %v7785_v62 = vadd.f32 %v2631_v42, %v7782_v60  ;;  %v6282_v23 = vpop.f32.mrb[31].mxu0 }
0x1d3b   :  { %v2636_v63 = vsel %vm2635_vm13, %v7785_v62, -inf }
0x1d3c   :  { %2637 = vmax.xlane.f32.xlu0 %v2636_v63 }
0x1d40   :  { %v2808_v4 = vpop.f32.mrb[32].mxu0 }
0x1d41   :  { %v6312_v5 = vpop.f32.mrb[33].mxu0  ;;  %v2809_v13 = vadd.f32 %v2808_v4, %v7694_v2 }
0x1dc9   :  { %v7789_v6 = vpop.xlane.xlu0 %2637 }
0x1dca   :  { %vm2639_vm14 = vcmp.ge.f32.partialorder %v7785_v62, %v7789_v6 }
0x1dcb   :  { %v2640_v8 = vsel %vm2639_vm14, %v7640_v7, 64  ;;  %vm3820_vm14 = vcmp.eq.s32.totalorder %v7640_v7, 2 }
0x1dcc   :  { %v2641_v9 = vsel %vm2635_vm13, %v2640_v8, 2147483647 }
0x1dcd   :  { %v2643_v32 = vshra.s32 %v2641_v9, 16  ;;  %v2642_v14 = vand.u32 65535, %v2641_v9 }
0x1dcf   :  { %v2645_v38 = vcvt.s32.f32 %v2643_v32  ;;  %v2644_v16 = vcvt.s32.f32 %v2642_v14 }
0x1dd1   :  { %2646 = vmin.xlane.f32.xlu0 %v2645_v38 }
0x1de7   :  { %2820 = vrot.lane.b32.xlu0 %v2809_v13, %s7261_s0 }
0x1e5e   :  { %v2647_v15 = vpop.xlane.xlu0 %2646 }
0x1e5f   :  { %vm2648_vm15 = vcmp.eq.f32.partialorder %v2645_v38, %v2647_v15  ;;  %v2653_v20 = vcvt.f32.s32 %v2647_v15 }
0x1e60   :  { %v2649_v19 = vsel %vm2648_vm15, %v2644_v16, inf }
0x1e61   :  { %2650 = vmin.xlane.f32.xlu1 %v2649_v19  ;;  %v2654_v24 = vshll.u32 %v2653_v20, 16 }
0x1e62   :  { %v2821_v10 = vpop.permute.xlu0 %2820 }
0x1eee   :  { %v2651_v21 = vpop.xlane.xlu1 %2650 }
0x1eef   :  { %v2652_v55 = vcvt.f32.s32 %v2651_v21 }
0x1ef1   :  { %v7797_v25 = vadd.s32 %v2654_v24, %v2652_v55 }
0x1ef3   :  { %vm2666_vm4 = vcmp.eq.s32.totalorder %v7640_v7, %v7797_v25 }
0x1ef4   :  { %v5642_v27 = vsel %vm2666_vm4, 1.0, %v7260_v1 }
0x1ef5   :  { %6300 = vmatmul.mubr.msk.f32.vlgmr.msra.gmra.mrb[26].mxu1 %vm2067_vm3, %v5642_v27 }
0x1ef6   :  { %6314 = vmatpush3.xpose.msk.msra.mxu1 %vm79_vm1, %v7686_v37  ;;  %6315 = vmatprep.mubr.msk.f32.mxu1 %vm7259_vm0, %v7260_v1 }
0x1ef7   :  { %6318 = vmatprep.subr.mxu1 %v7260_v1 }
0x1fc8   :  { %v2738_v28 = vpop.f32.mrb[26].mxu1 }
0x1fc9   :  { %v2739_v29 = vadd.f32 %v2738_v28, %v7699_v40  ;;  %v6301_v30 = vpop.f32.mrb[27].mxu1 }
0x1fcb   :  { %v2812_v31 = vadd.f32 %v2809_v13, %v2739_v29 }
0x1fcd   :  { %v5645_v56 = vmul.f32 -1.442695, %v2812_v31 }
0x1fcf   :  { %7098 = vpow2.f32 %v5645_v56 }
0x1fd9   :  { %v7099_v34 = vpop.eup %7098 }
0x1fda   :  { %v2816_v35 = vadd.f32 1.0, %v7099_v34 }
0x1fdc   :  { %7100 = vrcp.f32 %v2816_v35 }
0x1fe6   :  { %v7101_v61 = vpop.eup %7100 }
0x1fe7   :  { %v2823_v53 = vmul.f32 %v7101_v61, %v2821_v10  ;;  %v2830_v36 = vsub.f32 1.0, %v7101_v61  ;;  %v2836_v18 = vmul.f32 %v7101_v61, %v7706_v12 }
0x1fe9   :  { %2825 = vrot.lane.b32.xlu1 %v2823_v53, %s7261_s0 }
0x205b   :  { %v2826_v48 = vpop.permute.xlu1 %2825 }
0x205c   :  { %v2828_v57 = vadd.f32 %v2826_v48, %v2739_v29 }
0x205e   :  { %7102 = vtanh.f32 %v2828_v57 }
0x2068   :  { %v7103_v58 = vpop.eup %7102 }
0x2069   :  { %2832 = vrot.lane.b32.xlu1 %v7103_v58, %s7262_s27 }
0x20db   :  { %v2833_v59 = vpop.permute.xlu1 %2832 }
0x20dc   :  { %v2835_v41 = vmul.f32 %v2833_v59, %v2830_v36 }
0x20de   :  { %v7812_v45 = vadd.f32 %v2836_v18, %v2835_v41 }
0x20e0   :  { %2839 = vrot.lane.b32.xlu0 %v7812_v45, %s7262_s27 }
0x2152   :  { %v2840_v46 = vpop.permute.xlu0 %2839 }
0x2153   :  { %6316 = vmatmul.mubr.msk.f32.vlgmr.msra.gmra.mrb[28].mxu1 %vm79_vm1, %v2840_v46 }
0x2154   :  { %6319 = vmatpush3.msra.mxu1 %v7686_v37  ;;  %6320 = vmatprep.mubr.msk.f32.mxu1 %vm7259_vm0, %v7260_v1 }
0x2155   :  { %6824 = vmatprep.subr.bf16.mxu1 %v7258_v0 }
0x2226   :  { %v2909_v49 = vpop.f32.mrb[28].mxu1 }
0x2227   :  { %v6317_v51 = vpop.f32.mrb[29].mxu1  ;;  %v2913_v12 = vsel %vm2326_vm11, %v2909_v49, -inf }
0x2228   :  { %2914 = vmax.xlane.f32.xlu1 %v2913_v12  ;;  %v2664_v51 = vsel %vm2663_vm7, %v7797_v25, 0 }
0x22b5   :  { %v2915_v42 = vpop.xlane.xlu1 %2914 }
0x22b6   :  { %v2916_v23 = vsub.f32 %v2909_v49, %v2915_v42 }
0x22b8   :  { %v2917_v63 = vmul.f32 1.442695, %v2916_v23 }
0x22ba   :  { %7104 = vpow2.f32 %v2917_v63 }
0x22c4   :  { %v7105_v4 = vpop.eup %7104 }
0x22c5   :  { %v2919_v5 = vsel %vm2326_vm11, %v7105_v4, 0.0 }
0x22c6   :  { %2920 = vadd.xlane.f32.xlu0 %v2919_v5 }
0x2353   :  { %v2921_v8 = vpop.xlane.xlu0 %2920 }
0x2354   :  { %7106 = vrcp.f32 %v2921_v8 }
0x235e   :  { %v7107_v9 = vpop.eup %7106 }
0x235f   :  { %v2923_v32 = vmul.f32 %v7107_v9, %v7105_v4 }
0x2361   :  { %6321 = vmatmul.mubr.msk.f32.vlgmr.msra.gmra.mrb[30].mxu1 %vm2339_vm12, %v2923_v32 }
0x2362   :  { %6826 = vmatpush3.bf16.msra.mxu1 %v7728_v33  ;;  %6342 = vmatprep.mubr.msk.f32.mxu1 %vm7259_vm0, %v7260_v1 }
0x2363   :  { %6827 = vmatprep.subr.bf16.mxu1 %v7258_v0 }
0x2366   :  { %6829 = vmatpush3.bf16.msra.mxu1 %v7732_v54 }
0x2367   :  { %6836 = vmatprep.subr.bf16.mxu1 %v7258_v0 }
0x2369   :  { %6343 = vmatmul.mubr.msk.f32.vlgmr.msra.gmra.mrb[32].mxu1 %vm79_vm1, %v2840_v46 }
0x236a   :  { %6838 = vmatpush3.bf16.msra.mxu1 %v7628_v17  ;;  %6372 = vmatprep.mubr.msk.f32.mxu1 %vm7259_vm0, %v7260_v1 }
0x236b   :  { %6839 = vmatprep.subr.bf16.mxu1 %v7258_v0 }
0x236e   :  { %6841 = vmatpush3.bf16.msra.mxu1 %v7632_v3 }
0x236f   :  { %6842 = vmatprep.subr.bf16.mxu1 %v7258_v0 }
0x2372   :  { %6844 = vmatpush3.bf16.msra.mxu1 %v7636_v22 }
0x2373   :  { %6845 = vmatprep.subr.bf16.mxu1 %v7258_v0 }
0x2376   :  { %6847 = vmatpush3.bf16.msra.mxu1 %v7643_v26 }
0x2377   :  { %6391 = vmatprep.subr.mxu1 %v7260_v1 }
0x2434   :  { %v2993_v38 = vpop.f32.mrb[30].mxu1 }
0x2435   :  { %v6322_v13 = vpop.f32.mrb[31].mxu1  ;;  %6332 = vmatmul.mubr.msk.f32.vlgmr.msra.gmra.mrb[34].mxu0 %vm79_vm1, %v2993_v38 }
0x2436   :  { %6832 = vmatpush3.bf16.msra.mxu0 %v7754_v44  ;;  %6353 = vmatprep.mubr.msk.f32.mxu0 %vm7259_vm0, %v7260_v1 }
0x2437   :  { %6833 = vmatprep.subr.bf16.mxu0 %v7258_v0 }
0x243a   :  { %6835 = vmatpush3.bf16.msra.mxu0 %v7757_v43 }
0x243b   :  { %6848 = vmatprep.subr.bf16.mxu0 %v7258_v0 }
0x243c   :  { %v3136_v14 = vpop.f32.mrb[32].mxu1 }
0x243d   :  { %v6344_v15 = vpop.f32.mrb[33].mxu1 }
0x2508   :  { %v3066_v16 = vpop.f32.mrb[34].mxu0 }
0x2509   :  { %v3137_v19 = vadd.f32 %v3136_v14, %v3066_v16  ;;  %v6333_v20 = vpop.f32.mrb[35].mxu0 }
0x250b   :  { %v3140_v21 = vadd.f32 %v3137_v19, %v7763_v39 }
0x250d   :  { %7108 = vtanh.f32 %v3140_v21 }
0x2517   :  { %v7109_v24 = vpop.eup %7108 }
0x2518   :  { %6354 = vmatmul.mubr.msk.f32.vlgmr.msra.gmra.mrb[36].mxu0 %vm79_vm1, %v7109_v24 }
0x2519   :  { %6850 = vmatpush3.bf16.msra.mxu0 %v7619_v50  ;;  %6383 = vmatprep.mubr.msk.f32.mxu0 %vm7259_vm0, %v7260_v1 }
0x251a   :  { %6851 = vmatprep.subr.bf16.mxu0 %v7258_v0 }
0x251d   :  { %6853 = vmatpush3.bf16.msra.mxu0 %v7622_v52 }
0x251e   :  { %6386 = vmatprep.subr.mxu0 %v7260_v1 }
0x2520   :  { %6384 = vmatmul.mubr.msk.f32.vlgmr.msra.gmra.mrb[38].mxu0 %vm79_vm1, %v2840_v46 }
0x2521   :  { %6388 = vmatprep.mubr.msk.f32.mxu0 %vm7259_vm0, %v7260_v1 }
0x2526   :  { %6387 = vmatpush3.xpose.msk.msra.mxu0 %vm79_vm1, %v7686_v37 }
0x2527   :  { %6854 = vmatprep.subr.bf16.mxu0 %v7258_v0 }
0x25eb   :  { %v3211_v55 = vpop.f32.mrb[36].mxu0 }
0x25ec   :  { %v7863_v27 = vadd.f32 %v3211_v55, %v7782_v60  ;;  %v6355_v28 = vpop.f32.mrb[37].mxu0 }
0x25ee   :  { %v3215_v29 = vsel %vm2635_vm13, %v7863_v27, -inf }
0x25ef   :  { %3216 = vmax.xlane.f32.xlu0 %v3215_v29 }
0x25f3   :  { %v3386_v30 = vpop.f32.mrb[38].mxu0 }
0x25f4   :  { %v6385_v31 = vpop.f32.mrb[39].mxu0  ;;  %v3387_v53 = vadd.f32 %v3386_v30, %v7694_v2 }
0x267c   :  { %v7867_v56 = vpop.xlane.xlu0 %3216 }
0x267d   :  { %vm3218_vm5 = vcmp.ge.f32.partialorder %v7863_v27, %v7867_v56 }
0x267e   :  { %v3219_v34 = vsel %vm3218_vm5, %v7640_v7, 64 }
0x267f   :  { %v3220_v35 = vsel %vm2635_vm13, %v3219_v34, 2147483647 }
0x2680   :  { %v3222_v61 = vshra.s32 %v3220_v35, 16  ;;  %v3221_v48 = vand.u32 65535, %v3220_v35 }
0x2682   :  { %v3224_v10 = vcvt.s32.f32 %v3222_v61  ;;  %v3223_v58 = vcvt.s32.f32 %v3221_v48 }
0x2684   :  { %3225 = vmin.xlane.f32.xlu1 %v3224_v10 }
0x2695   :  { %3398 = vrot.lane.b32.xlu1 %v3387_v53, %s7261_s0 }
0x2711   :  { %v3226_v57 = vpop.xlane.xlu1 %3225 }
0x2712   :  { %vm3227_vm6 = vcmp.eq.f32.partialorder %v3224_v10, %v3226_v57  ;;  %v3232_v59 = vcvt.f32.s32 %v3226_v57 }
0x2713   :  { %v3228_v36 = vsel %vm3227_vm6, %v3223_v58, inf  ;;  %vm4399_vm6 = vcmp.eq.s32.totalorder %v7640_v7, 3 }
0x2714   :  { %3229 = vmin.xlane.f32.xlu0 %v3228_v36  ;;  %v3233_v41 = vshll.u32 %v3232_v59, 16 }
0x2715   :  { %v3399_v38 = vpop.permute.xlu1 %3398 }
0x27a1   :  { %v3230_v18 = vpop.xlane.xlu0 %3229 }
0x27a2   :  { %v3231_v46 = vcvt.f32.s32 %v3230_v18 }
0x27a4   :  { %v3234_v49 = vadd.s32 %v3233_v41, %v3231_v46 }
0x27a6   :  { %v7881_v12 = vsel %vm2062_vm2, %v3234_v49, %v2664_v51  ;;  %vm3244_vm8 = vcmp.eq.s32.totalorder %v7640_v7, %v3234_v49 }
0x27a7   :  { %v5652_v42 = vsel %vm3244_vm8, 1.0, %v7260_v1 }
0x27a8   :  { %6373 = vmatmul.mubr.msk.f32.vlgmr.msra.gmra.mrb[34].mxu1 %vm2067_vm3, %v5652_v42 }
0x27a9   :  { %6392 = vmatpush3.msra.mxu1 %v7686_v37  ;;  %6393 = vmatprep.mubr.msk.f32.mxu1 %vm7259_vm0, %v7260_v1 }
0x27aa   :  { %6860 = vmatprep.subr.bf16.mxu1 %v7258_v0 }
0x287b   :  { %v3316_v23 = vpop.f32.mrb[34].mxu1 }
0x287c   :  { %v3317_v25 = vadd.f32 %v3316_v23, %v7699_v40  ;;  %v6374_v63 = vpop.f32.mrb[35].mxu1 }
0x287e   :  { %v3390_v4 = vadd.f32 %v3387_v53, %v3317_v25 }
0x2880   :  { %v5655_v5 = vmul.f32 -1.442695, %v3390_v4 }
0x2882   :  { %7110 = vpow2.f32 %v5655_v5 }
0x288c   :  { %v7111_v8 = vpop.eup %7110 }
0x288d   :  { %v3394_v9 = vadd.f32 1.0, %v7111_v8 }
0x288f   :  { %7112 = vrcp.f32 %v3394_v9 }
0x2899   :  { %v7113_v32 = vpop.eup %7112 }
0x289a   :  { %v3401_v13 = vmul.f32 %v7113_v32, %v3399_v38  ;;  %v3408_v19 = vsub.f32 1.0, %v7113_v32  ;;  %v3414_v21 = vmul.f32 %v7113_v32, %v7812_v45 }
0x289c   :  { %3403 = vrot.lane.b32.xlu0 %v3401_v13, %s7261_s0 }
0x290e   :  { %v3404_v14 = vpop.permute.xlu0 %3403 }
0x290f   :  { %v3406_v15 = vadd.f32 %v3404_v14, %v3317_v25 }
0x2911   :  { %7114 = vtanh.f32 %v3406_v15 }
0x291b   :  { %v7115_v16 = vpop.eup %7114 }
0x291c   :  { %3410 = vrot.lane.b32.xlu1 %v7115_v16, %s7262_s27 }
0x298e   :  { %v3411_v20 = vpop.permute.xlu1 %3410 }
0x298f   :  { %v3413_v24 = vmul.f32 %v3411_v20, %v3408_v19 }
0x2991   :  { %v7894_v55 = vadd.f32 %v3414_v21, %v3413_v24 }
0x2993   :  { %3417 = vrot.lane.b32.xlu1 %v7894_v55, %s7262_s27 }
0x2a05   :  { %v3418_v28 = vpop.permute.xlu1 %3417 }
0x2a06   :  { %6389 = vmatmul.mubr.msk.f32.vlgmr.msra.gmra.mrb[40].mxu0 %vm79_vm1, %v3418_v28 }
0x2a07   :  { %6856 = vmatpush3.bf16.msra.mxu0 %v7720_v47  ;;  %6404 = vmatprep.mubr.msk.f32.mxu0 %vm7259_vm0, %v7260_v1 }
0x2a08   :  { %6857 = vmatprep.subr.bf16.mxu0 %v7258_v0 }
0x2a0b   :  { %6859 = vmatpush3.bf16.msra.mxu0 %v7723_v11 }
0x2a0c   :  { %6866 = vmatprep.subr.bf16.mxu0 %v7258_v0 }
0x2ad9   :  { %v3487_v45 = vpop.f32.mrb[40].mxu0 }
0x2ada   :  { %v6390_v29 = vpop.f32.mrb[41].mxu0  ;;  %v3491_v30 = vsel %vm2326_vm11, %v3487_v45, -inf }
0x2adb   :  { %3492 = vmax.xlane.f32.xlu0 %v3491_v30 }
0x2b68   :  { %v3493_v31 = vpop.xlane.xlu0 %3492 }
0x2b69   :  { %v3494_v34 = vsub.f32 %v3487_v45, %v3493_v31 }
0x2b6b   :  { %v3495_v35 = vmul.f32 1.442695, %v3494_v34 }
0x2b6d   :  { %7116 = vpow2.f32 %v3495_v35 }
0x2b77   :  { %v7117_v61 = vpop.eup %7116 }
0x2b78   :  { %v3497_v10 = vsel %vm2326_vm11, %v7117_v61, 0.0 }
0x2b79   :  { %3498 = vadd.xlane.f32.xlu1 %v3497_v10 }
0x2c06   :  { %v3499_v53 = vpop.xlane.xlu1 %3498 }
0x2c07   :  { %7118 = vrcp.f32 %v3499_v53 }
0x2c11   :  { %v7119_v48 = vpop.eup %7118 }
0x2c12   :  { %v3501_v57 = vmul.f32 %v7119_v48, %v7117_v61 }
0x2c14   :  { %6394 = vmatmul.mubr.msk.f32.vlgmr.msra.gmra.mrb[36].mxu1 %vm2339_vm12, %v3501_v57 }
0x2c15   :  { %6862 = vmatpush3.bf16.msra.mxu1 %v7728_v33  ;;  %6415 = vmatprep.mubr.msk.f32.mxu1 %vm7259_vm0, %v7260_v1 }
0x2c16   :  { %6863 = vmatprep.subr.bf16.mxu1 %v7258_v0 }
0x2c19   :  { %6865 = vmatpush3.bf16.msra.mxu1 %v7732_v54 }
0x2c1a   :  { %6872 = vmatprep.subr.bf16.mxu1 %v7258_v0 }
0x2c1c   :  { %6416 = vmatmul.mubr.msk.f32.vlgmr.msra.gmra.mrb[38].mxu1 %vm79_vm1, %v3418_v28 }
0x2c1d   :  { %6874 = vmatpush3.bf16.msra.mxu1 %v7628_v17  ;;  %6445 = vmatprep.mubr.msk.f32.mxu1 %vm7259_vm0, %v7260_v1 }
0x2c1e   :  { %6875 = vmatprep.subr.bf16.mxu1 %v7258_v0 }
0x2c21   :  { %6877 = vmatpush3.bf16.msra.mxu1 %v7632_v3 }
0x2c22   :  { %6878 = vmatprep.subr.bf16.mxu1 %v7258_v0 }
0x2c25   :  { %6880 = vmatpush3.bf16.msra.mxu1 %v7636_v22 }
0x2c26   :  { %6881 = vmatprep.subr.bf16.mxu1 %v7258_v0 }
0x2c29   :  { %6883 = vmatpush3.bf16.msra.mxu1 %v7643_v26 }
0x2c2a   :  { %6464 = vmatprep.subr.mxu1 %v7260_v1 }
0x2ce7   :  { %v3571_v58 = vpop.f32.mrb[36].mxu1 }
0x2ce8   :  { %v6395_v36 = vpop.f32.mrb[37].mxu1  ;;  %6405 = vmatmul.mubr.msk.f32.vlgmr.msra.gmra.mrb[42].mxu0 %vm79_vm1, %v3571_v58 }
0x2ce9   :  { %6868 = vmatpush3.bf16.msra.mxu0 %v7754_v44  ;;  %6426 = vmatprep.mubr.msk.f32.mxu0 %vm7259_vm0, %v7260_v1 }
0x2cea   :  { %6869 = vmatprep.subr.bf16.mxu0 %v7258_v0 }
0x2ced   :  { %6871 = vmatpush3.bf16.msra.mxu0 %v7757_v43 }
0x2cee   :  { %6884 = vmatprep.subr.bf16.mxu0 %v7258_v0 }
0x2cef   :  { %v3714_v59 = vpop.f32.mrb[38].mxu1 }
0x2cf0   :  { %v6417_v18 = vpop.f32.mrb[39].mxu1 }
0x2dbb   :  { %v3644_v41 = vpop.f32.mrb[42].mxu0 }
0x2dbc   :  { %v3715_v46 = vadd.f32 %v3714_v59, %v3644_v41  ;;  %v6406_v49 = vpop.f32.mrb[43].mxu0 }
0x2dbe   :  { %v3718_v51 = vadd.f32 %v3715_v46, %v7763_v39 }
0x2dc0   :  { %7120 = vtanh.f32 %v3718_v51 }
0x2dca   :  { %v7121_v42 = vpop.eup %7120 }
0x2dcb   :  { %6427 = vmatmul.mubr.msk.f32.vlgmr.msra.gmra.mrb[44].mxu0 %vm79_vm1, %v7121_v42 }
0x2dcc   :  { %6886 = vmatpush3.bf16.msra.mxu0 %v7619_v50  ;;  %6456 = vmatprep.mubr.msk.f32.mxu0 %vm7259_vm0, %v7260_v1 }
0x2dcd   :  { %6887 = vmatprep.subr.bf16.mxu0 %v7258_v0 }
0x2dd0   :  { %6889 = vmatpush3.bf16.msra.mxu0 %v7622_v52 }
0x2dd1   :  { %6459 = vmatprep.subr.mxu0 %v7260_v1 }
0x2dd3   :  { %6457 = vmatmul.mubr.msk.f32.vlgmr.msra.gmra.mrb[46].mxu0 %vm79_vm1, %v3418_v28 }
0x2dd4   :  { %6461 = vmatprep.mubr.msk.f32.mxu0 %vm7259_vm0, %v7260_v1 }
0x2dd9   :  { %6460 = vmatpush3.xpose.msk.msra.mxu0 %vm79_vm1, %v7686_v37 }
0x2dda   :  { %6890 = vmatprep.subr.bf16.mxu0 %v7258_v0 }
0x2e9e   :  { %v3789_v23 = vpop.f32.mrb[44].mxu0 }
0x2e9f   :  { %v7947_v25 = vadd.f32 %v3789_v23, %v7782_v60  ;;  %v6428_v63 = vpop.f32.mrb[45].mxu0 }
0x2ea1   :  { %v3793_v4 = vsel %vm2635_vm13, %v7947_v25, -inf }
0x2ea2   :  { %3794 = vmax.xlane.f32.xlu0 %v3793_v4 }
0x2ea6   :  { %v3965_v5 = vpop.f32.mrb[46].mxu0 }
0x2ea7   :  { %v6458_v8 = vpop.f32.mrb[47].mxu0  ;;  %v3966_v15 = vadd.f32 %v3965_v5, %v7694_v2 }
0x2f2f   :  { %v7951_v9 = vpop.xlane.xlu0 %3794 }
0x2f30   :  { %vm3796_vm9 = vcmp.ge.f32.partialorder %v7947_v25, %v7951_v9 }
0x2f31   :  { %v3797_v32 = vsel %vm3796_vm9, %v7640_v7, 64 }
0x2f32   :  { %v3798_v38 = vsel %vm2635_vm13, %v3797_v32, 2147483647 }
0x2f33   :  { %v3800_v13 = vshra.s32 %v3798_v38, 16  ;;  %v3799_v16 = vand.u32 65535, %v3798_v38 }
0x2f35   :  { %v3802_v14 = vcvt.s32.f32 %v3800_v13  ;;  %v3801_v20 = vcvt.s32.f32 %v3799_v16 }
0x2f37   :  { %3803 = vmin.xlane.f32.xlu0 %v3802_v14 }
0x2f4d   :  { %3977 = vrot.lane.b32.xlu0 %v3966_v15, %s7261_s0 }
0x2fc4   :  { %v3804_v19 = vpop.xlane.xlu0 %3803 }
0x2fc5   :  { %vm3805_vm10 = vcmp.eq.f32.partialorder %v3802_v14, %v3804_v19  ;;  %v3810_v24 = vcvt.f32.s32 %v3804_v19 }
0x2fc6   :  { %v3806_v21 = vsel %vm3805_vm10, %v3801_v20, inf }
0x2fc7   :  { %3807 = vmin.xlane.f32.xlu1 %v3806_v21  ;;  %v3811_v45 = vshll.u32 %v3810_v24, 16 }
0x2fc8   :  { %v3978_v36 = vpop.permute.xlu0 %3977 }
0x3054   :  { %v3808_v28 = vpop.xlane.xlu1 %3807 }
0x3055   :  { %v3809_v29 = vcvt.f32.s32 %v3808_v28 }
0x3057   :  { %v3812_v30 = vadd.s32 %v3811_v45, %v3809_v29 }
0x3059   :  { %v7963_v31 = vsel %vm3820_vm14, %v3812_v30, %v7881_v12  ;;  %vm3823_vm15 = vcmp.eq.s32.totalorder %v7640_v7, %v3812_v30 }
0x305a   :  { %v5662_v34 = vsel %vm3823_vm15, 1.0, %v7260_v1  ;;  %vm4978_vm15 = vcmp.eq.s32.totalorder %v7640_v7, 4 }
0x305b   :  { %6446 = vmatmul.mubr.msk.f32.vlgmr.msra.gmra.mrb[40].mxu1 %vm2067_vm3, %v5662_v34 }
0x305c   :  { %6465 = vmatpush3.msra.mxu1 %v7686_v37  ;;  %6466 = vmatprep.mubr.msk.f32.mxu1 %vm7259_vm0, %v7260_v1 }
0x305d   :  { %6896 = vmatprep.subr.bf16.mxu1 %v7258_v0 }
0x312e   :  { %v3895_v35 = vpop.f32.mrb[40].mxu1 }
0x312f   :  { %v3896_v61 = vadd.f32 %v3895_v35, %v7699_v40  ;;  %v6447_v10 = vpop.f32.mrb[41].mxu1 }
0x3131   :  { %v3969_v53 = vadd.f32 %v3966_v15, %v3896_v61 }
0x3133   :  { %v5665_v12 = vmul.f32 -1.442695, %v3969_v53 }
0x3135   :  { %7122 = vpow2.f32 %v5665_v12 }
0x313f   :  { %v7123_v48 = vpop.eup %7122 }
0x3140   :  { %v3973_v57 = vadd.f32 1.0, %v7123_v48 }
0x3142   :  { %7124 = vrcp.f32 %v3973_v57 }
0x314c   :  { %v7125_v58 = vpop.eup %7124 }
0x314d   :  { %v3980_v59 = vmul.f32 %v7125_v58, %v3978_v36  ;;  %v3987_v49 = vsub.f32 1.0, %v7125_v58  ;;  %v3993_v42 = vmul.f32 %v7125_v58, %v7894_v55 }
0x314f   :  { %3982 = vrot.lane.b32.xlu1 %v3980_v59, %s7261_s0 }
0x31c1   :  { %v3983_v18 = vpop.permute.xlu1 %3982 }
0x31c2   :  { %v3985_v41 = vadd.f32 %v3983_v18, %v3896_v61 }
0x31c4   :  { %7126 = vtanh.f32 %v3985_v41 }
0x31ce   :  { %v7127_v46 = vpop.eup %7126 }
0x31cf   :  { %3989 = vrot.lane.b32.xlu1 %v7127_v46, %s7262_s27 }
0x3241   :  { %v3990_v51 = vpop.permute.xlu1 %3989 }
0x3242   :  { %v3992_v23 = vmul.f32 %v3990_v51, %v3987_v49 }
0x3244   :  { %v7976_v63 = vadd.f32 %v3993_v42, %v3992_v23 }
0x3246   :  { %3996 = vrot.lane.b32.xlu0 %v7976_v63, %s7262_s27 }
0x32b8   :  { %v3997_v4 = vpop.permute.xlu0 %3996 }
0x32b9   :  { %6462 = vmatmul.mubr.msk.f32.vlgmr.msra.gmra.mrb[48].mxu0 %vm79_vm1, %v3997_v4 }
0x32ba   :  { %6892 = vmatpush3.bf16.msra.mxu0 %v7720_v47  ;;  %6477 = vmatprep.mubr.msk.f32.mxu0 %vm7259_vm0, %v7260_v1 }
0x32bb   :  { %6893 = vmatprep.subr.bf16.mxu0 %v7258_v0 }
0x32be   :  { %6895 = vmatpush3.bf16.msra.mxu0 %v7723_v11 }
0x32bf   :  { %6902 = vmatprep.subr.bf16.mxu0 %v7258_v0 }
0x338c   :  { %v4066_v55 = vpop.f32.mrb[48].mxu0 }
0x338d   :  { %v6463_v5 = vpop.f32.mrb[49].mxu0  ;;  %v4070_v8 = vsel %vm2326_vm11, %v4066_v55, -inf }
0x338e   :  { %4071 = vmax.xlane.f32.xlu1 %v4070_v8 }
0x341b   :  { %v4072_v32 = vpop.xlane.xlu1 %4071 }
0x341c   :  { %v4073_v38 = vsub.f32 %v4066_v55, %v4072_v32 }
0x341e   :  { %v4074_v13 = vmul.f32 1.442695, %v4073_v38 }
0x3420   :  { %7128 = vpow2.f32 %v4074_v13 }
0x342a   :  { %v7129_v14 = vpop.eup %7128 }
0x342b   :  { %v4076_v15 = vsel %vm2326_vm11, %v7129_v14, 0.0 }
0x342c   :  { %4077 = vadd.xlane.f32.xlu0 %v4076_v15 }
0x34b9   :  { %v4078_v16 = vpop.xlane.xlu0 %4077 }
0x34ba   :  { %7130 = vrcp.f32 %v4078_v16 }
0x34c4   :  { %v7131_v19 = vpop.eup %7130 }
0x34c5   :  { %v4080_v20 = vmul.f32 %v7131_v19, %v7129_v14 }
0x34c7   :  { %6467 = vmatmul.mubr.msk.f32.vlgmr.msra.gmra.mrb[42].mxu1 %vm2339_vm12, %v4080_v20 }
0x34c8   :  { %6898 = vmatpush3.bf16.msra.mxu1 %v7728_v33  ;;  %6488 = vmatprep.mubr.msk.f32.mxu1 %vm7259_vm0, %v7260_v1 }
0x34c9   :  { %6899 = vmatprep.subr.bf16.mxu1 %v7258_v0 }
0x34cc   :  { %6901 = vmatpush3.bf16.msra.mxu1 %v7732_v54 }
0x34cd   :  { %6908 = vmatprep.subr.bf16.mxu1 %v7258_v0 }
0x34cf   :  { %6489 = vmatmul.mubr.msk.f32.vlgmr.msra.gmra.mrb[44].mxu1 %vm79_vm1, %v3997_v4 }
0x34d0   :  { %6910 = vmatpush3.bf16.msra.mxu1 %v7628_v17  ;;  %6518 = vmatprep.mubr.msk.f32.mxu1 %vm7259_vm0, %v7260_v1 }
0x34d1   :  { %6911 = vmatprep.subr.bf16.mxu1 %v7258_v0 }
0x34d4   :  { %6913 = vmatpush3.bf16.msra.mxu1 %v7632_v3 }
0x34d5   :  { %6914 = vmatprep.subr.bf16.mxu1 %v7258_v0 }
0x34d8   :  { %6916 = vmatpush3.bf16.msra.mxu1 %v7636_v22 }
0x34d9   :  { %6917 = vmatprep.subr.bf16.mxu1 %v7258_v0 }
0x34dc   :  { %6919 = vmatpush3.bf16.msra.mxu1 %v7643_v26 }
0x34dd   :  { %6537 = vmatprep.subr.mxu1 %v7260_v1 }
0x359a   :  { %v4150_v21 = vpop.f32.mrb[42].mxu1 }
0x359b   :  { %v6468_v24 = vpop.f32.mrb[43].mxu1  ;;  %6478 = vmatmul.mubr.msk.f32.vlgmr.msra.gmra.mrb[50].mxu0 %vm79_vm1, %v4150_v21 }
0x359c   :  { %6904 = vmatpush3.bf16.msra.mxu0 %v7754_v44  ;;  %6499 = vmatprep.mubr.msk.f32.mxu0 %vm7259_vm0, %v7260_v1 }
0x359d   :  { %6905 = vmatprep.subr.bf16.mxu0 %v7258_v0 }
0x35a0   :  { %6907 = vmatpush3.bf16.msra.mxu0 %v7757_v43 }
0x35a1   :  { %6920 = vmatprep.subr.bf16.mxu0 %v7258_v0 }
0x35a2   :  { %v4293_v28 = vpop.f32.mrb[44].mxu1 }
0x35a3   :  { %v6490_v45 = vpop.f32.mrb[45].mxu1 }
0x366e   :  { %v4223_v29 = vpop.f32.mrb[50].mxu0 }
0x366f   :  { %v4294_v30 = vadd.f32 %v4293_v28, %v4223_v29  ;;  %v6479_v34 = vpop.f32.mrb[51].mxu0 }
0x3671   :  { %v4297_v35 = vadd.f32 %v4294_v30, %v7763_v39 }
0x3673   :  { %7132 = vtanh.f32 %v4297_v35 }
0x367d   :  { %v7133_v61 = vpop.eup %7132 }
0x367e   :  { %6500 = vmatmul.mubr.msk.f32.vlgmr.msra.gmra.mrb[52].mxu0 %vm79_vm1, %v7133_v61 }
0x367f   :  { %6922 = vmatpush3.bf16.msra.mxu0 %v7619_v50  ;;  %6529 = vmatprep.mubr.msk.f32.mxu0 %vm7259_vm0, %v7260_v1 }
0x3680   :  { %6923 = vmatprep.subr.bf16.mxu0 %v7258_v0 }
0x3683   :  { %6925 = vmatpush3.bf16.msra.mxu0 %v7622_v52 }
0x3684   :  { %6532 = vmatprep.subr.mxu0 %v7260_v1 }
0x3686   :  { %6530 = vmatmul.mubr.msk.f32.vlgmr.msra.gmra.mrb[54].mxu0 %vm79_vm1, %v3997_v4 }
0x3687   :  { %6534 = vmatprep.mubr.msk.f32.mxu0 %vm7259_vm0, %v7260_v1 }
0x368c   :  { %6533 = vmatpush3.xpose.msk.msra.mxu0 %vm79_vm1, %v7686_v37 }
0x368d   :  { %6926 = vmatprep.subr.bf16.mxu0 %v7258_v0 }
0x3751   :  { %v4368_v10 = vpop.f32.mrb[52].mxu0 }
0x3752   :  { %v8029_v53 = vadd.f32 %v4368_v10, %v7782_v60  ;;  %v6501_v12 = vpop.f32.mrb[53].mxu0 }
0x3754   :  { %v4372_v48 = vsel %vm2635_vm13, %v8029_v53, -inf }
0x3755   :  { %4373 = vmax.xlane.f32.xlu0 %v4372_v48 }
0x3759   :  { %v4544_v57 = vpop.f32.mrb[54].mxu0 }
0x375a   :  { %v6531_v58 = vpop.f32.mrb[55].mxu0  ;;  %v4545_v49 = vadd.f32 %v4544_v57, %v7694_v2 }
0x37e2   :  { %v8033_v36 = vpop.xlane.xlu0 %4373 }
0x37e3   :  { %vm4375_vm4 = vcmp.ge.f32.partialorder %v8029_v53, %v8033_v36 }
0x37e4   :  { %v4376_v59 = vsel %vm4375_vm4, %v7640_v7, 64 }
0x37e5   :  { %v4377_v18 = vsel %vm2635_vm13, %v4376_v59, 2147483647 }
0x37e6   :  { %v4379_v41 = vshra.s32 %v4377_v18, 16  ;;  %v4378_v51 = vand.u32 65535, %v4377_v18 }
0x37e8   :  { %v4381_v46 = vcvt.s32.f32 %v4379_v41  ;;  %v4380_v23 = vcvt.s32.f32 %v4378_v51 }
0x37ea   :  { %4382 = vmin.xlane.f32.xlu1 %v4381_v46 }
0x37fb   :  { %4556 = vrot.lane.b32.xlu1 %v4545_v49, %s7261_s0 }
0x3877   :  { %v4383_v42 = vpop.xlane.xlu1 %4382 }
0x3878   :  { %vm4384_vm5 = vcmp.eq.f32.partialorder %v4381_v46, %v4383_v42  ;;  %v4389_v55 = vcvt.f32.s32 %v4383_v42 }
0x3879   :  { %v4385_v4 = vsel %vm4384_vm5, %v4380_v23, inf }
0x387a   :  { %4386 = vmin.xlane.f32.xlu0 %v4385_v4  ;;  %v4390_v8 = vshll.u32 %v4389_v55, 16 }
0x387b   :  { %v4557_v45 = vpop.permute.xlu1 %4556 }
0x3907   :  { %v4387_v5 = vpop.xlane.xlu0 %4386 }
0x3908   :  { %v4388_v32 = vcvt.f32.s32 %v4387_v5 }
0x390a   :  { %v4391_v38 = vadd.s32 %v4390_v8, %v4388_v32 }
0x390c   :  { %v8045_v13 = vsel %vm4399_vm6, %v4391_v38, %v7963_v31  ;;  %vm4402_vm8 = vcmp.eq.s32.totalorder %v7640_v7, %v4391_v38 }
0x390d   :  { %v5672_v14 = vsel %vm4402_vm8, 1.0, %v7260_v1 }
0x390e   :  { %6519 = vmatmul.mubr.msk.f32.vlgmr.msra.gmra.mrb[46].mxu1 %vm2067_vm3, %v5672_v14 }
0x390f   :  { %6538 = vmatpush3.msra.mxu1 %v7686_v37  ;;  %6539 = vmatprep.mubr.msk.f32.mxu1 %vm7259_vm0, %v7260_v1 }
0x3910   :  { %6932 = vmatprep.subr.bf16.mxu1 %v7258_v0 }
0x39e1   :  { %v4474_v15 = vpop.f32.mrb[46].mxu1 }
0x39e2   :  { %v4475_v16 = vadd.f32 %v4474_v15, %v7699_v40  ;;  %v6520_v19 = vpop.f32.mrb[47].mxu1 }
0x39e4   :  { %v4548_v20 = vadd.f32 %v4545_v49, %v4475_v16 }
0x39e6   :  { %v5675_v31 = vmul.f32 -1.442695, %v4548_v20 }
0x39e8   :  { %7134 = vpow2.f32 %v5675_v31 }
0x39f2   :  { %v7135_v21 = vpop.eup %7134 }
0x39f3   :  { %v4552_v24 = vadd.f32 1.0, %v7135_v21 }
0x39f5   :  { %7136 = vrcp.f32 %v4552_v24 }
0x39ff   :  { %v7137_v28 = vpop.eup %7136 }
0x3a00   :  { %v4559_v29 = vmul.f32 %v7137_v28, %v4557_v45  ;;  %v4566_v61 = vsub.f32 1.0, %v7137_v28  ;;  %v4572_v12 = vmul.f32 %v7137_v28, %v7976_v63 }
0x3a02   :  { %4561 = vrot.lane.b32.xlu0 %v4559_v29, %s7261_s0 }
0x3a74   :  { %v4562_v30 = vpop.permute.xlu0 %4561 }
0x3a75   :  { %v4564_v34 = vadd.f32 %v4562_v30, %v4475_v16 }
0x3a77   :  { %7138 = vtanh.f32 %v4564_v34 }
0x3a81   :  { %v7139_v35 = vpop.eup %7138 }
0x3a82   :  { %4568 = vrot.lane.b32.xlu1 %v7139_v35, %s7262_s27 }
0x3af4   :  { %v4569_v10 = vpop.permute.xlu1 %4568 }
0x3af5   :  { %v4571_v48 = vmul.f32 %v4569_v10, %v4566_v61 }
0x3af7   :  { %v8058_v57 = vadd.f32 %v4572_v12, %v4571_v48 }
0x3af9   :  { %4575 = vrot.lane.b32.xlu1 %v8058_v57, %s7262_s27 }
0x3b6b   :  { %v4576_v58 = vpop.permute.xlu1 %4575 }
0x3b6c   :  { %6535 = vmatmul.mubr.msk.f32.vlgmr.msra.gmra.mrb[56].mxu0 %vm79_vm1, %v4576_v58 }
0x3b6d   :  { %6928 = vmatpush3.bf16.msra.mxu0 %v7720_v47  ;;  %6550 = vmatprep.mubr.msk.f32.mxu0 %vm7259_vm0, %v7260_v1 }
0x3b6e   :  { %6929 = vmatprep.subr.bf16.mxu0 %v7258_v0 }
0x3b71   :  { %6931 = vmatpush3.bf16.msra.mxu0 %v7723_v11 }
0x3b72   :  { %6938 = vmatprep.subr.bf16.mxu0 %v7258_v0 }
0x3c3f   :  { %v4645_v63 = vpop.f32.mrb[56].mxu0 }
0x3c40   :  { %v6536_v59 = vpop.f32.mrb[57].mxu0  ;;  %v4649_v18 = vsel %vm2326_vm11, %v4645_v63, -inf }
0x3c41   :  { %4650 = vmax.xlane.f32.xlu0 %v4649_v18 }
0x3cce   :  { %v4651_v41 = vpop.xlane.xlu0 %4650 }
0x3ccf   :  { %v4652_v46 = vsub.f32 %v4645_v63, %v4651_v41 }
0x3cd1   :  { %v4653_v49 = vmul.f32 1.442695, %v4652_v46 }
0x3cd3   :  { %7140 = vpow2.f32 %v4653_v49 }
0x3cdd   :  { %v7141_v51 = vpop.eup %7140 }
0x3cde   :  { %v4655_v42 = vsel %vm2326_vm11, %v7141_v51, 0.0 }
0x3cdf   :  { %4656 = vadd.xlane.f32.xlu1 %v4655_v42 }
0x3d6c   :  { %v4657_v23 = vpop.xlane.xlu1 %4656 }
0x3d6d   :  { %7142 = vrcp.f32 %v4657_v23 }
0x3d77   :  { %v7143_v4 = vpop.eup %7142 }
0x3d78   :  { %v4659_v55 = vmul.f32 %v7143_v4, %v7141_v51 }
0x3d7a   :  { %6540 = vmatmul.mubr.msk.f32.vlgmr.msra.gmra.mrb[48].mxu1 %vm2339_vm12, %v4659_v55 }
0x3d7b   :  { %6934 = vmatpush3.bf16.msra.mxu1 %v7728_v33  ;;  %6561 = vmatprep.mubr.msk.f32.mxu1 %vm7259_vm0, %v7260_v1 }
0x3d7c   :  { %6935 = vmatprep.subr.bf16.mxu1 %v7258_v0 }
0x3d7f   :  { %6937 = vmatpush3.bf16.msra.mxu1 %v7732_v54 }
0x3d80   :  { %6944 = vmatprep.subr.bf16.mxu1 %v7258_v0 }
0x3d82   :  { %6562 = vmatmul.mubr.msk.f32.vlgmr.msra.gmra.mrb[50].mxu1 %vm79_vm1, %v4576_v58 }
0x3d83   :  { %6946 = vmatpush3.bf16.msra.mxu1 %v7628_v17  ;;  %6591 = vmatprep.mubr.msk.f32.mxu1 %vm7259_vm0, %v7260_v1 }
0x3d84   :  { %6947 = vmatprep.subr.bf16.mxu1 %v7258_v0 }
0x3d87   :  { %6949 = vmatpush3.bf16.msra.mxu1 %v7632_v3 }
0x3d88   :  { %6950 = vmatprep.subr.bf16.mxu1 %v7258_v0 }
0x3d8b   :  { %6952 = vmatpush3.bf16.msra.mxu1 %v7636_v22 }
0x3d8c   :  { %6953 = vmatprep.subr.bf16.mxu1 %v7258_v0 }
0x3d8f   :  { %6955 = vmatpush3.bf16.msra.mxu1 %v7643_v26 }
0x3d90   :  { %6610 = vmatprep.subr.mxu1 %v7260_v1 }
0x3e4d   :  { %v4729_v5 = vpop.f32.mrb[48].mxu1 }
0x3e4e   :  { %v6541_v8 = vpop.f32.mrb[49].mxu1  ;;  %6551 = vmatmul.mubr.msk.f32.vlgmr.msra.gmra.mrb[58].mxu0 %vm79_vm1, %v4729_v5 }
0x3e4f   :  { %6940 = vmatpush3.bf16.msra.mxu0 %v7754_v44  ;;  %6572 = vmatprep.mubr.msk.f32.mxu0 %vm7259_vm0, %v7260_v1 }
0x3e50   :  { %6941 = vmatprep.subr.bf16.mxu0 %v7258_v0 }
0x3e53   :  { %6943 = vmatpush3.bf16.msra.mxu0 %v7757_v43 }
0x3e54   :  { %6956 = vmatprep.subr.bf16.mxu0 %v7258_v0 }
0x3e55   :  { %v4872_v17 = vpop.f32.mrb[50].mxu1 }
0x3e56   :  { %v6563_v3 = vpop.f32.mrb[51].mxu1 }
0x3f21   :  { %v4802_v22 = vpop.f32.mrb[58].mxu0 }
0x3f22   :  { %v4873_v26 = vadd.f32 %v4872_v17, %v4802_v22  ;;  %v6552_v32 = vpop.f32.mrb[59].mxu0 }
0x3f24   :  { %v4876_v38 = vadd.f32 %v4873_v26, %v7763_v39 }
0x3f26   :  { %7144 = vtanh.f32 %v4876_v38 }
0x3f30   :  { %v7145_v14 = vpop.eup %7144 }
0x3f31   :  { %6573 = vmatmul.mubr.msk.f32.vlgmr.msra.gmra.mrb[60].mxu0 %vm79_vm1, %v7145_v14 }
0x3f32   :  { %6958 = vmatpush3.bf16.msra.mxu0 %v7619_v50  ;;  %6602 = vmatprep.mubr.msk.f32.mxu0 %vm7259_vm0, %v7260_v1 }
0x3f33   :  { %6959 = vmatprep.subr.bf16.mxu0 %v7258_v0 }
0x3f36   :  { %6961 = vmatpush3.bf16.msra.mxu0 %v7622_v52 }
0x3f37   :  { %6605 = vmatprep.subr.mxu0 %v7260_v1 }
0x3f39   :  { %6603 = vmatmul.mubr.msk.f32.vlgmr.msra.gmra.mrb[62].mxu0 %vm79_vm1, %v4576_v58 }
0x3f3a   :  { %6607 = vmatprep.mubr.msk.f32.mxu0 %vm7259_vm0, %v7260_v1 }
0x3f3f   :  { %6606 = vmatpush3.xpose.msk.msra.mxu0 %vm79_vm1, %v7686_v37 }
0x3f40   :  { %6962 = vmatprep.subr.bf16.mxu0 %v7258_v0 }
0x4004   :  { %v4947_v50 = vpop.f32.mrb[60].mxu0 }
0x4005   :  { %v8111_v15 = vadd.f32 %v4947_v50, %v7782_v60  ;;  %v6574_v16 = vpop.f32.mrb[61].mxu0 }
0x4007   :  { %v4951_v52 = vsel %vm2635_vm13, %v8111_v15, -inf }
0x4008   :  { %4952 = vmax.xlane.f32.xlu0 %v4951_v52 }
0x400c   :  { %v5123_v19 = vpop.f32.mrb[62].mxu0 }
0x400d   :  { %v6604_v20 = vpop.f32.mrb[63].mxu0  ;;  %v5124_v29 = vadd.f32 %v5123_v19, %v7694_v2 }
0x4095   :  { %v8115_v31 = vpop.xlane.xlu0 %4952 }
0x4096   :  { %vm4954_vm9 = vcmp.ge.f32.partialorder %v8111_v15, %v8115_v31 }
0x4097   :  { %v4955_v21 = vsel %vm4954_vm9, %v7640_v7, 64 }
0x4098   :  { %v4956_v24 = vsel %vm2635_vm13, %v4955_v21, 2147483647 }
0x4099   :  { %v4958_v28 = vshra.s32 %v4956_v24, 16  ;;  %v4957_v30 = vand.u32 65535, %v4956_v24 }
0x409b   :  { %v4960_v45 = vcvt.s32.f32 %v4958_v28  ;;  %v4959_v35 = vcvt.s32.f32 %v4957_v30 }
0x409d   :  { %4961 = vmin.xlane.f32.xlu0 %v4960_v45 }
0x40b3   :  { %5135 = vrot.lane.b32.xlu0 %v5124_v29, %s7261_s0 }
0x412a   :  { %v4962_v34 = vpop.xlane.xlu0 %4961 }
0x412b   :  { %vm4963_vm10 = vcmp.eq.f32.partialorder %v4960_v45, %v4962_v34  ;;  %v4968_v10 = vcvt.f32.s32 %v4962_v34 }
0x412c   :  { %v4964_v61 = vsel %vm4963_vm10, %v4959_v35, inf }
0x412d   :  { %4965 = vmin.xlane.f32.xlu1 %v4964_v61  ;;  %v4969_v48 = vshll.u32 %v4968_v10, 16 }
0x412e   :  { %v5136_v4 = vpop.permute.xlu0 %5135 }
0x41ba   :  { %v4966_v12 = vpop.xlane.xlu1 %4965 }
0x41bb   :  { %v4967_v58 = vcvt.f32.s32 %v4966_v12 }
0x41bd   :  { %v4970_v63 = vadd.s32 %v4969_v48, %v4967_v58 }
0x41bf   :  { %vm4981_vm4 = vcmp.eq.s32.totalorder %v7640_v7, %v4970_v63  ;;  %v8128_v2 = vsel %vm4978_vm15, %v4970_v63, %v8045_v13 }
0x41c0   :  { %v5682_v59 = vsel %vm4981_vm4, 1.0, %v7260_v1 }
0x41c1   :  { %6592 = vmatmul.mubr.msk.f32.vlgmr.msra.gmra.mrb[52].mxu1 %vm2067_vm3, %v5682_v59  ;;  %v4392_v59 = vsub.f32 %v8029_v53, %v8033_v36  ;;  %vm5557_vm3 = vcmp.eq.s32.totalorder %v7640_v7, 5 }
0x41c2   :  { %6611 = vmatpush3.msra.mxu1 %v7686_v37  ;;  %6612 = vmatprep.mubr.msk.f32.mxu1 %vm7259_vm0, %v7260_v1 }
0x41c3   :  { %6968 = vmatprep.subr.bf16.mxu1 %v7258_v0 }
0x4294   :  { %v5053_v18 = vpop.f32.mrb[52].mxu1 }
0x4295   :  { %v5054_v41 = vadd.f32 %v5053_v18, %v7699_v40  ;;  %v6593_v46 = vpop.f32.mrb[53].mxu1  ;;  %v4393_v18 = vmul.f32 1.442695, %v4392_v59 }
0x4297   :  { %v5127_v49 = vadd.f32 %v5124_v29, %v5054_v41 }
0x4299   :  { %v5685_v51 = vmul.f32 -1.442695, %v5127_v49 }
0x429b   :  { %7146 = vpow2.f32 %v5685_v51 }
0x42a5   :  { %v7147_v13 = vpop.eup %7146 }
0x42a6   :  { %v5131_v42 = vadd.f32 1.0, %v7147_v13 }
0x42a8   :  { %7148 = vrcp.f32 %v5131_v42 }
0x42b2   :  { %v7149_v23 = vpop.eup %7148 }
0x42b3   :  { %v5138_v55 = vmul.f32 %v7149_v23, %v5136_v4  ;;  %v5145_v17 = vsub.f32 1.0, %v7149_v23  ;;  %v5151_v3 = vmul.f32 %v7149_v23, %v8058_v57 }
0x42b5   :  { %5140 = vrot.lane.b32.xlu1 %v5138_v55, %s7261_s0 }
0x4327   :  { %v5141_v37 = vpop.permute.xlu1 %5140 }
0x4328   :  { %v5143_v5 = vadd.f32 %v5141_v37, %v5054_v41 }
0x432a   :  { %7150 = vtanh.f32 %v5143_v5 }
0x4334   :  { %v7151_v8 = vpop.eup %7150 }
0x4335   :  { %5147 = vrot.lane.b32.xlu1 %v7151_v8, %s7262_s27 }
0x43a7   :  { %v5148_v40 = vpop.permute.xlu1 %5147 }
0x43a8   :  { %v5150_v22 = vmul.f32 %v5148_v40, %v5145_v17 }
0x43aa   :  { %v5152_v26 = vadd.f32 %v5151_v3, %v5150_v22 }
0x43ac   :  { %5154 = vrot.lane.b32.xlu0 %v5152_v26, %s7262_s27 }
0x441e   :  { %v5155_v32 = vpop.permute.xlu0 %5154 }
0x441f   :  { %6608 = vmatmul.mubr.msk.f32.vlgmr.msra.gmra.mrb[64].mxu0 %vm79_vm1, %v5155_v32 }
0x4420   :  { %6964 = vmatpush3.bf16.msra.mxu0 %v7720_v47  ;;  %6623 = vmatprep.mubr.msk.f32.mxu0 %vm7259_vm0, %v7260_v1 }
0x4421   :  { %6965 = vmatprep.subr.bf16.mxu0 %v7258_v0 }
0x4424   :  { %6967 = vmatpush3.bf16.msra.mxu0 %v7723_v11 }
0x4425   :  { %6974 = vmatprep.subr.bf16.mxu0 %v7258_v0 }
0x44f2   :  { %v5224_v38 = vpop.f32.mrb[64].mxu0 }
0x44f3   :  { %v6609_v57 = vpop.f32.mrb[65].mxu0  ;;  %v5228_v14 = vsel %vm2326_vm11, %v5224_v38, -inf }
0x44f4   :  { %5229 = vmax.xlane.f32.xlu1 %v5228_v14 }
0x4581   :  { %v5230_v50 = vpop.xlane.xlu1 %5229 }
0x4582   :  { %v5231_v16 = vsub.f32 %v5224_v38, %v5230_v50 }
0x4584   :  { %v5232_v52 = vmul.f32 1.442695, %v5231_v16 }
0x4586   :  { %7152 = vpow2.f32 %v5232_v52 }
0x4590   :  { %v7153_v19 = vpop.eup %7152 }
0x4591   :  { %v5234_v47 = vsel %vm2326_vm11, %v7153_v19, 0.0  ;;  %vm5560_vm11 = vcmask 40960  }
0x4592   :  { %5235 = vadd.xlane.f32.xlu0 %v5234_v47 }
0x461f   :  { %v5236_v20 = vpop.xlane.xlu0 %5235 }
0x4620   :  { %7154 = vrcp.f32 %v5236_v20 }
0x462a   :  { %v7155_v21 = vpop.eup %7154 }
0x462b   :  { %v5238_v24 = vmul.f32 %v7155_v21, %v7153_v19 }
0x462d   :  { %6613 = vmatmul.mubr.msk.f32.vlgmr.msra.gmra.mrb[54].mxu1 %vm2339_vm12, %v5238_v24 }
0x462e   :  { %6970 = vmatpush3.bf16.msra.mxu1 %v7728_v33  ;;  %6634 = vmatprep.mubr.msk.f32.mxu1 %vm7259_vm0, %v7260_v1 }
0x462f   :  { %6971 = vmatprep.subr.bf16.mxu1 %v7258_v0 }
0x4632   :  { %6973 = vmatpush3.bf16.msra.mxu1 %v7732_v54 }
0x4635   :  { %6635 = vmatmul.mubr.msk.f32.vlgmr.msra.gmra.mrb[56].mxu1 %vm79_vm1, %v5155_v32 }
0x4700   :  { %v5308_v11 = vpop.f32.mrb[54].mxu1 }
0x4701   :  { %v6614_v28 = vpop.f32.mrb[55].mxu1  ;;  %6624 = vmatmul.mubr.msk.f32.vlgmr.msra.gmra.mrb[66].mxu0 %vm79_vm1, %v5308_v11 }
0x4702   :  { %6976 = vmatpush3.bf16.msra.mxu0 %v7754_v44  ;;  %6645 = vmatprep.mubr.msk.f32.mxu0 %vm7259_vm0, %v7260_v1  ;;  %v2656_v44 = vsub.f32 %v7785_v62, %v7789_v6 }
0x4703   :  { %6977 = vmatprep.subr.bf16.mxu0 %v7258_v0  ;;  %v3813_v0 = vsub.f32 %v7947_v25, %v7951_v9 }
0x4704   :  { %v2657_v61 = vmul.f32 1.442695, %v2656_v44 }
0x4705   :  { %v3814_v1 = vmul.f32 1.442695, %v3813_v0 }
0x4706   :  { %6979 = vmatpush3.bf16.msra.mxu0 %v7757_v43  ;;  %v4971_v43 = vsub.f32 %v8111_v15, %v8115_v31 }
0x4708   :  { %v5451_v33 = vpop.f32.mrb[56].mxu1  ;;  %v4972_v10 = vmul.f32 1.442695, %v4971_v43 }
0x4709   :  { %v6636_v45 = vpop.f32.mrb[57].mxu1 }
0x47d4   :  { %v5381_v29 = vpop.f32.mrb[66].mxu0 }
0x47d5   :  { %v5452_v30 = vadd.f32 %v5451_v33, %v5381_v29  ;;  %v6625_v54 = vpop.f32.mrb[67].mxu0 }
0x47d7   :  { %v5455_v34 = vadd.f32 %v5452_v30, %v7763_v39 }
0x47d9   :  { %7156 = vtanh.f32 %v5455_v34 }
0x47da   :  { %7158 = vpow2.f32 %v2657_v61 }
0x47db   :  { %7160 = vpow2.f32 %v3814_v1 }
0x47dc   :  { %7162 = vpow2.f32 %v4972_v10 }
0x47e3   :  { %v7157_v35 = vpop.eup %7156 }
0x47e4   :  { %6646 = vmatmul.mubr.msk.f32.vlgmr.msra.gmra.mrb[68].mxu0 %vm79_vm1, %v7157_v35  ;;  %v7159_v63 = vpop.eup %7158 }
0x47e5   :  { %v2659_v62 = vsel %vm2635_vm13, %v7159_v63, 0.0  ;;  %v7161_v6 = vpop.eup %7160 }
0x47e6   :  { %v3816_v25 = vsel %vm2635_vm13, %v7161_v6, 0.0  ;;  %v7163_v9 = vpop.eup %7162 }
0x47e7   :  { %v4974_v15 = vsel %vm2635_vm13, %v7163_v9, 0.0 }
0x48b7   :  { %v5526_v12 = vpop.f32.mrb[68].mxu0 }
0x48b8   :  { %v5527_v39 = vadd.f32 %v5526_v12, %v7782_v60  ;;  %v6647_v48 = vpop.f32.mrb[69].mxu0  ;;  %v3235_v60 = vsub.f32 %v7863_v27, %v7867_v56 }
0x48ba   :  { %v5530_v58 = vsel %vm2635_vm13, %v5527_v39, -inf  ;;  %v3236_v31 = vmul.f32 1.442695, %v3235_v60 }
0x48bb   :  { %5531 = vmax.xlane.f32.xlu0 %v5530_v58 }
0x48bc   :  { %7164 = vpow2.f32 %v3236_v31 }
0x48bd   :  { %7166 = vpow2.f32 %v4393_v18 }
0x48bf   :  { %2660 = vadd.xlane.f32.xlu0 %v2659_v62 }
0x48c3   :  { %3817 = vadd.xlane.f32.xlu0 %v3816_v25 }
0x48c6   :  { %v7165_v4 = vpop.eup %7164 }
0x48c7   :  { %4975 = vadd.xlane.f32.xlu0 %v4974_v15  ;;  %v3238_v27 = vsel %vm2635_vm13, %v7165_v4, 0.0  ;;  %v7167_v56 = vpop.eup %7166 }
0x48c8   :  { %v4395_v53 = vsel %vm2635_vm13, %v7167_v56, 0.0 }
0x4948   :  { %v5532_v41 = vpop.xlane.xlu0 %5531 }
0x4949   :  { %vm5533_vm0 = vcmp.ge.f32.partialorder %v5527_v39, %v5532_v41  ;;  %v5550_v46 = vsub.f32 %v5527_v39, %v5532_v41 }
0x494a   :  { %v5534_v49 = vsel %vm5533_vm0, %v7640_v7, 64 }
0x494b   :  { %v5535_v51 = vsel %vm2635_vm13, %v5534_v49, 2147483647  ;;  %v5551_v13 = vmul.f32 1.442695, %v5550_v46 }
0x494c   :  { %v5537_v42 = vshra.s32 %v5535_v51, 16  ;;  %v5536_v37 = vand.u32 65535, %v5535_v51  ;;  %v2661_v5 = vpop.xlane.xlu0 %2660 }
0x494d   :  { %7168 = vpow2.f32 %v5551_v13 }
0x494e   :  { %v5539_v23 = vcvt.s32.f32 %v5537_v42  ;;  %v5538_v17 = vcvt.s32.f32 %v5536_v37  ;;  %7170 = vrcp.f32 %v2661_v5 }
0x4950   :  { %5540 = vmin.xlane.f32.xlu1 %v5539_v23  ;;  %v3818_v3 = vpop.xlane.xlu0 %3817 }
0x4954   :  { %3239 = vadd.xlane.f32.xlu1 %v3238_v27  ;;  %v4976_v32 = vpop.xlane.xlu0 %4975 }
0x4957   :  { %v7169_v36 = vpop.eup %7168 }
0x4958   :  { %4396 = vadd.xlane.f32.xlu1 %v4395_v53  ;;  %v5553_v55 = vsel %vm2635_vm13, %v7169_v36, 0.0  ;;  %v7171_v38 = vpop.eup %7170 }
0x4959   :  { %v2665_v50 = vsel %vm2663_vm7, %v7171_v38, 0.0 }
0x495c   :  { %5554 = vadd.xlane.f32.xlu1 %v5553_v55 }
0x49dd   :  { %v5541_v8 = vpop.xlane.xlu1 %5540 }
0x49de   :  { %vm5542_vm1 = vcmp.eq.f32.partialorder %v5539_v23, %v5541_v8 }
0x49df   :  { %v5543_v40 = vsel %vm5542_vm1, %v5538_v17, inf }
0x49e0   :  { %5544 = vmin.xlane.f32.xlu0 %v5543_v40 }
0x49e1   :  { %v3240_v22 = vpop.xlane.xlu1 %3239 }
0x49e2   :  { %7172 = vrcp.f32 %v3240_v22 }
0x49e3   :  { %7174 = vrcp.f32 %v3818_v3 }
0x49e5   :  { %v4397_v26 = vpop.xlane.xlu1 %4396 }
0x49e6   :  { %7176 = vrcp.f32 %v4397_v26 }
0x49e7   :  { %7178 = vrcp.f32 %v4976_v32 }
0x49e9   :  { %v5555_v57 = vpop.xlane.xlu1 %5554 }
0x49ea   :  { %7180 = vrcp.f32 %v5555_v57 }
0x49ec   :  { %v7173_v14 = vpop.eup %7172 }
0x49ed   :  { %v3243_v16 = vsel %vm2062_vm2, %v7173_v14, %v2665_v50  ;;  %v7175_v52 = vpop.eup %7174 }
0x49ee   :  { %v3822_v47 = vsel %vm3820_vm14, %v7175_v52, %v3243_v16 }
0x49f0   :  { %v7177_v19 = vpop.eup %7176 }
0x49f1   :  { %v4401_v20 = vsel %vm4399_vm6, %v7177_v19, %v3822_v47  ;;  %v7179_v21 = vpop.eup %7178 }
0x49f2   :  { %v4980_v11 = vsel %vm4978_vm15, %v7179_v21, %v4401_v20 }
0x49f4   :  { %v7181_v24 = vpop.eup %7180 }
0x49f5   :  { %v5559_v28 = vsel %vm5557_vm3, %v7181_v24, %v4980_v11 }
0x49f6   :  { %5562 = vst.msk [vmem:[#allocation6] sm:$0x1] %vm5560_vm11, %v5559_v28 }
0x49f7   :  { %7216 = shalt.err (!%p7213_p12)
}
0x49f8   :  { %s7217_s7 = scalar_lea.hbm %s8230_s3, 16 }
0x49f9   :  { %p7218_p13 = scmp.ne.s32.totalorder %s8230_s3, %s7217_s7  ;;  %p7221_p0 = scmp.lt.u32.totalorder %s7217_s7, %s8230_s3 }
0x49fb   :  { %p7223_p1 = pnand %p7221_p0, %p7218_p13 }
0x49fd   :  { %7226 = shalt.err (!%p7223_p1)
}
0x49fe   :  { %5582 = dma.vmem_to_hbm [thread:$0]  %s5580_s29, 16, %s8230_s3, [#allocation7]   ;;  %v5547_v33 = vcvt.f32.s32 %v5541_v8 }
0x49ff   :  { %s7264_s14 = smov [#allocation5]  }
0x4a00   :  { %v5548_v29 = vshll.u32 %v5547_v33, 16  ;;  %s5569_s15 = sshll.u32 %s7264_s14, 4  ;;  %s5570_s15 = int_to_ptr.vmem [resolvable:$true] %s5569_s15 }
0x4a01   :  { %s7227_s16 = scalar_lea.vmem %s5570_s15, 16  ;;  %s7231_s17 = scalar_lea.vmem %s5570_s15, 32 }
0x4a02   :  { %p7228_p2 = scmp.ne.s32.totalorder %s5570_s15, %s7227_s16  ;;  %p7232_p3 = scmp.lt.s32.totalorder %s5570_s15, %s5570_s15 }
0x4a03   :  { %p7233_p4 = scmp.lt.s32.totalorder %s7231_s17, %s7227_s16 }
0x4a05   :  { %p7234_p5 = por %p7233_p4, %p7232_p3 }
0x4a07   :  { %p7235_p6 = pnand %p7234_p5, %p7228_p2 }
0x4a6d   :  { %v5545_v45 = vpop.xlane.xlu0 %5544 }
0x4a6e   :  { %v5546_v30 = vcvt.f32.s32 %v5545_v45 }
0x4a70   :  { %v5549_v54 = vadd.s32 %v5548_v29, %v5546_v30 }
0x4a72   :  { %v5558_v34 = vsel %vm5557_vm3, %v5549_v54, %v8128_v2 }
0x4a73   :  { %5561 = vst.msk [vmem:[#allocation5] sm:$0x1] %vm5560_vm11, %v5558_v34 }
0x4a74   :  { %7238 = shalt.err (!%p7235_p6)
}
0x4a75   :  { %s7239_s19 = scalar_lea.hbm %s8229_s2, 16 }
0x4a76   :  { %p7240_p7 = scmp.ne.s32.totalorder %s8229_s2, %s7239_s19  ;;  %p7243_p8 = scmp.lt.u32.totalorder %s7239_s19, %s8229_s2 }
0x4a78   :  { %p7245_p9 = pnand %p7243_p8, %p7240_p7 }
0x4a7a   :  { %7248 = shalt.err (!%p7245_p9)
}
0x4a7b   :  { %5572 = dma.vmem_to_hbm [thread:$0]  %s5570_s15, 16, %s8229_s2, [#allocation4]  }
0x4a7c   :  { %7251 = dma.done.wait [#allocation4], 16  }
0x4a7d   :  { %7252 = vsyncadd [#allocation4], 4294967280 }
0x4a7e   :  { %7253 = dma.done.wait [#allocation7], 16  }
0x4a7f   :  { %7254 = vsyncadd [#allocation7], 4294967280 }
0x4a80   :  { %5589 = vsyncpa [#allocation3], 1 }
0x4a81   :  { %5590 = vsyncpa [#allocation4], 1 }
0x4a82   :  { %5591 = vsyncpa [#allocation7], 1 }

</bundles_post_ra>
